<compile_context>
chip_gen: v6e
topology: v6e:2x2x1
jax: 0.10.0
libtpu: 0.0.40
codegen_flags: <defaults>
</compile_context>

<pallas_src>
import functools

import jax
import jax.numpy as jnp
from jax.experimental import pallas as pl
from jax.experimental.pallas import tpu as pltpu


def _volrend_kernel(sigma_ref, dists_ref, rgb_ref, zvals_ref, tri_ref, bg_ref,
                    weight_ref, packed_ref, *, distance_scale):
    # x = -(sigma * dist): negated optical depth.  Note log(1 - alpha) == x
    # exactly, so no log/exp round trip is needed for the transmittance.
    x = -(sigma_ref[...] * dists_ref[...] * distance_scale)        # [tB, S]

    # Exclusive cumulative sum of x along the sample axis as an MXU matmul
    # with a resident strictly-upper-triangular ones matrix:
    #   T_excl[:, j] = exp( sum_{i<j} x[:, i] )
    T_excl = jnp.exp(jnp.dot(x, tri_ref[...],
                             preferred_element_type=jnp.float32))  # [tB, S]
    alpha = 1.0 - jnp.exp(x)                                       # [tB, S]

    weight = alpha * T_excl                                        # [tB, S]
    weight_ref[...] = weight

    # ---- reductions over samples ---------------------------------------
    acc = jnp.sum(weight, axis=-1)                                 # [tB]
    depth = jnp.sum(weight * zvals_ref[...], axis=-1)              # [tB]
    rgb_map = jnp.sum(rgb_ref[...] * weight[None, :, :], axis=-1)  # [3, tB]

    # Vectorized background composite: rgb_map + (1 - acc) * bg
    composited = rgb_map + (1.0 - acc)[None, :] * bg_ref[...]      # [3, tB]

    # Single packed lane-dense store: rows = [acc, depth, r, g, b, pad x3]
    tile_b = acc.shape[0]
    packed = jnp.concatenate(
        [acc[None, :], depth[None, :], composited,
         jnp.zeros((3, tile_b), jnp.float32)], axis=0)             # [8, tB]
    packed_ref[...] = packed


def tensor_nerf_render(sigma, dists, z_vals, rgb_cm, bg_col,
                       *, distance_scale=25.0, tile_b=512):
    """Dense TensorNeRF compositing (all samples valid, no tonemap).

    rgb_cm is channel-major [3, B, S]; the upstream shading module should
    emit this layout directly so no standalone transpose is paid here.
    """
    B, S = sigma.shape
    assert rgb_cm.shape == (3, B, S), "rgb must be channel-major [3, B, S]"
    tile_b = min(tile_b, B)
    assert B % tile_b == 0, "B must be a multiple of tile_b"

    # Strictly upper-triangular ones, built once (resident in VMEM: the
    # BlockSpec index_map is constant so it is never re-DMA'd).
    tri = jnp.triu(jnp.ones((S, S), dtype=jnp.float32), k=1)
    bg = bg_col.astype(jnp.float32).reshape(3, 1)

    kernel = functools.partial(_volrend_kernel, distance_scale=distance_scale)

    out_shapes = (
        jax.ShapeDtypeStruct((B, S), jnp.float32),   # weight
        jax.ShapeDtypeStruct((8, B), jnp.float32),   # packed: acc/depth/rgb
    )

    weight, packed = pl.pallas_call(
        kernel,
        out_shape=out_shapes,
        grid_spec=pltpu.PrefetchScalarGridSpec(
            num_scalar_prefetch=0,
            grid=(B // tile_b,),
            in_specs=[
                pl.BlockSpec((tile_b, S), lambda i: (i, 0)),         # sigma
                pl.BlockSpec((tile_b, S), lambda i: (i, 0)),         # dists
                pl.BlockSpec((3, tile_b, S), lambda i: (0, i, 0)),   # rgb cm
                pl.BlockSpec((tile_b, S), lambda i: (i, 0)),         # z_vals
                pl.BlockSpec((S, S), lambda i: (0, 0)),              # tri
                pl.BlockSpec((3, 1), lambda i: (0, 0)),              # bg
            ],
            out_specs=[
                pl.BlockSpec((tile_b, S), lambda i: (i, 0)),         # weight
                pl.BlockSpec((8, tile_b), lambda i: (0, i)),         # packed
            ],
        ),
        compiler_params=pltpu.CompilerParams(
            dimension_semantics=("parallel",)),
    )(sigma.astype(jnp.float32), dists.astype(jnp.float32),
      rgb_cm.astype(jnp.float32), z_vals.astype(jnp.float32), tri, bg)

    images = {
        "rgb_map": jnp.transpose(packed[2:5], (1, 0)),   # [B, 3]
        "acc_map": packed[0],                            # [B]
        "depth": packed[1],                              # [B]
        "weights": weight,                               # [B, S]
    }
    return images


# ---------------------- pure-JAX reference (for checking) ----------------
def _raw2alpha_ref(sigma, dist):
    alpha = 1.0 - jnp.exp(-sigma * dist)
    ones = jnp.ones((alpha.shape[0], 1), dtype=alpha.dtype)
    T = jnp.cumprod(jnp.concatenate([ones, 1.0 - alpha + 1e-10], axis=-1),
                    axis=-1)
    return alpha * T[:, :-1]


def _render_ref(sigma, dists, z_vals, rgb, bg_col, distance_scale):
    weight = _raw2alpha_ref(sigma, dists * distance_scale)
    acc = jnp.sum(weight, axis=1)
    rgb_map = jnp.sum(weight[..., None] * rgb, axis=1)
    rgb_map = rgb_map + (1.0 - acc[..., None]) * bg_col[None, :]
    depth = jnp.sum(weight * z_vals, axis=1)
    return rgb_map, acc, depth, weight


if __name__ == "__main__":
    key = jax.random.PRNGKey(0)
    k1, k2, k3 = jax.random.split(key, 3)

    B, S = 1024, 64
    distance_scale = 25.0

    sigma = jax.nn.softplus(jax.random.normal(k1, (B, S), dtype=jnp.float32))
    dists = jax.random.uniform(k2, (B, S), minval=0.01, maxval=0.1,
                               dtype=jnp.float32)
    z_vals = jnp.cumsum(dists, axis=-1) + 2.0
    # The upstream shading producer emits channel-major rgb [3, B, S].
    rgb_cm = jax.random.uniform(k3, (3, B, S), dtype=jnp.float32)
    bg_col = jnp.array([1.0, 1.0, 1.0], dtype=jnp.float32)

    images = tensor_nerf_render(sigma, dists, z_vals, rgb_cm, bg_col,
                                distance_scale=distance_scale, tile_b=256)
    jax.block_until_ready(images)

    rgb_bsd = jnp.transpose(rgb_cm, (1, 2, 0))   # [B, S, 3] for the reference
    rgb_ref, acc_ref, depth_ref, w_ref = _render_ref(
        sigma, dists, z_vals, rgb_bsd, bg_col, distance_scale)

    assert jnp.allclose(images["weights"], w_ref, rtol=1e-4, atol=1e-5)
    assert jnp.allclose(images["acc_map"], acc_ref, rtol=1e-4, atol=1e-5)
    assert jnp.allclose(images["rgb_map"], rgb_ref, rtol=1e-4, atol=1e-4)
    assert jnp.allclose(images["depth"], depth_ref, rtol=1e-4, atol=1e-4)

    print("KERNEL_OK")
</pallas_src>

<mosaic_0001>
module attributes {stable_mosaic.version = 11 : i64} {
  func.func @_volrend_kernel(%arg0: i32, %arg1: memref<256x64xf32, #tpu.memory_space<vmem>>, %arg2: memref<256x64xf32, #tpu.memory_space<vmem>>, %arg3: memref<3x256x64xf32, #tpu.memory_space<vmem>>, %arg4: memref<256x64xf32, #tpu.memory_space<vmem>>, %arg5: memref<64x64xf32, #tpu.memory_space<vmem>>, %arg6: memref<3x1xf32, #tpu.memory_space<vmem>>, %arg7: memref<256x64xf32, #tpu.memory_space<vmem>>, %arg8: memref<8x256xf32, #tpu.memory_space<vmem>>) attributes {dimension_semantics = [#tpu.dimension_semantics<parallel>], iteration_bounds = array<i64: 4>, scalar_prefetch = 0 : i64, scratch_operands = 0 : i64, tpu.core_type = #tpu.core_type<tc>, window_params = [{transform_indices = @transform_0, window_bounds = array<i64: 256, 64>}, {transform_indices = @transform_1, window_bounds = array<i64: 256, 64>}, {transform_indices = @transform_2, window_bounds = array<i64: 3, 256, 64>}, {transform_indices = @transform_3, window_bounds = array<i64: 256, 64>}, {pipeline_mode = #tpu.pipeline_mode<synchronous>, transform_indices = @transform_4, window_bounds = array<i64: 64, 64>}, {pipeline_mode = #tpu.pipeline_mode<synchronous>, transform_indices = @transform_5, window_bounds = array<i64: 3, 1>}, {transform_indices = @transform_6, window_bounds = array<i64: 256, 64>}, {transform_indices = @transform_7, window_bounds = array<i64: 8, 256>}]} {
    %c0 = arith.constant 0 : index
    %c0_0 = arith.constant 0 : index
    %0 = vector.load %arg1[%c0, %c0_0] : memref<256x64xf32, #tpu.memory_space<vmem>>, vector<256x64xf32>
    %c0_1 = arith.constant 0 : index
    %c0_2 = arith.constant 0 : index
    %1 = vector.load %arg2[%c0_1, %c0_2] : memref<256x64xf32, #tpu.memory_space<vmem>>, vector<256x64xf32>
    %2 = arith.mulf %0, %1 : vector<256x64xf32>
    %cst = arith.constant 2.500000e+01 : f32
    %3 = vector.broadcast %cst : f32 to vector<256x64xf32>
    %4 = arith.mulf %2, %3 : vector<256x64xf32>
    %cst_3 = arith.constant 0.000000e+00 : f32
    %5 = vector.broadcast %cst_3 : f32 to vector<256x64xf32>
    %6 = arith.subf %5, %4 : vector<256x64xf32>
    %c0_4 = arith.constant 0 : index
    %c0_5 = arith.constant 0 : index
    %7 = vector.load %arg5[%c0_4, %c0_5] : memref<64x64xf32, #tpu.memory_space<vmem>>, vector<64x64xf32>
    %cst_6 = arith.constant dense<0.000000e+00> : vector<256x64xf32>
    %8 = tpu.matmul %6, %7, %cst_6 {dimension_numbers = #tpu.dot_dimension_numbers<[1], [0], [0], [1], [0, 0, 1, 1], [], []>} : vector<256x64xf32>, vector<64x64xf32>, vector<256x64xf32> -> vector<256x64xf32>
    %9 = math.exp %8 : vector<256x64xf32>
    %10 = math.exp %6 : vector<256x64xf32>
    %cst_7 = arith.constant 1.000000e+00 : f32
    %11 = vector.broadcast %cst_7 : f32 to vector<256x64xf32>
    %12 = arith.subf %11, %10 : vector<256x64xf32>
    %13 = arith.mulf %12, %9 : vector<256x64xf32>
    %c0_8 = arith.constant 0 : index
    %c0_9 = arith.constant 0 : index
    %14 = vector.load %arg7[%c0_8, %c0_9] : memref<256x64xf32, #tpu.memory_space<vmem>>, vector<256x64xf32>
    tpu.vector_store %arg7[%c0_8, %c0_9], %13 {strides = array<i32>} : memref<256x64xf32, #tpu.memory_space<vmem>>, vector<256x64xf32>,
    %cst_10 = arith.constant dense<0.000000e+00> : vector<256xf32>
    %15 = vector.multi_reduction <add>, %13, %cst_10 [1] : vector<256x64xf32> to vector<256xf32>
    %c0_11 = arith.constant 0 : index
    %c0_12 = arith.constant 0 : index
    %16 = vector.load %arg4[%c0_11, %c0_12] : memref<256x64xf32, #tpu.memory_space<vmem>>, vector<256x64xf32>
    %17 = arith.mulf %13, %16 : vector<256x64xf32>
    %cst_13 = arith.constant dense<0.000000e+00> : vector<256xf32>
    %18 = vector.multi_reduction <add>, %17, %cst_13 [1] : vector<256x64xf32> to vector<256xf32>
    %c0_14 = arith.constant 0 : index
    %c0_15 = arith.constant 0 : index
    %c0_16 = arith.constant 0 : index
    %19 = vector.load %arg3[%c0_14, %c0_15, %c0_16] : memref<3x256x64xf32, #tpu.memory_space<vmem>>, vector<3x256x64xf32>
    %20 = vector.shape_cast %13 : vector<256x64xf32> to vector<1x256x64xf32>
    %21 = vector.broadcast %20 : vector<1x256x64xf32> to vector<3x256x64xf32>
    %22 = arith.mulf %19, %21 : vector<3x256x64xf32>
    %cst_17 = arith.constant dense<0.000000e+00> : vector<3x256xf32>
    %23 = vector.multi_reduction <add>, %22, %cst_17 [2] : vector<3x256x64xf32> to vector<3x256xf32>
    %cst_18 = arith.constant 1.000000e+00 : f32
    %24 = vector.broadcast %cst_18 : f32 to vector<256xf32>
    %25 = arith.subf %24, %15 : vector<256xf32>
    %26 = vector.shape_cast %25 : vector<256xf32> to vector<1x256xf32>
    %c0_19 = arith.constant 0 : index
    %c0_20 = arith.constant 0 : index
    %27 = vector.load %arg6[%c0_19, %c0_20] : memref<3x1xf32, #tpu.memory_space<vmem>>, vector<3x1xf32>
    %28 = vector.broadcast %26 : vector<1x256xf32> to vector<3x256xf32>
    %29 = vector.broadcast %27 : vector<3x1xf32> to vector<3x256xf32>
    %30 = arith.mulf %28, %29 : vector<3x256xf32>
    %31 = arith.addf %23, %30 : vector<3x256xf32>
    %32 = vector.shape_cast %15 : vector<256xf32> to vector<1x256xf32>
    %33 = vector.shape_cast %18 : vector<256xf32> to vector<1x256xf32>
    %cst_21 = arith.constant 0.000000e+00 : f32
    %34 = vector.broadcast %cst_21 : f32 to vector<3x256xf32>
    %35 = tpu.concatenate %32, %33, %31, %34 in 0 : vector<1x256xf32>, vector<1x256xf32>, vector<3x256xf32>, vector<3x256xf32> -> vector<8x256xf32>
    %c0_22 = arith.constant 0 : index
    %c0_23 = arith.constant 0 : index
    %36 = vector.load %arg8[%c0_22, %c0_23] : memref<8x256xf32, #tpu.memory_space<vmem>>, vector<8x256xf32>
    tpu.vector_store %arg8[%c0_22, %c0_23], %35 {strides = array<i32>} : memref<8x256xf32, #tpu.memory_space<vmem>>, vector<8x256xf32>,
    return
  }
  func.func @transform_0(%arg0: i32) -> (i32, i32) {
    %c0_i32 = arith.constant 0 : i32
    %c0_i32_0 = arith.constant 0 : i32
    return %arg0, %c0_i32 : i32, i32
  }
  func.func @transform_1(%arg0: i32) -> (i32, i32) {
    %c0_i32 = arith.constant 0 : i32
    %c0_i32_0 = arith.constant 0 : i32
    return %arg0, %c0_i32 : i32, i32
  }
  func.func @transform_2(%arg0: i32) -> (i32, i32, i32) {
    %c0_i32 = arith.constant 0 : i32
    %c0_i32_0 = arith.constant 0 : i32
    %c0_i32_1 = arith.constant 0 : i32
    return %c0_i32, %arg0, %c0_i32_0 : i32, i32, i32
  }
  func.func @transform_3(%arg0: i32) -> (i32, i32) {
    %c0_i32 = arith.constant 0 : i32
    %c0_i32_0 = arith.constant 0 : i32
    return %arg0, %c0_i32 : i32, i32
  }
  func.func @transform_4(%arg0: i32) -> (i32, i32) {
    %c0_i32 = arith.constant 0 : i32
    %c0_i32_0 = arith.constant 0 : i32
    %c0_i32_1 = arith.constant 0 : i32
    return %c0_i32, %c0_i32_0 : i32, i32
  }
  func.func @transform_5(%arg0: i32) -> (i32, i32) {
    %c0_i32 = arith.constant 0 : i32
    %c0_i32_0 = arith.constant 0 : i32
    %c0_i32_1 = arith.constant 0 : i32
    return %c0_i32, %c0_i32_0 : i32, i32
  }
  func.func @transform_6(%arg0: i32) -> (i32, i32) {
    %c0_i32 = arith.constant 0 : i32
    %c0_i32_0 = arith.constant 0 : i32
    return %arg0, %c0_i32 : i32, i32
  }
  func.func @transform_7(%arg0: i32) -> (i32, i32) {
    %c0_i32 = arith.constant 0 : i32
    %c0_i32_0 = arith.constant 0 : i32
    return %c0_i32, %arg0 : i32, i32
  }
}

</mosaic_0001>

<bundles_post_ra>
// kernel: tpu_custom_call.1
= control target key start
LH: loop header
LB: loop body
LE: loop exit
PB: predicated region body
PF: predicated region fallthrough
CT: control target
= control target key end

     0   :  { %13 = vsyncpa [#allocation4], 0  ;;  %s6922_s0 = inlined_call_operand.vmem [shape: f32[1024,64], index: 0, kind: input, shape index: {}]   ;;  %s6923_s1 = inlined_call_operand.vmem [shape: f32[1024,64], index: 1, kind: input, shape index: {}]   ;;  %s6924_s2 = inlined_call_operand.vmem [shape: f32[3,1024,64], index: 2, kind: input, shape index: {}]   ;;  %s6925_s3 = inlined_call_operand.vmem [shape: f32[1024,64], index: 3, kind: input, shape index: {}]   ;;  %s6926_s4 = inlined_call_operand.vmem [shape: f32[64,64], index: 4, kind: input, shape index: {}]   ;;  %s6927_s5 = inlined_call_operand.vmem [shape: f32[3,1], index: 5, kind: input, shape index: {}]   ;;  %s6928_s6 = inlined_call_operand.vmem [shape: f32[1024,64], index: 6, kind: output, shape index: {0}]   ;;  %s6929_s7 = inlined_call_operand.hbm [shape: f32[8,1024], index: 7, kind: output, shape index: {1}]  }
   0x1   :  { %15 = vsyncpa [#allocation4 + $0x1], 0  ;;  %s4362_s24 = smov 0   ;;  %s4364_s25 = smov 0  }
   0x2   :  { %s4366_s26 = smov 0   ;;  %s4368_s27 = smov 0  }
   0x3 LB: > { %s4383_s28 = sadd.s32 4294967295, %s4318_s27   ;;  %s3912_s29 = sadd.s32 4294967294, %s4318_s27   ;;  %s4318_s27 = sphi %s4368_s27, %s7202_s27   ;;  %s4314_s26 = sphi %s4366_s26, %s7201_s26   ;;  %s4310_s25 = sphi %s4364_s25, %s7200_s25   ;;  %s4306_s24 = sphi %s4362_s24, %s7199_s24  }
   0x4   : > { %s4387_s30 = sadd.s32 1, %s4318_s27   ;;  %s80_s8 = sadd.s32 1, %s4314_s26 }
   0x5   : > { %s77_s9 = ssub.s32 %s4318_s27, %s4387_s30  ;;  %p87_p0 = scmp.ne.s32.totalorder %s4314_s26, %s4310_s25 }
   0x6   : > { %p78_p1 = scmp.eq.s32.totalorder %s77_s9, 0  ;;  %p88_p2 = scmp.eq.s32.totalorder %s4318_s27, 0 }
   0x7   : > { %p211_p3 = scmp.eq.s32.totalorder %s4383_s28, 3  ;;  %p216_p4 = scmp.ne.s32.totalorder %s4310_s25, %s4306_s24 }
   0x8   : > { %s4399_s10 = scalar_select %p78_p1, %s4314_s26, %s80_s8  }
   0x9   : > { %p89_p5 = por %p88_p2, %p87_p0  ;;  %p4401_p6 = por %p211_p3, %p87_p0 }
   0xa   : > { %p217_p7 = scmp.eq.s32.totalorder %s3912_s29, 3  ;;  %p3914_p9 = scmp.ge.s32.totalorder %s4318_s27, 4 }
   0xc   : > { %p4405_p8 = por %p217_p7, %p216_p4  ;;  %239 = sbr.rel (%p3914_p9) target bundleno = 70 (0x46), region = 24 }
  0x11   : > { %260 = sbr.rel (!%p89_p5) target bundleno = 70 (0x46), region = 36  ;;  %s262_s13 = sand.u32 (%p89_p5), 1, %s4314_s26  }
  0x12   : > { %s3964_s14 = sshll.u32 (%p89_p5), %s4318_s27, 8  ;;  %s4086_s15 = smul.u32 (%p89_p5), 768, %s262_s13 }
  0x13   : > { %s4415_s18 = scalar_lea.vmem (%p89_p5), %s6924_s2, %s3964_s14 }
  0x14   : > { %v486_v0 = vld [vmem:[%s4415_s18] sm:$0xff] (%p89_p5)  ;;  %v488_v1 = vld [vmem:[%s4415_s18 + $0x8] sm:$0xff] (%p89_p5)  ;;  %v490_v2 = vld [vmem:[%s4415_s18 + $0x10] sm:$0xff] (%p89_p5)  ;;  %s4423_s19 = scalar_lea.vmem (%p89_p5), [#allocation2], %s4086_s15 }
  0x15   : > { %v492_v3 = vld [vmem:[%s4415_s18 + $0x18] sm:$0xff] (%p89_p5)  ;;  %v494_v4 = vld [vmem:[%s4415_s18 + $0x20] sm:$0xff] (%p89_p5)  ;;  %v496_v5 = vld [vmem:[%s4415_s18 + $0x28] sm:$0xff] (%p89_p5)  ;;  %487 = vst [vmem:[%s4423_s19] sm:$0xff] (%p89_p5), %v486_v0 }
  0x16   : > { %489 = vst [vmem:[%s4423_s19 + $0x8] sm:$0xff] %v488_v1  ;;  %491 = vst [vmem:[%s4423_s19 + $0x10] sm:$0xff] %v490_v2  ;;  %v498_v6 = vld [vmem:[%s4415_s18 + $0x30] sm:$0xff]  ;;  %v500_v7 = vld [vmem:[%s4415_s18 + $0x38] sm:$0xff] }
  0x17   : > { %493 = vst [vmem:[%s4423_s19 + $0x18] sm:$0xff] %v492_v3  ;;  %495 = vst [vmem:[%s4423_s19 + $0x20] sm:$0xff] %v494_v4  ;;  %v502_v8 = vld [vmem:[%s4415_s18 + $0x40] sm:$0xff]  ;;  %v504_v9 = vld [vmem:[%s4415_s18 + $0x48] sm:$0xff] }
  0x18   : > { %497 = vst [vmem:[%s4423_s19 + $0x28] sm:$0xff] %v496_v5  ;;  %499 = vst [vmem:[%s4423_s19 + $0x30] sm:$0xff] %v498_v6  ;;  %v506_v10 = vld [vmem:[%s4415_s18 + $0x50] sm:$0xff]  ;;  %v508_v11 = vld [vmem:[%s4415_s18 + $0x58] sm:$0xff] }
  0x19   : > { %501 = vst [vmem:[%s4423_s19 + $0x38] sm:$0xff] %v500_v7  ;;  %503 = vst [vmem:[%s4423_s19 + $0x40] sm:$0xff] %v502_v8  ;;  %v510_v12 = vld [vmem:[%s4415_s18 + $0x60] sm:$0xff]  ;;  %v512_v13 = vld [vmem:[%s4415_s18 + $0x68] sm:$0xff] }
  0x1a   : > { %505 = vst [vmem:[%s4423_s19 + $0x48] sm:$0xff] %v504_v9  ;;  %507 = vst [vmem:[%s4423_s19 + $0x50] sm:$0xff] %v506_v10  ;;  %v514_v14 = vld [vmem:[%s4415_s18 + $0x70] sm:$0xff]  ;;  %v516_v15 = vld [vmem:[%s4415_s18 + $0x78] sm:$0xff] }
  0x1b   : > { %509 = vst [vmem:[%s4423_s19 + $0x58] sm:$0xff] %v508_v11  ;;  %511 = vst [vmem:[%s4423_s19 + $0x60] sm:$0xff] %v510_v12  ;;  %v518_v16 = vld [vmem:[%s4415_s18 + $0x80] sm:$0xff]  ;;  %v520_v17 = vld [vmem:[%s4415_s18 + $0x88] sm:$0xff] }
  0x1c   : > { %513 = vst [vmem:[%s4423_s19 + $0x68] sm:$0xff] %v512_v13  ;;  %515 = vst [vmem:[%s4423_s19 + $0x70] sm:$0xff] %v514_v14  ;;  %v522_v18 = vld [vmem:[%s4415_s18 + $0x90] sm:$0xff]  ;;  %v524_v19 = vld [vmem:[%s4415_s18 + $0x98] sm:$0xff] }
  0x1d   : > { %517 = vst [vmem:[%s4423_s19 + $0x78] sm:$0xff] %v516_v15  ;;  %519 = vst [vmem:[%s4423_s19 + $0x80] sm:$0xff] %v518_v16  ;;  %v526_v20 = vld [vmem:[%s4415_s18 + $0xa0] sm:$0xff]  ;;  %v528_v21 = vld [vmem:[%s4415_s18 + $0xa8] sm:$0xff] }
  0x1e   : > { %521 = vst [vmem:[%s4423_s19 + $0x88] sm:$0xff] %v520_v17  ;;  %523 = vst [vmem:[%s4423_s19 + $0x90] sm:$0xff] %v522_v18  ;;  %v530_v22 = vld [vmem:[%s4415_s18 + $0xb0] sm:$0xff]  ;;  %v532_v23 = vld [vmem:[%s4415_s18 + $0xb8] sm:$0xff] }
  0x1f   : > { %525 = vst [vmem:[%s4423_s19 + $0x98] sm:$0xff] %v524_v19  ;;  %527 = vst [vmem:[%s4423_s19 + $0xa0] sm:$0xff] %v526_v20  ;;  %v534_v24 = vld [vmem:[%s4415_s18 + $0xc0] sm:$0xff]  ;;  %v536_v25 = vld [vmem:[%s4415_s18 + $0xc8] sm:$0xff] }
  0x20   : > { %529 = vst [vmem:[%s4423_s19 + $0xa8] sm:$0xff] %v528_v21  ;;  %531 = vst [vmem:[%s4423_s19 + $0xb0] sm:$0xff] %v530_v22  ;;  %v538_v26 = vld [vmem:[%s4415_s18 + $0xd0] sm:$0xff]  ;;  %v540_v27 = vld [vmem:[%s4415_s18 + $0xd8] sm:$0xff] }
  0x21   : > { %533 = vst [vmem:[%s4423_s19 + $0xb8] sm:$0xff] %v532_v23  ;;  %535 = vst [vmem:[%s4423_s19 + $0xc0] sm:$0xff] %v534_v24  ;;  %v542_v28 = vld [vmem:[%s4415_s18 + $0xe0] sm:$0xff]  ;;  %v544_v29 = vld [vmem:[%s4415_s18 + $0xe8] sm:$0xff] }
  0x22   : > { %537 = vst [vmem:[%s4423_s19 + $0xc8] sm:$0xff] %v536_v25  ;;  %539 = vst [vmem:[%s4423_s19 + $0xd0] sm:$0xff] %v538_v26  ;;  %v546_v30 = vld [vmem:[%s4415_s18 + $0xf0] sm:$0xff]  ;;  %v548_v31 = vld [vmem:[%s4415_s18 + $0xf8] sm:$0xff] }
  0x23   : > { %541 = vst [vmem:[%s4423_s19 + $0xd8] sm:$0xff] %v540_v27  ;;  %543 = vst [vmem:[%s4423_s19 + $0xe0] sm:$0xff] %v542_v28  ;;  %v550_v32 = vld [vmem:[%s4415_s18 + $0x400] sm:$0xff]  ;;  %v552_v33 = vld [vmem:[%s4415_s18 + $0x408] sm:$0xff] }
  0x24   : > { %545 = vst [vmem:[%s4423_s19 + $0xe8] sm:$0xff] %v544_v29  ;;  %547 = vst [vmem:[%s4423_s19 + $0xf0] sm:$0xff] %v546_v30  ;;  %v554_v34 = vld [vmem:[%s4415_s18 + $0x410] sm:$0xff]  ;;  %v556_v35 = vld [vmem:[%s4415_s18 + $0x418] sm:$0xff] }
  0x25   : > { %549 = vst [vmem:[%s4423_s19 + $0xf8] sm:$0xff] %v548_v31  ;;  %551 = vst [vmem:[%s4423_s19 + $0x100] sm:$0xff] %v550_v32  ;;  %v558_v36 = vld [vmem:[%s4415_s18 + $0x420] sm:$0xff]  ;;  %v560_v37 = vld [vmem:[%s4415_s18 + $0x428] sm:$0xff] }
  0x26   : > { %553 = vst [vmem:[%s4423_s19 + $0x108] sm:$0xff] %v552_v33  ;;  %555 = vst [vmem:[%s4423_s19 + $0x110] sm:$0xff] %v554_v34  ;;  %v562_v38 = vld [vmem:[%s4415_s18 + $0x430] sm:$0xff]  ;;  %v564_v39 = vld [vmem:[%s4415_s18 + $0x438] sm:$0xff] }
  0x27   : > { %557 = vst [vmem:[%s4423_s19 + $0x118] sm:$0xff] %v556_v35  ;;  %559 = vst [vmem:[%s4423_s19 + $0x120] sm:$0xff] %v558_v36  ;;  %v566_v40 = vld [vmem:[%s4415_s18 + $0x440] sm:$0xff]  ;;  %v568_v41 = vld [vmem:[%s4415_s18 + $0x448] sm:$0xff] }
  0x28   : > { %561 = vst [vmem:[%s4423_s19 + $0x128] sm:$0xff] %v560_v37  ;;  %563 = vst [vmem:[%s4423_s19 + $0x130] sm:$0xff] %v562_v38  ;;  %v570_v42 = vld [vmem:[%s4415_s18 + $0x450] sm:$0xff]  ;;  %v572_v43 = vld [vmem:[%s4415_s18 + $0x458] sm:$0xff] }
  0x29   : > { %565 = vst [vmem:[%s4423_s19 + $0x138] sm:$0xff] %v564_v39  ;;  %567 = vst [vmem:[%s4423_s19 + $0x140] sm:$0xff] %v566_v40  ;;  %v574_v44 = vld [vmem:[%s4415_s18 + $0x460] sm:$0xff]  ;;  %v576_v45 = vld [vmem:[%s4415_s18 + $0x468] sm:$0xff] }
  0x2a   : > { %569 = vst [vmem:[%s4423_s19 + $0x148] sm:$0xff] %v568_v41  ;;  %571 = vst [vmem:[%s4423_s19 + $0x150] sm:$0xff] %v570_v42  ;;  %v578_v46 = vld [vmem:[%s4415_s18 + $0x470] sm:$0xff]  ;;  %v580_v47 = vld [vmem:[%s4415_s18 + $0x478] sm:$0xff] }
  0x2b   : > { %573 = vst [vmem:[%s4423_s19 + $0x158] sm:$0xff] %v572_v43  ;;  %575 = vst [vmem:[%s4423_s19 + $0x160] sm:$0xff] %v574_v44  ;;  %v582_v48 = vld [vmem:[%s4415_s18 + $0x480] sm:$0xff]  ;;  %v584_v49 = vld [vmem:[%s4415_s18 + $0x488] sm:$0xff] }
  0x2c   : > { %577 = vst [vmem:[%s4423_s19 + $0x168] sm:$0xff] %v576_v45  ;;  %579 = vst [vmem:[%s4423_s19 + $0x170] sm:$0xff] %v578_v46  ;;  %v586_v50 = vld [vmem:[%s4415_s18 + $0x490] sm:$0xff]  ;;  %v588_v51 = vld [vmem:[%s4415_s18 + $0x498] sm:$0xff] }
  0x2d   : > { %581 = vst [vmem:[%s4423_s19 + $0x178] sm:$0xff] %v580_v47  ;;  %583 = vst [vmem:[%s4423_s19 + $0x180] sm:$0xff] %v582_v48  ;;  %v590_v52 = vld [vmem:[%s4415_s18 + $0x4a0] sm:$0xff]  ;;  %v592_v53 = vld [vmem:[%s4415_s18 + $0x4a8] sm:$0xff] }
  0x2e   : > { %585 = vst [vmem:[%s4423_s19 + $0x188] sm:$0xff] %v584_v49  ;;  %587 = vst [vmem:[%s4423_s19 + $0x190] sm:$0xff] %v586_v50  ;;  %v594_v54 = vld [vmem:[%s4415_s18 + $0x4b0] sm:$0xff]  ;;  %v596_v55 = vld [vmem:[%s4415_s18 + $0x4b8] sm:$0xff] }
  0x2f   : > { %589 = vst [vmem:[%s4423_s19 + $0x198] sm:$0xff] %v588_v51  ;;  %591 = vst [vmem:[%s4423_s19 + $0x1a0] sm:$0xff] %v590_v52  ;;  %v598_v56 = vld [vmem:[%s4415_s18 + $0x4c0] sm:$0xff]  ;;  %v600_v57 = vld [vmem:[%s4415_s18 + $0x4c8] sm:$0xff] }
  0x30   : > { %593 = vst [vmem:[%s4423_s19 + $0x1a8] sm:$0xff] %v592_v53  ;;  %595 = vst [vmem:[%s4423_s19 + $0x1b0] sm:$0xff] %v594_v54  ;;  %v602_v58 = vld [vmem:[%s4415_s18 + $0x4d0] sm:$0xff]  ;;  %v604_v59 = vld [vmem:[%s4415_s18 + $0x4d8] sm:$0xff] }
  0x31   : > { %597 = vst [vmem:[%s4423_s19 + $0x1b8] sm:$0xff] %v596_v55  ;;  %599 = vst [vmem:[%s4423_s19 + $0x1c0] sm:$0xff] %v598_v56  ;;  %v606_v60 = vld [vmem:[%s4415_s18 + $0x4e0] sm:$0xff]  ;;  %v608_v61 = vld [vmem:[%s4415_s18 + $0x4e8] sm:$0xff] }
  0x32   : > { %601 = vst [vmem:[%s4423_s19 + $0x1c8] sm:$0xff] %v600_v57  ;;  %603 = vst [vmem:[%s4423_s19 + $0x1d0] sm:$0xff] %v602_v58  ;;  %v610_v62 = vld [vmem:[%s4415_s18 + $0x4f0] sm:$0xff]  ;;  %v612_v63 = vld [vmem:[%s4415_s18 + $0x4f8] sm:$0xff] }
  0x33   : > { %605 = vst [vmem:[%s4423_s19 + $0x1d8] sm:$0xff] %v604_v59  ;;  %607 = vst [vmem:[%s4423_s19 + $0x1e0] sm:$0xff] %v606_v60  ;;  %v614_v0 = vld [vmem:[%s4415_s18 + $0x800] sm:$0xff]  ;;  %v616_v1 = vld [vmem:[%s4415_s18 + $0x808] sm:$0xff] }
  0x34   : > { %609 = vst [vmem:[%s4423_s19 + $0x1e8] sm:$0xff] %v608_v61  ;;  %611 = vst [vmem:[%s4423_s19 + $0x1f0] sm:$0xff] %v610_v62  ;;  %v618_v2 = vld [vmem:[%s4415_s18 + $0x810] sm:$0xff]  ;;  %v620_v3 = vld [vmem:[%s4415_s18 + $0x818] sm:$0xff] }
  0x35   : > { %613 = vst [vmem:[%s4423_s19 + $0x1f8] sm:$0xff] %v612_v63  ;;  %615 = vst [vmem:[%s4423_s19 + $0x200] sm:$0xff] %v614_v0  ;;  %v622_v4 = vld [vmem:[%s4415_s18 + $0x820] sm:$0xff]  ;;  %v624_v5 = vld [vmem:[%s4415_s18 + $0x828] sm:$0xff] }
  0x36   : > { %617 = vst [vmem:[%s4423_s19 + $0x208] sm:$0xff] %v616_v1  ;;  %619 = vst [vmem:[%s4423_s19 + $0x210] sm:$0xff] %v618_v2  ;;  %v626_v6 = vld [vmem:[%s4415_s18 + $0x830] sm:$0xff]  ;;  %v628_v7 = vld [vmem:[%s4415_s18 + $0x838] sm:$0xff] }
  0x37   : > { %621 = vst [vmem:[%s4423_s19 + $0x218] sm:$0xff] %v620_v3  ;;  %623 = vst [vmem:[%s4423_s19 + $0x220] sm:$0xff] %v622_v4  ;;  %v630_v8 = vld [vmem:[%s4415_s18 + $0x840] sm:$0xff]  ;;  %v632_v9 = vld [vmem:[%s4415_s18 + $0x848] sm:$0xff] }
  0x38   : > { %625 = vst [vmem:[%s4423_s19 + $0x228] sm:$0xff] %v624_v5  ;;  %627 = vst [vmem:[%s4423_s19 + $0x230] sm:$0xff] %v626_v6  ;;  %v634_v10 = vld [vmem:[%s4415_s18 + $0x850] sm:$0xff]  ;;  %v636_v11 = vld [vmem:[%s4415_s18 + $0x858] sm:$0xff] }
  0x39   : > { %629 = vst [vmem:[%s4423_s19 + $0x238] sm:$0xff] %v628_v7  ;;  %631 = vst [vmem:[%s4423_s19 + $0x240] sm:$0xff] %v630_v8  ;;  %v638_v12 = vld [vmem:[%s4415_s18 + $0x860] sm:$0xff]  ;;  %v640_v13 = vld [vmem:[%s4415_s18 + $0x868] sm:$0xff] }
  0x3a   : > { %633 = vst [vmem:[%s4423_s19 + $0x248] sm:$0xff] %v632_v9  ;;  %635 = vst [vmem:[%s4423_s19 + $0x250] sm:$0xff] %v634_v10  ;;  %v642_v14 = vld [vmem:[%s4415_s18 + $0x870] sm:$0xff]  ;;  %v644_v15 = vld [vmem:[%s4415_s18 + $0x878] sm:$0xff] }
  0x3b   : > { %637 = vst [vmem:[%s4423_s19 + $0x258] sm:$0xff] %v636_v11  ;;  %639 = vst [vmem:[%s4423_s19 + $0x260] sm:$0xff] %v638_v12  ;;  %v646_v16 = vld [vmem:[%s4415_s18 + $0x880] sm:$0xff]  ;;  %v648_v17 = vld [vmem:[%s4415_s18 + $0x888] sm:$0xff] }
  0x3c   : > { %641 = vst [vmem:[%s4423_s19 + $0x268] sm:$0xff] %v640_v13  ;;  %643 = vst [vmem:[%s4423_s19 + $0x270] sm:$0xff] %v642_v14  ;;  %v650_v18 = vld [vmem:[%s4415_s18 + $0x890] sm:$0xff]  ;;  %v652_v19 = vld [vmem:[%s4415_s18 + $0x898] sm:$0xff] }
  0x3d   : > { %645 = vst [vmem:[%s4423_s19 + $0x278] sm:$0xff] %v644_v15  ;;  %647 = vst [vmem:[%s4423_s19 + $0x280] sm:$0xff] %v646_v16  ;;  %v654_v20 = vld [vmem:[%s4415_s18 + $0x8a0] sm:$0xff]  ;;  %v656_v21 = vld [vmem:[%s4415_s18 + $0x8a8] sm:$0xff] }
  0x3e   : > { %649 = vst [vmem:[%s4423_s19 + $0x288] sm:$0xff] %v648_v17  ;;  %651 = vst [vmem:[%s4423_s19 + $0x290] sm:$0xff] %v650_v18  ;;  %v658_v22 = vld [vmem:[%s4415_s18 + $0x8b0] sm:$0xff]  ;;  %v660_v23 = vld [vmem:[%s4415_s18 + $0x8b8] sm:$0xff] }
  0x3f   : > { %653 = vst [vmem:[%s4423_s19 + $0x298] sm:$0xff] %v652_v19  ;;  %655 = vst [vmem:[%s4423_s19 + $0x2a0] sm:$0xff] %v654_v20  ;;  %v662_v24 = vld [vmem:[%s4415_s18 + $0x8c0] sm:$0xff]  ;;  %v664_v25 = vld [vmem:[%s4415_s18 + $0x8c8] sm:$0xff] }
  0x40   : > { %657 = vst [vmem:[%s4423_s19 + $0x2a8] sm:$0xff] %v656_v21  ;;  %659 = vst [vmem:[%s4423_s19 + $0x2b0] sm:$0xff] %v658_v22  ;;  %v666_v26 = vld [vmem:[%s4415_s18 + $0x8d0] sm:$0xff]  ;;  %v668_v27 = vld [vmem:[%s4415_s18 + $0x8d8] sm:$0xff] }
  0x41   : > { %661 = vst [vmem:[%s4423_s19 + $0x2b8] sm:$0xff] %v660_v23  ;;  %663 = vst [vmem:[%s4423_s19 + $0x2c0] sm:$0xff] %v662_v24  ;;  %v670_v28 = vld [vmem:[%s4415_s18 + $0x8e0] sm:$0xff]  ;;  %v672_v29 = vld [vmem:[%s4415_s18 + $0x8e8] sm:$0xff] }
  0x42   : > { %665 = vst [vmem:[%s4423_s19 + $0x2c8] sm:$0xff] %v664_v25  ;;  %667 = vst [vmem:[%s4423_s19 + $0x2d0] sm:$0xff] %v666_v26  ;;  %v674_v30 = vld [vmem:[%s4415_s18 + $0x8f0] sm:$0xff]  ;;  %v676_v31 = vld [vmem:[%s4415_s18 + $0x8f8] sm:$0xff] }
  0x43   : > { %669 = vst [vmem:[%s4423_s19 + $0x2d8] sm:$0xff] %v668_v27  ;;  %671 = vst [vmem:[%s4423_s19 + $0x2e0] sm:$0xff] %v670_v28 }
  0x44   : > { %673 = vst [vmem:[%s4423_s19 + $0x2e8] sm:$0xff] %v672_v29  ;;  %675 = vst [vmem:[%s4423_s19 + $0x2f0] sm:$0xff] %v674_v30 }
  0x45   : > { %677 = vst [vmem:[%s4423_s19 + $0x2f8] sm:$0xff] %v676_v31 }
  0x46 PF: > { %p3917_p10 = scmp.ge.s32.totalorder %s4318_s27, 1  ;;  %p691_p11 = scmp.lt.s32.totalorder %s4318_s27, 5 }
  0x48   : > { %p692_p12 = pnand %p3917_p10, %p691_p11 }
  0x4a   : > { %695 = sbr.rel (%p692_p12) target bundleno = 1129 (0x469), region = 78 }
  0x4f   : > { %v942_v32 = vld [vmem:[%s6926_s4 + $0x38] sm:$0xff]  ;;  %v941_v33 = vld [vmem:[%s6926_s4 + $0x30] sm:$0xff]  ;;  %s3919_s29 = sshll.u32 %s4383_s28, 5  ;;  %v940_v34 = vld [vmem:[%s6926_s4 + $0x28] sm:$0xff]  ;;  %vm943_vm0 = vcmask 523264   ;;  %s4970_s20 = sand.u32 1, %s4310_s25  }
  0x50   : > { %4006 = vmatprep.subr.mxu0 %v942_v32  ;;  %4070 = vmatprep.subr.mxu1 %v942_v32  ;;  %p750_p13 = scmp.lt.s32.totalorder %s3919_s29, 127  ;;  %v939_v35 = vld [vmem:[%s6926_s4 + $0x20] sm:$0xff]  ;;  %v938_v36 = vld [vmem:[%s6926_s4 + $0x18] sm:$0xff]  ;;  %v937_v37 = vld [vmem:[%s6926_s4 + $0x10] sm:$0xff]  ;;  %vm2512_vm1 = vcmask 130112   ;;  %vm2519_vm2 = vcmask 195712  }
  0x51   : > { %4007 = vmatpush3.msra.mxu0 %v942_v32  ;;  %4078 = vmatpush3.msra.mxu1 %v942_v32  ;;  %v936_v41 = vld [vmem:[%s6926_s4 + $0x8] sm:$0xff]  ;;  %v935_v63 = vld [vmem:[%s6926_s4] sm:$0xff]  ;;  %vm2526_vm3 = vcmask 261312   ;;  %vm2533_vm4 = vcmask 326912   ;;  %vm2540_vm5 = vcmask 392512   ;;  %vm2547_vm6 = vcmask 458112  }
  0x52   : > { %4008 = vmatprep.subr.mxu0 %v941_v33  ;;  %4071 = vmatprep.subr.mxu1 %v941_v33  ;;  %s7204_s29 = smov (!%p750_p13, %s3919_s29), 127  ;;  %vm2554_vm7 = vcmask 523712   ;;  %vm2561_vm8 = vcmask 589312   ;;  %vm2568_vm9 = vcmask 654912   ;;  %vm6992_vm10 = vcmask 720512   ;;  %s3918_s13 = sshll.u32 %s4970_s20, 4 }
  0x53   : > { %4009 = vmatpush3.msra.mxu0 %v941_v33  ;;  %4079 = vmatpush3.msra.mxu1 %v941_v33  ;;  %s4626_s15 = sshll.u32 %s7204_s29, 3  ;;  %vm6991_vm11 = vcmask 786112   ;;  %vm2589_vm12 = vcmask 851712   ;;  %vm2596_vm13 = vcmask 917312   ;;  %vm2603_vm14 = vcmask 982912   ;;  %s6838_s14 = scalar_lea.vmem [#allocation3], %s3918_s13 }
  0x54   : > { %4010 = vmatprep.subr.mxu0 %v940_v34  ;;  %4072 = vmatprep.subr.mxu1 %v940_v34  ;;  %s4638_s22 = scalar_lea.vmem %s6922_s0, %s4626_s15  ;;  %s4644_s8 = scalar_lea.vmem %s6923_s1, %s4626_s15  ;;  %vm2610_vm15 = vcmask 1048512  }
  0x55   : > { %4011 = vmatpush3.msra.mxu0 %v940_v34  ;;  %4080 = vmatpush3.msra.mxu1 %v940_v34  ;;  %v775_v38 = vld [vmem:[%s4638_s22] sm:$0xff]  ;;  %v776_v44 = vld [vmem:[%s4638_s22 + $0x8] sm:$0xff]  ;;  %v777_v50 = vld [vmem:[%s4638_s22 + $0x10] sm:$0xff]  ;;  %s4964_s19 = scalar_lea.vmem %s6925_s3, %s4626_s15  ;;  %s4976_s23 = scalar_lea.vmem %s6928_s6, %s4626_s15 }
  0x56   : > { %4012 = vmatprep.subr.mxu0 %v939_v35  ;;  %4073 = vmatprep.subr.mxu1 %v939_v35  ;;  %v807_v39 = vld [vmem:[%s4644_s8] sm:$0xff]  ;;  %v808_v45 = vld [vmem:[%s4644_s8 + $0x8] sm:$0xff]  ;;  %v809_v53 = vld [vmem:[%s4644_s8 + $0x10] sm:$0xff]  ;;  %s4087_s15 = smul.u32 768, %s4970_s20  ;;  %s3965_s16 = sshll.u32 %s4383_s28, 8 }
  0x57   : > { %v791_v40 = vld [vmem:[%s4638_s22 + $0x80] sm:$0xff]  ;;  %4013 = vmatpush3.msra.mxu0 %v939_v35  ;;  %4081 = vmatpush3.msra.mxu1 %v939_v35  ;;  %v839_v42 = vmul.f32 %v807_v39, %v775_v38  ;;  %v840_v47 = vmul.f32 %v808_v45, %v776_v44  ;;  %v792_v48 = vld [vmem:[%s4638_s22 + $0x88] sm:$0xff]  ;;  %v778_v54 = vld [vmem:[%s4638_s22 + $0x18] sm:$0xff]  ;;  %v841_v58 = vmul.f32 %v809_v53, %v777_v50  ;;  %s3786_s17 = sshll.u32 %s6838_s14, 4  ;;  %s6884_s21 = scalar_lea.hbm %s6929_s7, %s3965_s16  ;;  %s3787_s17 = int_to_ptr.vmem [resolvable:$true] %s3786_s17 }
  0x58   : > { %v823_v43 = vld [vmem:[%s4644_s8 + $0x80] sm:$0xff]  ;;  %4014 = vmatprep.subr.mxu0 %v938_v36  ;;  %4074 = vmatprep.subr.mxu1 %v938_v36  ;;  %v824_v49 = vld [vmem:[%s4644_s8 + $0x88] sm:$0xff]  ;;  %v810_v55 = vld [vmem:[%s4644_s8 + $0x18] sm:$0xff]  ;;  %s5037_s29 = scalar_lea.vmem [#allocation2], %s4087_s15  ;;  %s4258_s28 = scalar_lea.vmem %s3787_s17, 256 }
  0x59   : > { %v855_v46 = vmul.f32 %v823_v43, %v791_v40  ;;  %4015 = vmatpush3.msra.mxu0 %v938_v36  ;;  %4082 = vmatpush3.msra.mxu1 %v938_v36  ;;  %v4658_v51 = vmul.f32 25.0, %v839_v42  ;;  %v856_v52 = vmul.f32 %v824_v49, %v792_v48  ;;  %v4665_v57 = vmul.f32 25.0, %v840_v47  ;;  %v793_v60 = vld [vmem:[%s4638_s22 + $0x90] sm:$0xff]  ;;  %v794_v62 = vld [vmem:[%s4638_s22 + $0x98] sm:$0xff]  ;;  %v779_v11 = vld [vmem:[%s4638_s22 + $0x20] sm:$0xff]  ;;  %p4259_p0 = scmp.ne.s32.totalorder %s3787_s17, %s4258_s28 }
  0x5a   : > { %4016 = vmatprep.subr.mxu0 %v937_v37  ;;  %4075 = vmatprep.subr.mxu1 %v937_v37  ;;  %v842_v59 = vmul.f32 %v810_v55, %v778_v54  ;;  %v825_v61 = vld [vmem:[%s4644_s8 + $0x90] sm:$0xff]  ;;  %v826_v2 = vld [vmem:[%s4644_s8 + $0x98] sm:$0xff]  ;;  %v4679_v6 = vmul.f32 25.0, %v841_v58  ;;  %v811_v12 = vld [vmem:[%s4644_s8 + $0x20] sm:$0xff] }
  0x5b   : > { %v4663_v56 = vmul.f32 25.0, %v855_v46  ;;  %4017 = vmatpush3.msra.mxu0 %v937_v37  ;;  %4083 = vmatpush3.msra.mxu1 %v937_v37  ;;  %v4673_v0 = vmul.f32 25.0, %v856_v52  ;;  %v857_v1 = vmul.f32 %v825_v61, %v793_v60  ;;  %v903_v3 = vsub.f32 0.0, %v4658_v51  ;;  %v780_v14 = vld [vmem:[%s4638_s22 + $0x28] sm:$0xff]  ;;  %v795_v16 = vld [vmem:[%s4638_s22 + $0xa0] sm:$0xff]  ;;  %v781_v23 = vld [vmem:[%s4638_s22 + $0x30] sm:$0xff]  ;;  %p4260_p1 = pnand %p4259_p0, %p4401_p6 }
  0x5c   : > { %4018 = vmatprep.subr.mxu0 %v936_v41  ;;  %4076 = vmatprep.subr.mxu1 %v936_v41  ;;  %v904_v5 = vsub.f32 0.0, %v4665_v57  ;;  %v4682_v8 = vmul.f32 25.0, %v842_v59  ;;  %v858_v10 = vmul.f32 %v826_v2, %v794_v62  ;;  %v905_v13 = vsub.f32 0.0, %v4679_v6  ;;  %v812_v15 = vld [vmem:[%s4644_s8 + $0x28] sm:$0xff]  ;;  %v827_v19 = vld [vmem:[%s4644_s8 + $0xa0] sm:$0xff]  ;;  %v813_v24 = vld [vmem:[%s4644_s8 + $0x30] sm:$0xff] }
  0x5d   : > { %v919_v4 = vsub.f32 0.0, %v4663_v56  ;;  %4019 = vmatpush3.msra.mxu0 %v936_v41  ;;  %4084 = vmatpush3.msra.mxu1 %v936_v41  ;;  %v920_v7 = vsub.f32 0.0, %v4673_v0  ;;  %v4684_v9 = vmul.f32 25.0, %v857_v1  ;;  %v796_v20 = vld [vmem:[%s4638_s22 + $0xa8] sm:$0xff]  ;;  %v843_v22 = vmul.f32 %v811_v12, %v779_v11  ;;  %v782_v31 = vld [vmem:[%s4638_s22 + $0x38] sm:$0xff]  ;;  %v797_v38 = vld [vmem:[%s4638_s22 + $0xb0] sm:$0xff]  ;;  %p4261_p2 = pneg %p4260_p1 }
  0x5e   : > { %4020 = vmatprep.subr.mxu0 %v935_v63  ;;  %4077 = vmatprep.subr.mxu1 %v935_v63  ;;  %v4693_v18 = vmul.f32 25.0, %v858_v10  ;;  %v828_v21 = vld [vmem:[%s4644_s8 + $0xa8] sm:$0xff]  ;;  %v906_v25 = vsub.f32 0.0, %v4682_v8  ;;  %v844_v27 = vmul.f32 %v812_v15, %v780_v14  ;;  %v859_v29 = vmul.f32 %v827_v19, %v795_v16  ;;  %v814_v32 = vld [vmem:[%s4644_s8 + $0x38] sm:$0xff]  ;;  %v829_v39 = vld [vmem:[%s4644_s8 + $0xb0] sm:$0xff] }
  0x5f   : > { %4021 = vmatpush3.msra.mxu0 %v935_v63  ;;  %4085 = vmatpush3.msra.mxu1 %v935_v63  ;;  %v921_v17 = vsub.f32 0.0, %v4684_v9  ;;  %v4720_v28 = vmul.f32 25.0, %v843_v22  ;;  %v860_v30 = vmul.f32 %v828_v21, %v796_v20  ;;  %v845_v34 = vmul.f32 %v813_v24, %v781_v23  ;;  %v798_v43 = vld [vmem:[%s4638_s22 + $0xb8] sm:$0xff]  ;;  %v783_v47 = vld [vmem:[%s4638_s22 + $0x40] sm:$0xff]  ;;  %v784_v53 = vld [vmem:[%s4638_s22 + $0x48] sm:$0xff] }
  0x60   : > { %4022 = vmatprep.mubr.msk.f32.mxu0 %vm943_vm0, %v903_v3  ;;  %4046 = vmatprep.mubr.msk.f32.mxu1 %vm943_vm0, %v919_v4  ;;  %v922_v26 = vsub.f32 0.0, %v4693_v18  ;;  %v4724_v33 = vmul.f32 25.0, %v844_v27  ;;  %v4727_v36 = vmul.f32 25.0, %v859_v29  ;;  %v846_v42 = vmul.f32 %v814_v32, %v782_v31  ;;  %v830_v44 = vld [vmem:[%s4644_s8 + $0xb8] sm:$0xff]  ;;  %v815_v52 = vld [vmem:[%s4644_s8 + $0x40] sm:$0xff]  ;;  %v816_v54 = vld [vmem:[%s4644_s8 + $0x48] sm:$0xff] }
  0x61   : > { %4023 = vmatmul.mubr.msk.f32.vlgmr.msra.gmra.mxu0 %vm943_vm0, %v904_v5  ;;  %4047 = vmatmul.mubr.msk.f32.vlgmr.msra.gmra.mxu1 %vm943_vm0, %v920_v7  ;;  %v907_v35 = vsub.f32 0.0, %v4720_v28  ;;  %v4729_v37 = vmul.f32 25.0, %v860_v30  ;;  %v4740_v41 = vmul.f32 25.0, %v845_v34  ;;  %v861_v50 = vmul.f32 %v829_v39, %v797_v38  ;;  %v799_v58 = vld [vmem:[%s4638_s22 + $0xc0] sm:$0xff]  ;;  %v800_v15 = vld [vmem:[%s4638_s22 + $0xc8] sm:$0xff]  ;;  %v785_v22 = vld [vmem:[%s4638_s22 + $0x50] sm:$0xff] }
  0x62   : > { %4025 = vmatprep.mubr.msk.f32.mxu0 %vm943_vm0, %v905_v13  ;;  %4049 = vmatprep.mubr.msk.f32.mxu1 %vm943_vm0, %v921_v17  ;;  %v908_v40 = vsub.f32 0.0, %v4724_v33  ;;  %v923_v45 = vsub.f32 0.0, %v4727_v36  ;;  %v4751_v49 = vmul.f32 25.0, %v846_v42  ;;  %v862_v55 = vmul.f32 %v830_v44, %v798_v43  ;;  %v831_v59 = vld [vmem:[%s4644_s8 + $0xc0] sm:$0xff]  ;;  %v832_v16 = vld [vmem:[%s4644_s8 + $0xc8] sm:$0xff]  ;;  %v817_v23 = vld [vmem:[%s4644_s8 + $0x50] sm:$0xff] }
  0x63   : > { %v924_v46 = vsub.f32 0.0, %v4729_v37  ;;  %v909_v48 = vsub.f32 0.0, %v4740_v41  ;;  %v4768_v61 = vmul.f32 25.0, %v861_v50  ;;  %v847_v63 = vmul.f32 %v815_v52, %v783_v47  ;;  %v786_v24 = vld [vmem:[%s4638_s22 + $0x58] sm:$0xff]  ;;  %v801_v31 = vld [vmem:[%s4638_s22 + $0xd0] sm:$0xff] }
  0x64   : > { %v910_v60 = vsub.f32 0.0, %v4751_v49  ;;  %v4773_v62 = vmul.f32 25.0, %v862_v55  ;;  %v848_v1 = vmul.f32 %v816_v54, %v784_v53  ;;  %v863_v10 = vmul.f32 %v831_v59, %v799_v58  ;;  %v818_v30 = vld [vmem:[%s4644_s8 + $0x58] sm:$0xff]  ;;  %v833_v32 = vld [vmem:[%s4644_s8 + $0xd0] sm:$0xff] }
  0x65   : > { %4026 = vmatmul.mubr.msk.f32.gmra.mxu0 %vm943_vm0, %v906_v25  ;;  %4050 = vmatmul.mubr.msk.f32.gmra.mxu1 %vm943_vm0, %v922_v26  ;;  %v925_v2 = vsub.f32 0.0, %v4768_v61  ;;  %v4777_v12 = vmul.f32 25.0, %v847_v63  ;;  %v864_v29 = vmul.f32 %v832_v16, %v800_v15  ;;  %v849_v38 = vmul.f32 %v817_v23, %v785_v22  ;;  %v802_v43 = vld [vmem:[%s4638_s22 + $0xd8] sm:$0xff]  ;;  %v819_v15 = vld [vmem:[%s4644_s8 + $0x60] sm:$0xff]  ;;  %v788_v22 = vld [vmem:[%s4638_s22 + $0x68] sm:$0xff] }
  0x66   : > { %4028 = vmatprep.mubr.msk.f32.mxu0 %vm943_vm0, %v907_v35  ;;  %4052 = vmatprep.mubr.msk.f32.mxu1 %vm943_vm0, %v923_v45  ;;  %v926_v11 = vsub.f32 0.0, %v4773_v62  ;;  %v4779_v14 = vmul.f32 25.0, %v848_v1  ;;  %v4789_v19 = vmul.f32 25.0, %v863_v10  ;;  %v850_v39 = vmul.f32 %v818_v30, %v786_v24  ;;  %v834_v44 = vld [vmem:[%s4644_s8 + $0xd8] sm:$0xff]  ;;  %v787_v10 = vld [vmem:[%s4638_s22 + $0x60] sm:$0xff]  ;;  %v820_v23 = vld [vmem:[%s4644_s8 + $0x68] sm:$0xff] }
  0x67   : > { %v911_v20 = vsub.f32 0.0, %v4777_v12  ;;  %v4812_v34 = vmul.f32 25.0, %v864_v29  ;;  %v865_v42 = vmul.f32 %v833_v32, %v801_v31  ;;  %v4817_v50 = vmul.f32 25.0, %v849_v38  ;;  %v803_v31 = vld [vmem:[%s4638_s22 + $0xe0] sm:$0xff] }
  0x68   : > { %v912_v21 = vsub.f32 0.0, %v4779_v14  ;;  %v927_v27 = vsub.f32 0.0, %v4789_v19  ;;  %v4819_v52 = vmul.f32 25.0, %v850_v39  ;;  %v866_v55 = vmul.f32 %v834_v44, %v802_v43  ;;  %v835_v32 = vld [vmem:[%s4644_s8 + $0xe0] sm:$0xff]  ;;  %v836_v43 = vld [vmem:[%s4644_s8 + $0xe8] sm:$0xff] }
  0x69   : > { %4029 = vmatmul.mubr.msk.f32.gmra.mxu0 %vm943_vm0, %v908_v40  ;;  %4053 = vmatmul.mubr.msk.f32.gmra.mxu1 %vm943_vm0, %v924_v46  ;;  %v928_v47 = vsub.f32 0.0, %v4812_v34  ;;  %v4821_v53 = vmul.f32 25.0, %v865_v42  ;;  %v6936_v54 = vsub.f32 0.0, %v4817_v50  ;;  %v851_v16 = vmul.f32 %v819_v15, %v787_v10  ;;  %v804_v42 = vld [vmem:[%s4638_s22 + $0xe8] sm:$0xff] }
  0x6a   : > { %4031 = vmatprep.mubr.msk.f32.mxu0 %vm943_vm0, %v909_v48  ;;  %4055 = vmatprep.mubr.msk.f32.mxu1 %vm943_vm0, %v925_v2  ;;  %v6935_v58 = vsub.f32 0.0, %v4819_v52  ;;  %v4832_v63 = vmul.f32 25.0, %v866_v55  ;;  %v852_v24 = vmul.f32 %v820_v23, %v788_v22  ;;  %v867_v39 = vmul.f32 %v835_v32, %v803_v31  ;;  %v789_v23 = vld [vmem:[%s4638_s22 + $0x70] sm:$0xff]  ;;  %v790_v32 = vld [vmem:[%s4638_s22 + $0x78] sm:$0xff] }
  0x6b   : > { %v6932_v59 = vsub.f32 0.0, %v4821_v53  ;;  %v4848_v29 = vmul.f32 25.0, %v851_v16  ;;  %v868_v55 = vmul.f32 %v836_v43, %v804_v42  ;;  %v1365_v51 = vmul.f32 1.442695, %v921_v17 }
  0x6c   : > { %v6933_v1 = vsub.f32 0.0, %v4832_v63  ;;  %v4850_v30 = vmul.f32 25.0, %v852_v24  ;;  %v4861_v10 = vmul.f32 25.0, %v867_v39  ;;  %v821_v24 = vld [vmem:[%s4644_s8 + $0x70] sm:$0xff]  ;;  %v822_v39 = vld [vmem:[%s4644_s8 + $0x78] sm:$0xff]  ;;  %v6995_v19 = vsub.f32 0.0, %v4817_v50 }
  0x6d   : > { %4032 = vmatmul.mubr.msk.f32.gmra.mxu0 %vm943_vm0, %v910_v60  ;;  %4056 = vmatmul.mubr.msk.f32.gmra.mxu1 %vm943_vm0, %v926_v11  ;;  %v6930_v38 = vsub.f32 0.0, %v4848_v29  ;;  %v4866_v15 = vmul.f32 25.0, %v868_v55  ;;  %v853_v31 = vmul.f32 %v821_v24, %v789_v23  ;;  %v854_v42 = vmul.f32 %v822_v39, %v790_v32  ;;  %v1810_v50 = vld [vmem:[%s5037_s29 + $0x208] sm:$0xff] }
  0x6e   : > { %4034 = vmatprep.mubr.msk.f32.mxu0 %vm943_vm0, %v911_v20  ;;  %4058 = vmatprep.mubr.msk.f32.mxu1 %vm943_vm0, %v927_v27  ;;  %v6931_v44 = vsub.f32 0.0, %v4850_v30  ;;  %v6934_v16 = vsub.f32 0.0, %v4861_v10  ;;  %v1335_v32 = vmul.f32 1.442695, %v906_v25  ;;  %v1367_v56 = vmul.f32 1.442695, %v922_v26 }
  0x6f   : > { %v6937_v22 = vsub.f32 0.0, %v4866_v15  ;;  %v4880_v43 = vmul.f32 25.0, %v853_v31  ;;  %v4882_v55 = vmul.f32 25.0, %v854_v42  ;;  %v1337_v57 = vmul.f32 1.442695, %v907_v35 }
  0x70   : > { %v1339_v0 = vmul.f32 1.442695, %v908_v40  ;;  %v1343_v39 = vmul.f32 1.442695, %v910_v60 }
  0x71   : > { %4035 = vmatmul.mubr.msk.f32.gmra.mxu0 %vm943_vm0, %v912_v21  ;;  %4059 = vmatmul.mubr.msk.f32.gmra.mxu1 %vm943_vm0, %v928_v47 }
  0x72   : > { %4037 = vmatprep.mubr.msk.f32.mxu0 %vm943_vm0, %v6936_v54  ;;  %4061 = vmatprep.mubr.msk.f32.mxu1 %vm943_vm0, %v6932_v59  ;;  %v917_v59 = vsub.f32 0.0, %v4880_v43  ;;  %v918_v54 = vsub.f32 0.0, %v4882_v55  ;;  %v1766_v43 = vld [vmem:[%s5037_s29 + $0xa8] sm:$0xff] }
  0x74   : > { %v1357_v55 = vmul.f32 1.442695, %v917_v59 }
  0x75   : > { %4038 = vmatmul.mubr.msk.f32.gmra.mxu0 %vm943_vm0, %v6935_v58  ;;  %4062 = vmatmul.mubr.msk.f32.gmra.mxu1 %vm943_vm0, %v6933_v1  ;;  %v838_v58 = vld [vmem:[%s4644_s8 + $0xf8] sm:$0xff] }
  0x76   : > { %4040 = vmatprep.mubr.msk.f32.mxu0 %vm943_vm0, %v6930_v38  ;;  %4064 = vmatprep.mubr.msk.f32.mxu1 %vm943_vm0, %v6934_v16  ;;  %v805_v38 = vld [vmem:[%s4638_s22 + $0xf0] sm:$0xff]  ;;  %v806_v16 = vld [vmem:[%s4638_s22 + $0xf8] sm:$0xff]  ;;  %s3768_s22 = scalar_lea.sflag [#allocation4], %s4970_s20 }
  0x79   : > { %4041 = vmatmul.mubr.msk.f32.gmra.mxu0 %vm943_vm0, %v6931_v44  ;;  %4065 = vmatmul.mubr.msk.f32.gmra.mxu1 %vm943_vm0, %v6937_v22  ;;  %v837_v44 = vld [vmem:[%s4644_s8 + $0xf0] sm:$0xff]  ;;  %v870_v22 = vmul.f32 %v838_v58, %v806_v16  ;;  %v1329_v58 = vmul.f32 1.442695, %v903_v3  ;;  %v1363_v16 = vmul.f32 1.442695, %v920_v7 }
  0x7a   : > { %v869_v1 = vmul.f32 %v837_v44, %v805_v38  ;;  %4043 = vmatprep.mubr.msk.f32.mxu0 %vm943_vm0, %v917_v59  ;;  %v1331_v44 = vmul.f32 1.442695, %v904_v5  ;;  %v1369_v3 = vmul.f32 1.442695, %v923_v45  ;;  %v1341_v5 = vmul.f32 1.442695, %v909_v48 }
  0x7b   : > { %v4898_v24 = vmul.f32 25.0, %v870_v22  ;;  %4130 = vpow2.f32 %v1329_v58  ;;  %v1333_v22 = vmul.f32 1.442695, %v905_v13 }
  0x7c   : > { %v4893_v23 = vmul.f32 25.0, %v869_v1  ;;  %v1361_v1 = vmul.f32 1.442695, %v919_v4  ;;  %v1371_v4 = vmul.f32 1.442695, %v924_v46 }
  0x7d   : > { %4044 = vmatmul.mubr.msk.f32.gmra.mxu0 %vm943_vm0, %v918_v54  ;;  %v934_v38 = vsub.f32 0.0, %v4898_v24 }
  0x7e   : > { %v933_v31 = vsub.f32 0.0, %v4893_v23  ;;  %4132 = vpow2.f32 %v1361_v1 }
  0x7f   : > { %4134 = vpow2.f32 %v1331_v44  ;;  %v1373_v44 = vmul.f32 1.442695, %v925_v2 }
  0x80   : > { %4067 = vmatprep.mubr.msk.f32.mxu1 %vm943_vm0, %v933_v31  ;;  %4136 = vpow2.f32 %v1363_v16  ;;  %v1389_v59 = vmul.f32 1.442695, %v933_v31  ;;  %v1782_v31 = vld [vmem:[%s5037_s29 + $0x128] sm:$0xff] }
  0x81   : > { %4068 = vmatmul.mubr.msk.f32.gmra.mxu1 %vm943_vm0, %v934_v38  ;;  %4138 = vpow2.f32 %v1333_v22 }
  0x82   : > { %4140 = vpow2.f32 %v1335_v32 }
  0x83   : > { %4142 = vpow2.f32 %v1365_v51 }
  0x84   : > { %4144 = vpow2.f32 %v1367_v56 }
  0x85   : > { %4146 = vpow2.f32 %v1337_v57 }
  0x86   : > { %4148 = vpow2.f32 %v1339_v0 }
  0x87   : > { %4150 = vpow2.f32 %v1369_v3 }
  0x88   : > { %4152 = vpow2.f32 %v1371_v4  ;;  %v4934_v18 = vpop.eup %4130 }
  0x89   : > { %4154 = vpow2.f32 %v1341_v5 }
  0x8b   : > { %v4936_v28 = vpop.eup %4132 }
  0x8c   : > { %v4135_v36 = vpop.eup %4134 }
  0x8d   : > { %v4137_v41 = vpop.eup %4136 }
  0x8e   : > { %v4938_v48 = vpop.eup %4138 }
  0x8f   : > { %v4942_v1 = vpop.eup %4140 }
  0x90   : > { %v4946_v32 = vpop.eup %4142 }
  0x91   : > { %v4948_v56 = vpop.eup %4144 }
  0x92   : > { %v4950_v57 = vpop.eup %4146 }
  0x93   : > { %v4952_v61 = vpop.eup %4148 }
  0x94   : > { %v4954_v5 = vpop.eup %4150 }
 0x121   : > { %v4024_v6 = vpop.f32.mrf.mxu0  ;;  %v4048_v7 = vpop.f32.mrf.mxu1 }
 0x122   : > { %v1267_v8 = vmul.f32 1.442695, %v4024_v6  ;;  %v1299_v9 = vmul.f32 1.442695, %v4048_v7  ;;  %v1394_v6 = vsub.f32 1.0, %v4135_v36  ;;  %v1586_v36 = vld [vmem:[%s4964_s19 + $0x8] sm:$0xff] }
 0x123   : > { %v1106_v13 = vpop.f32.mrf.mxu0  ;;  %v1186_v17 = vpop.f32.mrf.mxu1  ;;  %v1375_v7 = vmul.f32 1.442695, %v926_v11  ;;  %v1409_v11 = vsub.f32 1.0, %v4936_v28 }
 0x124   : > { %4156 = vpow2.f32 %v1267_v8  ;;  %v1265_v25 = vmul.f32 1.442695, %v1106_v13  ;;  %v1297_v26 = vmul.f32 1.442695, %v1186_v17  ;;  %v1410_v13 = vsub.f32 1.0, %v4137_v41 }
 0x125   : > { %4158 = vpow2.f32 %v1299_v9  ;;  %v4027_v33 = vpop.f32.mrf.mxu0  ;;  %v4051_v35 = vpop.f32.mrf.mxu1 }
 0x126   : > { %4160 = vpow2.f32 %v1265_v25  ;;  %v1271_v37 = vmul.f32 1.442695, %v4027_v33  ;;  %v1303_v40 = vmul.f32 1.442695, %v4051_v35  ;;  %v4958_v9 = vpop.eup %4152  ;;  %v1393_v25 = vsub.f32 1.0, %v4934_v18 }
 0x127   : > { %4162 = vpow2.f32 %v1297_v26  ;;  %v1196_v45 = vpop.f32.mrf.mxu1  ;;  %v1116_v46 = vpop.f32.mrf.mxu0  ;;  %v1396_v35 = vsub.f32 1.0, %v4942_v1 }
 0x128   : > { %4164 = vpow2.f32 %v1271_v37  ;;  %v1301_v42 = vmul.f32 1.442695, %v1196_v45  ;;  %v1269_v58 = vmul.f32 1.442695, %v1116_v46  ;;  %v4966_v17 = vpop.eup %4154  ;;  %v1395_v45 = vsub.f32 1.0, %v4938_v48  ;;  %v1602_v48 = vld [vmem:[%s4964_s19 + $0x88] sm:$0xff] }
 0x129   : > { %4166 = vpow2.f32 %v1303_v40  ;;  %v4030_v16 = vpop.f32.mrf.mxu0  ;;  %v4054_v22 = vpop.f32.mrf.mxu1  ;;  %v1412_v46 = vsub.f32 1.0, %v4948_v56 }
 0x12a   : > { %4168 = vpow2.f32 %v1301_v42  ;;  %v1275_v51 = vmul.f32 1.442695, %v4030_v16  ;;  %v1307_v3 = vmul.f32 1.442695, %v4054_v22 }
 0x12b   : > { %4170 = vpow2.f32 %v1269_v58  ;;  %v1126_v49 = vpop.f32.mrf.mxu0  ;;  %v1206_v60 = vpop.f32.mrf.mxu1  ;;  %v1411_v58 = vsub.f32 1.0, %v4946_v32 }
 0x12c   : > { %4172 = vpow2.f32 %v1343_v39  ;;  %v1273_v0 = vmul.f32 1.442695, %v1126_v49  ;;  %v1305_v2 = vmul.f32 1.442695, %v1206_v60 }
 0x12d   : > { %4174 = vpow2.f32 %v1373_v44  ;;  %v4033_v4 = vpop.f32.mrf.mxu0  ;;  %v4057_v8 = vpop.f32.mrf.mxu1 }
 0x12e   : > { %4176 = vpow2.f32 %v1275_v51  ;;  %v1279_v37 = vmul.f32 1.442695, %v4033_v4  ;;  %v1311_v39 = vmul.f32 1.442695, %v4057_v8 }
 0x12f   : > { %4178 = vpow2.f32 %v1273_v0  ;;  %v1136_v26 = vpop.f32.mrf.mxu0  ;;  %v1216_v40 = vpop.f32.mrf.mxu1 }
 0x130   : > { %4180 = vpow2.f32 %v1307_v3  ;;  %v1277_v16 = vmul.f32 1.442695, %v1136_v26  ;;  %v1309_v49 = vmul.f32 1.442695, %v1216_v40 }
 0x131   : > { %v4157_v62 = vpop.eup %4156  ;;  %4182 = vpow2.f32 %v1305_v2 }
 0x132   : > { %v4159_v33 = vpop.eup %4158  ;;  %4184 = vpow2.f32 %v1375_v7  ;;  %v4980_v18 = vmul.f32 %v4157_v62, %v1394_v6  ;;  %v1585_v62 = vld [vmem:[%s4964_s19] sm:$0xff] }
 0x133   : > { %v4161_v41 = vpop.eup %4160  ;;  %v4985_v28 = vmul.f32 %v4159_v33, %v1410_v13  ;;  %4186 = vpow2.f32 %v1279_v37  ;;  %v1398_v33 = vsub.f32 1.0, %v4952_v61  ;;  %v1397_v37 = vsub.f32 1.0, %v4950_v57 }
 0x134   : > { %v4163_v42 = vpop.eup %4162  ;;  %1458 = vst.msk [vmem:[%s4976_s23 + $0x8] sm:$0xff] %vm943_vm0, %v4980_v18  ;;  %v4992_v1 = vmul.f32 %v4161_v41, %v1393_v25  ;;  %v1492_v44 = vsel %vm943_vm0, %v4980_v18, 0.0  ;;  %v1618_v56 = vmul.f32 %v1586_v36, %v4980_v18  ;;  %4188 = vpow2.f32 %v1311_v39 }
 0x135   : > { %v4165_v22 = vpop.eup %4164  ;;  %1474 = vst.msk [vmem:[%s4976_s23 + $0x88] sm:$0xff] %vm943_vm0, %v4985_v28  ;;  %v5000_v51 = vmul.f32 %v4163_v42, %v1409_v11  ;;  %v1540_v32 = vsel %vm943_vm0, %v4985_v28, 0.0  ;;  %1493 = vadd.xlane.f32.xlu0 %v1492_v44  ;;  %v1634_v2 = vmul.f32 %v1602_v48, %v4985_v28  ;;  %4190 = vpow2.f32 %v1277_v16  ;;  %v1762_v48 = vld [vmem:[%s5037_s29 + $0x88] sm:$0xff] }
 0x136   : > { %v4167_v60 = vpop.eup %4166  ;;  %1457 = vst.msk [vmem:[%s4976_s23] sm:$0xff] %vm943_vm0, %v4992_v1  ;;  %1541 = vadd.xlane.f32.xlu1 %v1540_v32  ;;  %v5008_v0 = vmul.f32 %v4165_v22, %v1396_v35  ;;  %v1489_v7 = vsel %vm943_vm0, %v4992_v1, 0.0  ;;  %v1652_v25 = vsel %vm943_vm0, %v1618_v56, 0.0  ;;  %4192 = vpow2.f32 %v1309_v49  ;;  %v1746_v35 = vld [vmem:[%s5037_s29 + $0x8] sm:$0xff] }
 0x137   : > { %v4169_v3 = vpop.eup %4168  ;;  %1473 = vst.msk [vmem:[%s4976_s23 + $0x80] sm:$0xff] %vm943_vm0, %v5000_v51  ;;  %v5014_v4 = vmul.f32 %v4167_v60, %v1412_v46  ;;  %v1700_v40 = vsel %vm943_vm0, %v1634_v2, 0.0  ;;  %v1414_v41 = vsub.f32 1.0, %v4958_v9  ;;  %v1617_v46 = vmul.f32 %v1585_v62, %v4992_v1 }
 0x138   : > { %v4171_v6 = vpop.eup %4170  ;;  %1460 = vst.msk [vmem:[%s4976_s23 + $0x18] sm:$0xff] %vm943_vm0, %v5008_v0  ;;  %v5021_v8 = vmul.f32 %v4169_v3, %v1411_v58  ;;  %v1413_v42 = vsub.f32 1.0, %v4954_v5  ;;  %v1842_v57 = vmul.f32 %v1746_v35, %v4980_v18  ;;  %v1601_v58 = vld [vmem:[%s4964_s19 + $0x80] sm:$0xff]  ;;  %v1858_v60 = vmul.f32 %v1762_v48, %v4985_v28 }
 0x139   : > { %v5023_v13 = vpop.eup %4172  ;;  %1490 = vadd.xlane.f32.xlu0 %v1489_v7  ;;  %1476 = vst.msk [vmem:[%s4976_s23 + $0x98] sm:$0xff] %vm943_vm0, %v5014_v4  ;;  %v5030_v11 = vmul.f32 %v4171_v6, %v1395_v45  ;;  %v1537_v45 = vsel %vm943_vm0, %v5000_v51, 0.0  ;;  %v1649_v32 = vsel %vm943_vm0, %v1617_v46, 0.0  ;;  %v1633_v5 = vmul.f32 %v1601_v58, %v5000_v51  ;;  %v1745_v3 = vld [vmem:[%s5037_s29] sm:$0xff]  ;;  %v1778_v6 = vld [vmem:[%s5037_s29 + $0x108] sm:$0xff] }
 0x13a   : > { %v5032_v26 = vpop.eup %4174  ;;  %1653 = vadd.xlane.f32.xlu1 %v1652_v25  ;;  %1475 = vst.msk [vmem:[%s4976_s23 + $0x90] sm:$0xff] %vm943_vm0, %v5021_v8  ;;  %v1940_v49 = vsel %vm943_vm0, %v1842_v57, 0.0  ;;  %v1400_v25 = vsub.f32 1.0, %v5023_v13  ;;  %v1347_v62 = vmul.f32 1.442695, %v912_v21  ;;  %v1399_v35 = vsub.f32 1.0, %v4966_v17 }
 0x13b   : > { %v4177_v36 = vpop.eup %4176  ;;  %1459 = vst.msk [vmem:[%s4976_s23 + $0x10] sm:$0xff] %vm943_vm0, %v5030_v11  ;;  %v1988_v13 = vsel %vm943_vm0, %v1858_v60, 0.0  ;;  %v1874_v14 = vmul.f32 %v1778_v6, %v4980_v18  ;;  %v1761_v21 = vld [vmem:[%s5037_s29 + $0x80] sm:$0xff]  ;;  %v1345_v46 = vmul.f32 1.442695, %v911_v20  ;;  %v1794_v17 = vld [vmem:[%s5037_s29 + $0x188] sm:$0xff] }
 0x13c   : > { %v4179_v61 = vpop.eup %4178  ;;  %v5056_v9 = vmul.f32 %v4177_v36, %v1398_v33  ;;  %4194 = vpow2.f32 %v1347_v62  ;;  %v1857_v12 = vmul.f32 %v1761_v21, %v5000_v51  ;;  %v1777_v48 = vld [vmem:[%s5037_s29 + $0x100] sm:$0xff]  ;;  %v6997_v6 = vsub.f32 0.0, %v4832_v63 }
 0x13d   : > { %v4181_v39 = vpop.eup %4180  ;;  %1538 = vadd.xlane.f32.xlu0 %v1537_v45  ;;  %v5058_v22 = vmul.f32 %v4179_v61, %v1397_v37  ;;  %v1697_v37 = vsel %vm943_vm0, %v1633_v5, 0.0  ;;  %v2036_v34 = vsel %vm943_vm0, %v1874_v14, 0.0  ;;  %4196 = vpow2.f32 %v1345_v46  ;;  %v1809_v21 = vld [vmem:[%s5037_s29 + $0x200] sm:$0xff] }
 0x13e   : > { %v4183_v44 = vpop.eup %4182  ;;  %1701 = vadd.xlane.f32.xlu1 %v1700_v40  ;;  %1462 = vst.msk [vmem:[%s4976_s23 + $0x28] sm:$0xff] %vm943_vm0, %v5056_v9  ;;  %v5065_v56 = vmul.f32 %v4181_v39, %v1414_v41  ;;  %v1841_v40 = vmul.f32 %v1745_v3, %v4992_v1  ;;  %v1415_v41 = vsub.f32 1.0, %v5032_v26  ;;  %v1377_v39 = vmul.f32 1.442695, %v927_v27 }
 0x13f   : > { %v4185_v16 = vpop.eup %4184  ;;  %1461 = vst.msk [vmem:[%s4976_s23 + $0x20] sm:$0xff] %vm943_vm0, %v5058_v22  ;;  %v5073_v2 = vmul.f32 %v4183_v44, %v1413_v42  ;;  %v1379_v26 = vmul.f32 1.442695, %v928_v47  ;;  %v4036_v44 = vpop.f32.mrf.mxu0  ;;  %v1349_v27 = vmul.f32 1.442695, %v6995_v19  ;;  %v1890_v47 = vmul.f32 %v1794_v17, %v4985_v28 }
 0x140   : > { %1478 = vst.msk [vmem:[%s4976_s23 + $0xa8] sm:$0xff] %vm943_vm0, %v5065_v56  ;;  %v4187_v7 = vpop.eup %4186  ;;  %v1416_v36 = vsub.f32 1.0, %v4185_v16  ;;  %v1937_v57 = vsel %vm943_vm0, %v1841_v40, 0.0  ;;  %4198 = vpow2.f32 %v1377_v39  ;;  %v1283_v60 = vmul.f32 1.442695, %v4036_v44 }
 0x141   : > { %1650 = vadd.xlane.f32.xlu0 %v1649_v32  ;;  %1477 = vst.msk [vmem:[%s4976_s23 + $0xa0] sm:$0xff] %vm943_vm0, %v5073_v2  ;;  %v4189_v33 = vpop.eup %4188  ;;  %v5099_v42 = vmul.f32 %v4187_v7, %v1400_v25  ;;  %v6996_v32 = vsub.f32 0.0, %v4819_v52  ;;  %4200 = vpow2.f32 %v1379_v26  ;;  %v1985_v3 = vsel %vm943_vm0, %v1857_v12, 0.0 }
 0x142   : > { %1941 = vadd.xlane.f32.xlu1 %v1940_v49  ;;  %v4191_v61 = vpop.eup %4190  ;;  %v5105_v58 = vmul.f32 %v4189_v33, %v1416_v36  ;;  %v4060_v49 = vpop.f32.mrf.mxu1  ;;  %v1873_v52 = vmul.f32 %v1777_v48, %v4992_v1  ;;  %4202 = vpow2.f32 %v1349_v27  ;;  %v1383_v7 = vmul.f32 1.442695, %v6997_v6  ;;  %v1793_v33 = vld [vmem:[%s5037_s29 + $0x180] sm:$0xff] }
 0x143   : > { %v4193_v45 = vpop.eup %4192  ;;  %v5103_v20 = vmul.f32 %v4191_v61, %v1399_v35  ;;  %1464 = vst.msk [vmem:[%s4976_s23 + $0x38] sm:$0xff] %vm943_vm0, %v5099_v42  ;;  %v1351_v5 = vmul.f32 1.442695, %v6996_v32  ;;  %v2084_v25 = vsel %vm943_vm0, %v1890_v47, 0.0  ;;  %v1906_v62 = vmul.f32 %v1810_v50, %v4980_v18  ;;  %v1146_v35 = vpop.f32.mrf.mxu0 }
 0x144   : > { %v5115_v16 = vmul.f32 %v4193_v45, %v1415_v41  ;;  %1480 = vst.msk [vmem:[%s4976_s23 + $0xb8] sm:$0xff] %vm943_vm0, %v5105_v58  ;;  %v1226_v36 = vpop.f32.mrf.mxu1  ;;  %v1889_v40 = vmul.f32 %v1793_v33, %v5000_v51  ;;  %v1281_v61 = vmul.f32 1.442695, %v1146_v35  ;;  %v1315_v41 = vmul.f32 1.442695, %v4060_v49  ;;  %v1587_v49 = vld [vmem:[%s4964_s19 + $0x10] sm:$0xff] }
 0x145   : > { %1698 = vadd.xlane.f32.xlu0 %v1697_v37  ;;  %1463 = vst.msk [vmem:[%s4976_s23 + $0x30] sm:$0xff] %vm943_vm0, %v5103_v20  ;;  %4204 = vpow2.f32 %v1351_v5  ;;  %v2033_v37 = vsel %vm943_vm0, %v1873_v52, 0.0  ;;  %v4039_v63 = vpop.f32.mrf.mxu0  ;;  %v2132_v18 = vsel %vm943_vm0, %v1906_v62, 0.0  ;;  %v1313_v45 = vmul.f32 1.442695, %v1226_v36 }
 0x146   : > { %1989 = vadd.xlane.f32.xlu1 %v1988_v13  ;;  %1479 = vst.msk [vmem:[%s4976_s23 + $0xb0] sm:$0xff] %vm943_vm0, %v5115_v16  ;;  %4206 = vpow2.f32 %v1283_v60  ;;  %v6998_v13 = vsub.f32 0.0, %v4821_v53  ;;  %v4063_v46 = vpop.f32.mrf.mxu1  ;;  %v1498_v17 = vsel %vm943_vm0, %v5008_v0, 0.0  ;;  %v2081_v26 = vsel %vm943_vm0, %v1889_v40, 0.0 }
 0x147   : > { %4208 = vpow2.f32 %v1383_v7  ;;  %v1156_v53 = vpop.f32.mrf.mxu0  ;;  %v1287_v44 = vmul.f32 1.442695, %v4039_v63  ;;  %v1546_v27 = vsel %vm943_vm0, %v5014_v4, 0.0  ;;  %v1319_v47 = vmul.f32 1.442695, %v4063_v46  ;;  %v1604_v63 = vld [vmem:[%s4964_s19 + $0x98] sm:$0xff] }
 0x148   : > { %v1381_v14 = vmul.f32 1.442695, %v6998_v13  ;;  %4210 = vpow2.f32 %v1281_v61  ;;  %v1236_v12 = vpop.f32.mrf.mxu1  ;;  %v1495_v6 = vsel %vm943_vm0, %v5030_v11, 0.0  ;;  %v1543_v62 = vsel %vm943_vm0, %v5021_v8, 0.0 }
 0x149   : > { %1938 = vadd.xlane.f32.xlu0 %v1937_v57  ;;  %4212 = vpow2.f32 %v1315_v41  ;;  %v4195_v39 = vpop.eup %4194  ;;  %v1905_v57 = vmul.f32 %v1809_v21, %v4992_v1  ;;  %v1317_v1 = vmul.f32 1.442695, %v1236_v12  ;;  %v1619_v33 = vmul.f32 %v1587_v49, %v5030_v11 }
 0x14a   : > { %2037 = vadd.xlane.f32.xlu1 %v2036_v34  ;;  %4214 = vpow2.f32 %v1313_v45  ;;  %v4197_v19 = vpop.eup %4196  ;;  %v1285_v34 = vmul.f32 1.442695, %v1156_v53  ;;  %v1402_v50 = vsub.f32 1.0, %v4195_v39 }
 0x14b   : > { %4216 = vpow2.f32 %v1381_v14  ;;  %v2129_v32 = vsel %vm943_vm0, %v1905_v57, 0.0  ;;  %v6999_v14 = vsub.f32 0.0, %v4850_v30  ;;  %v1655_v45 = vsel %vm943_vm0, %v1619_v33, 0.0  ;;  %v1747_v57 = vld [vmem:[%s5037_s29 + $0x10] sm:$0xff] }
 0x14c   : > { %4218 = vpow2.f32 %v1287_v44  ;;  %v1636_v30 = vmul.f32 %v1604_v63, %v5014_v4  ;;  %v1843_v49 = vmul.f32 %v1747_v57, %v5030_v11 }
 0x14d   : > { %1986 = vadd.xlane.f32.xlu0 %v1985_v3  ;;  %v4199_v48 = vpop.eup %4198  ;;  %4220 = vpow2.f32 %v1285_v34  ;;  %v1588_v3 = vld [vmem:[%s4964_s19 + $0x18] sm:$0xff] }
 0x14e   : > { %2085 = vadd.xlane.f32.xlu1 %v2084_v25  ;;  %v4201_v5 = vpop.eup %4200  ;;  %4222 = vpow2.f32 %v1319_v47  ;;  %v1401_v25 = vsub.f32 1.0, %v4197_v19  ;;  %v1620_v36 = vmul.f32 %v1588_v3, %v5008_v0  ;;  %v1417_v41 = vsub.f32 1.0, %v4199_v48  ;;  %v1748_v19 = vld [vmem:[%s5037_s29 + $0x18] sm:$0xff] }
 0x14f   : > { %v5150_v60 = vpop.eup %4202  ;;  %4224 = vpow2.f32 %v1317_v1  ;;  %v1418_v35 = vsub.f32 1.0, %v4201_v5  ;;  %v7000_v47 = vsub.f32 0.0, %v4848_v29  ;;  %v7001_v1 = vsub.f32 0.0, %v4866_v15 }
 0x150   : > { %v1403_v34 = vsub.f32 1.0, %v5150_v60  ;;  %v1706_v29 = vsel %vm943_vm0, %v1636_v30, 0.0  ;;  %v7002_v15 = vsub.f32 0.0, %v4861_v10  ;;  %v1943_v63 = vsel %vm943_vm0, %v1843_v49, 0.0 }
 0x151   : > { %2034 = vadd.xlane.f32.xlu0 %v2033_v37  ;;  %v1603_v37 = vld [vmem:[%s4964_s19 + $0x90] sm:$0xff]  ;;  %v1353_v48 = vmul.f32 1.442695, %v7000_v47  ;;  %v1387_v5 = vmul.f32 1.442695, %v7001_v1 }
 0x152   : > { %2133 = vadd.xlane.f32.xlu1 %v2132_v18  ;;  %v4205_v52 = vpop.eup %4204  ;;  %v1355_v18 = vmul.f32 1.442695, %v6999_v14  ;;  %v1635_v46 = vmul.f32 %v1603_v37, %v5021_v8  ;;  %v1795_v47 = vld [vmem:[%s5037_s29 + $0x190] sm:$0xff] }
 0x153   : > { %v4207_v7 = vpop.eup %4206  ;;  %v1404_v44 = vsub.f32 1.0, %v4205_v52  ;;  %v1844_v52 = vmul.f32 %v1748_v19, %v5008_v0  ;;  %v1891_v49 = vmul.f32 %v1795_v47, %v5021_v8 }
 0x154   : > { %v5160_v40 = vmul.f32 %v4207_v7, %v1402_v50  ;;  %v4209_v61 = vpop.eup %4208  ;;  %4226 = vpow2.f32 %v1355_v18  ;;  %v1703_v50 = vsel %vm943_vm0, %v1635_v46, 0.0  ;;  %v1780_v46 = vld [vmem:[%s5037_s29 + $0x118] sm:$0xff] }
 0x155   : > { %2082 = vadd.xlane.f32.xlu0 %v2081_v26  ;;  %v4211_v13 = vpop.eup %4210  ;;  %v1658_v26 = vsel %vm943_vm0, %v1620_v36, 0.0  ;;  %4228 = vpow2.f32 %v1353_v48  ;;  %v1946_v14 = vsel %vm943_vm0, %v1844_v52, 0.0 }
 0x156   : > { %1499 = vadd.xlane.f32.xlu1 %v1498_v17  ;;  %1466 = vst.msk [vmem:[%s4976_s23 + $0x48] sm:$0xff] %vm943_vm0, %v5160_v40  ;;  %v4213_v21 = vpop.eup %4212  ;;  %v5170_v17 = vmul.f32 %v4211_v13, %v1401_v25  ;;  %v1385_v25 = vmul.f32 1.442695, %v7002_v15  ;;  %4230 = vpow2.f32 %v1387_v5 }
 0x157   : > { %v4215_v39 = vpop.eup %4214  ;;  %v5175_v53 = vmul.f32 %v4213_v21, %v1418_v35  ;;  %v4042_v35 = vpop.f32.mrf.mxu0  ;;  %v1779_v21 = vld [vmem:[%s5037_s29 + $0x110] sm:$0xff] }
 0x158   : > { %v4217_v12 = vpop.eup %4216  ;;  %1465 = vst.msk [vmem:[%s4976_s23 + $0x40] sm:$0xff] %vm943_vm0, %v5170_v17 }
 0x159   : > { %2130 = vadd.xlane.f32.xlu0 %v2129_v32  ;;  %1482 = vst.msk [vmem:[%s4976_s23 + $0xc8] sm:$0xff] %vm943_vm0, %v5175_v53  ;;  %v1420_v32 = vsub.f32 1.0, %v4209_v61  ;;  %v4219_v60 = vpop.eup %4218  ;;  %v1419_v3 = vsub.f32 1.0, %v4217_v12  ;;  %v1291_v61 = vmul.f32 1.442695, %v4042_v35  ;;  %v1875_v12 = vmul.f32 %v1779_v21, %v5030_v11  ;;  %v1590_v21 = vld [vmem:[%s4964_s19 + $0x28] sm:$0xff] }
 0x15a   : > { %1547 = vadd.xlane.f32.xlu1 %v1546_v27  ;;  %v5181_v27 = vmul.f32 %v4215_v39, %v1417_v41  ;;  %v4221_v7 = vpop.eup %4220  ;;  %v5202_v33 = vmul.f32 %v4219_v60, %v1404_v44  ;;  %v1166_v39 = vpop.f32.mrf.mxu0 }
 0x15b   : > { %v4223_v36 = vpop.eup %4222  ;;  %v5204_v37 = vmul.f32 %v4221_v7, %v1403_v34  ;;  %4232 = vpow2.f32 %v1291_v61  ;;  %v1289_v30 = vmul.f32 1.442695, %v1166_v39  ;;  %v1876_v34 = vmul.f32 %v1780_v46, %v5008_v0 }
 0x15c   : > { %1481 = vst.msk [vmem:[%s4976_s23 + $0xc0] sm:$0xff] %vm943_vm0, %v5181_v27  ;;  %v4225_v41 = vpop.eup %4224  ;;  %1468 = vst.msk [vmem:[%s4976_s23 + $0x58] sm:$0xff] %vm943_vm0, %v5202_v33  ;;  %v5211_v13 = vmul.f32 %v4223_v36, %v1420_v32  ;;  %4234 = vpow2.f32 %v1385_v25  ;;  %v1796_v32 = vld [vmem:[%s5037_s29 + $0x198] sm:$0xff]  ;;  %v2087_v7 = vsel %vm943_vm0, %v1891_v49, 0.0  ;;  %v1552_v39 = vsel %vm943_vm0, %v5065_v56, 0.0  ;;  %v1605_v49 = vld [vmem:[%s4964_s19 + $0xa0] sm:$0xff]  ;;  %v4045_v24 = vpop.f32.mrf.mxu0 }
 0x15d   : > { %1544 = vadd.xlane.f32.xlu0 %v1543_v62  ;;  %v1764_v62 = vld [vmem:[%s5037_s29 + $0x98] sm:$0xff]  ;;  %1467 = vst.msk [vmem:[%s4976_s23 + $0x50] sm:$0xff] %vm943_vm0, %v5204_v37  ;;  %4236 = vpow2.f32 %v1289_v30  ;;  %v2042_v60 = vsel %vm943_vm0, %v1876_v34, 0.0  ;;  %v1501_v30 = vsel %vm943_vm0, %v5058_v22, 0.0  ;;  %v1606_v34 = vld [vmem:[%s4964_s19 + $0xa8] sm:$0xff] }
 0x15e   : > { %1496 = vadd.xlane.f32.xlu1 %v1495_v6  ;;  %v1763_v6 = vld [vmem:[%s5037_s29 + $0x90] sm:$0xff]  ;;  %v1860_v18 = vmul.f32 %v1764_v62, %v5014_v4  ;;  %1484 = vst.msk [vmem:[%s4976_s23 + $0xd8] sm:$0xff] %vm943_vm0, %v5211_v13  ;;  %v1176_v23 = vpop.f32.mrf.mxu0 }
 0x15f   : > { %v1859_v10 = vmul.f32 %v1763_v6, %v5021_v8 }
 0x160   : > { %v1994_v19 = vsel %vm943_vm0, %v1860_v18, 0.0 }
 0x161   : > { %1656 = vadd.xlane.f32.xlu0 %v1655_v45  ;;  %v5219_v45 = vmul.f32 %v4225_v41, %v1419_v3  ;;  %v1991_v57 = vsel %vm943_vm0, %v1859_v10, 0.0  ;;  %v4227_v5 = vpop.eup %4226  ;;  %v1892_v3 = vmul.f32 %v1796_v32, %v5014_v4  ;;  %v1504_v41 = vsel %vm943_vm0, %v5056_v9, 0.0 }
 0x162   : > { %1659 = vadd.xlane.f32.xlu1 %v1658_v26  ;;  %v4066_v26 = vpop.f32.mrf.mxu1  ;;  %v1406_v52 = vsub.f32 1.0, %v4227_v5  ;;  %v4229_v6 = vpop.eup %4228  ;;  %v1549_v32 = vsel %vm943_vm0, %v5073_v2, 0.0 }
 0x163   : > { %1483 = vst.msk [vmem:[%s4976_s23 + $0xd0] sm:$0xff] %vm943_vm0, %v5219_v45  ;;  %v1323_v44 = vmul.f32 1.442695, %v4066_v26  ;;  %v4231_v25 = vpop.eup %4230  ;;  %v2090_v62 = vsel %vm943_vm0, %v1892_v3, 0.0  ;;  %v1405_v61 = vsub.f32 1.0, %v4229_v6 }
 0x164   : > { %v1246_v48 = vpop.f32.mrf.mxu1  ;;  %v1422_v10 = vsub.f32 1.0, %v4231_v25 }
 0x165   : > { %1704 = vadd.xlane.f32.xlu0 %v1703_v50  ;;  %4238 = vpow2.f32 %v1323_v44  ;;  %v1321_v1 = vmul.f32 1.442695, %v1246_v48  ;;  %v2039_v50 = vsel %vm943_vm0, %v1875_v12, 0.0  ;;  %v1622_v44 = vmul.f32 %v1590_v21, %v5056_v9 }
 0x166   : > { %1707 = vadd.xlane.f32.xlu1 %v1706_v29  ;;  %v1811_v29 = vld [vmem:[%s5037_s29 + $0x210] sm:$0xff]  ;;  %v1359_v48 = vmul.f32 1.442695, %v918_v54  ;;  %v1750_v54 = vld [vmem:[%s5037_s29 + $0x28] sm:$0xff]  ;;  %v1878_v21 = vmul.f32 %v1782_v31, %v5056_v9 }
 0x167   : > { %4240 = vpow2.f32 %v1321_v1  ;;  %v1907_v15 = vmul.f32 %v1811_v29, %v5030_v11  ;;  %v1664_v5 = vsel %vm943_vm0, %v1622_v44, 0.0  ;;  %v1637_v29 = vmul.f32 %v1605_v49, %v5073_v2 }
 0x168   : > { %v4233_v35 = vpop.eup %4232  ;;  %4242 = vpow2.f32 %v1359_v48  ;;  %v1846_v6 = vmul.f32 %v1750_v54, %v5056_v9  ;;  %v2048_v48 = vsel %vm943_vm0, %v1878_v21, 0.0 }
 0x169   : > { %1944 = vadd.xlane.f32.xlu0 %v1943_v63  ;;  %v4235_v36 = vpop.eup %4234  ;;  %v5244_v63 = vmul.f32 %v4233_v35, %v1406_v52  ;;  %4244 = vpow2.f32 %v1357_v55  ;;  %v1862_v35 = vmul.f32 %v1766_v43, %v5065_v56 }
 0x16a   : > { %1947 = vadd.xlane.f32.xlu1 %v1946_v14  ;;  %v2135_v14 = vsel %vm943_vm0, %v1907_v15, 0.0  ;;  %v4237_v11 = vpop.eup %4236  ;;  %v1421_v18 = vsub.f32 1.0, %v4235_v36  ;;  %v1709_v15 = vsel %vm943_vm0, %v1637_v29, 0.0  ;;  %v1765_v36 = vld [vmem:[%s5037_s29 + $0xa0] sm:$0xff] }
 0x16b   : > { %1470 = vst.msk [vmem:[%s4976_s23 + $0x68] sm:$0xff] %vm943_vm0, %v5244_v63  ;;  %v5253_v26 = vmul.f32 %v4237_v11, %v1405_v61  ;;  %v1293_v61 = vmul.f32 1.442695, %v1176_v23  ;;  %v1861_v11 = vmul.f32 %v1765_v36, %v5073_v2  ;;  %v1507_v23 = vsel %vm943_vm0, %v5103_v20, 0.0 }
 0x16d   : > { %1992 = vadd.xlane.f32.xlu0 %v1991_v57  ;;  %1469 = vst.msk [vmem:[%s4976_s23 + $0x60] sm:$0xff] %vm943_vm0, %v5253_v26 }
 0x16e   : > { %1995 = vadd.xlane.f32.xlu1 %v1994_v19  ;;  %v1589_v19 = vld [vmem:[%s4964_s19 + $0x20] sm:$0xff] }
 0x16f   : > { %v1621_v1 = vmul.f32 %v1589_v19, %v5058_v22  ;;  %v1997_v19 = vsel %vm943_vm0, %v1861_v11, 0.0  ;;  %v1555_v11 = vsel %vm943_vm0, %v5115_v16, 0.0 }
 0x171   : > { %2040 = vadd.xlane.f32.xlu0 %v2039_v50  ;;  %v1638_v50 = vmul.f32 %v1606_v34, %v5065_v56  ;;  %v1661_v3 = vsel %vm943_vm0, %v1621_v1, 0.0  ;;  %v1797_v1 = vld [vmem:[%s5037_s29 + $0x1a0] sm:$0xff] }
 0x172   : > { %2043 = vadd.xlane.f32.xlu1 %v2042_v60  ;;  %v4239_v46 = vpop.eup %4238  ;;  %v1391_v60 = vmul.f32 1.442695, %v934_v38  ;;  %v1295_v38 = vmul.f32 1.442695, %v4045_v24  ;;  %v1893_v54 = vmul.f32 %v1797_v1, %v5073_v2 }
 0x173   : > { %v5257_v57 = vmul.f32 %v4239_v46, %v1422_v10  ;;  %v1712_v52 = vsel %vm943_vm0, %v1638_v50, 0.0  ;;  %v1781_v46 = vld [vmem:[%s5037_s29 + $0x120] sm:$0xff] }
 0x174   : > { %v4241_v12 = vpop.eup %4240  ;;  %4246 = vpow2.f32 %v1391_v60  ;;  %v1877_v34 = vmul.f32 %v1781_v46, %v5058_v22  ;;  %v2093_v43 = vsel %vm943_vm0, %v1893_v54, 0.0  ;;  %v1784_v54 = vld [vmem:[%s5037_s29 + $0x138] sm:$0xff] }
 0x175   : > { %2088 = vadd.xlane.f32.xlu0 %v2087_v7  ;;  %1486 = vst.msk [vmem:[%s4976_s23 + $0xe8] sm:$0xff] %vm943_vm0, %v5257_v57  ;;  %v5268_v47 = vmul.f32 %v4241_v12, %v1421_v18  ;;  %v1749_v7 = vld [vmem:[%s5037_s29 + $0x20] sm:$0xff]  ;;  %4248 = vpow2.f32 %v1295_v38  ;;  %v2000_v18 = vsel %vm943_vm0, %v1862_v35, 0.0  ;;  %v4243_v44 = vpop.eup %4242  ;;  %v1558_v35 = vsel %vm943_vm0, %v5105_v58, 0.0 }
 0x176   : > { %2091 = vadd.xlane.f32.xlu1 %v2090_v62  ;;  %v1845_v25 = vmul.f32 %v1749_v7, %v5058_v22  ;;  %v1952_v62 = vsel %vm943_vm0, %v1846_v6, 0.0  ;;  %4250 = vpow2.f32 %v1389_v59  ;;  %v1408_v50 = vsub.f32 1.0, %v4243_v44 }
 0x177   : > { %1485 = vst.msk [vmem:[%s4976_s23 + $0xe0] sm:$0xff] %vm943_vm0, %v5268_v47  ;;  %4252 = vpow2.f32 %v1293_v61  ;;  %v2045_v55 = vsel %vm943_vm0, %v1877_v34, 0.0  ;;  %v1510_v7 = vsel %vm943_vm0, %v5099_v42, 0.0 }
 0x179   : > { %2136 = vadd.xlane.f32.xlu0 %v2135_v14  ;;  %v1949_v14 = vsel %vm943_vm0, %v1845_v25, 0.0  ;;  %v1592_v25 = vld [vmem:[%s4964_s19 + $0x38] sm:$0xff] }
 0x17a   : > { %1505 = vadd.xlane.f32.xlu1 %v1504_v41  ;;  %v4069_v41 = vpop.f32.mrf.mxu1  ;;  %v1624_v61 = vmul.f32 %v1592_v25, %v5099_v42 }
 0x17b   : > { %v1327_v10 = vmul.f32 1.442695, %v4069_v41  ;;  %v1591_v41 = vld [vmem:[%s4964_s19 + $0x30] sm:$0xff] }
 0x17c   : > { %v1670_v21 = vsel %vm943_vm0, %v1624_v61, 0.0 }
 0x17d   : > { %1502 = vadd.xlane.f32.xlu0 %v1501_v30  ;;  %4254 = vpow2.f32 %v1327_v10  ;;  %v1798_v30 = vld [vmem:[%s5037_s29 + $0x1a8] sm:$0xff]  ;;  %v1608_v10 = vld [vmem:[%s4964_s19 + $0xb8] sm:$0xff] }
 0x17e   : > { %1553 = vadd.xlane.f32.xlu1 %v1552_v39  ;;  %v1256_v39 = vpop.f32.mrf.mxu1  ;;  %v1640_v46 = vmul.f32 %v1608_v10, %v5105_v58  ;;  %v1516_v10 = vsel %vm943_vm0, %v5160_v40, 0.0 }
 0x17f   : > { %v1325_v12 = vmul.f32 1.442695, %v1256_v39  ;;  %v1607_v39 = vld [vmem:[%s4964_s19 + $0xb0] sm:$0xff] }
 0x180   : > { %v1639_v44 = vmul.f32 %v1607_v39, %v5115_v16  ;;  %v1564_v39 = vsel %vm943_vm0, %v5175_v53, 0.0 }
 0x181   : > { %1550 = vadd.xlane.f32.xlu0 %v1549_v32  ;;  %4256 = vpow2.f32 %v1325_v12  ;;  %v1894_v32 = vmul.f32 %v1798_v30, %v5065_v56  ;;  %v1752_v30 = vld [vmem:[%s5037_s29 + $0x38] sm:$0xff] }
 0x182   : > { %1665 = vadd.xlane.f32.xlu1 %v1664_v5  ;;  %v4245_v5 = vpop.eup %4244  ;;  %v1848_v34 = vmul.f32 %v1752_v30, %v5099_v42  ;;  %v1715_v1 = vsel %vm943_vm0, %v1639_v44, 0.0 }
 0x183   : > { %v4247_v49 = vpop.eup %4246  ;;  %v2096_v60 = vsel %vm943_vm0, %v1894_v32, 0.0  ;;  %v1407_v29 = vsub.f32 1.0, %v4245_v5  ;;  %v1768_v32 = vld [vmem:[%s5037_s29 + $0xb8] sm:$0xff] }
 0x184   : > { %v1424_v6 = vsub.f32 1.0, %v4247_v49  ;;  %v1864_v49 = vmul.f32 %v1768_v32, %v5105_v58 }
 0x185   : > { %1662 = vadd.xlane.f32.xlu0 %v1661_v3  ;;  %v4249_v3 = vpop.eup %4248 }
 0x186   : > { %1713 = vadd.xlane.f32.xlu1 %v1712_v52  ;;  %v4251_v52 = vpop.eup %4250  ;;  %v5316_v59 = vmul.f32 %v4249_v3, %v1408_v50  ;;  %v1958_v50 = vsel %vm943_vm0, %v1848_v34, 0.0 }
 0x187   : > { %v4253_v24 = vpop.eup %4252 }
 0x188   : > { %1472 = vst.msk [vmem:[%s4976_s23 + $0x78] sm:$0xff] %vm943_vm0, %v5316_v59 }
 0x189   : > { %1710 = vadd.xlane.f32.xlu0 %v1709_v15  ;;  %v1423_v15 = vsub.f32 1.0, %v4251_v52  ;;  %v1880_v52 = vmul.f32 %v1784_v54, %v5099_v42 }
 0x18a   : > { %1953 = vadd.xlane.f32.xlu1 %v1952_v62  ;;  %v4255_v38 = vpop.eup %4254  ;;  %v5323_v62 = vmul.f32 %v4253_v24, %v1407_v29  ;;  %v2006_v29 = vsel %vm943_vm0, %v1864_v49, 0.0  ;;  %v1561_v49 = vsel %vm943_vm0, %v5181_v27, 0.0 }
 0x18b   : > { %v5327_v36 = vmul.f32 %v4255_v38, %v1424_v6  ;;  %v1783_v6 = vld [vmem:[%s5037_s29 + $0x130] sm:$0xff] }
 0x18c   : > { %1471 = vst.msk [vmem:[%s4976_s23 + $0x70] sm:$0xff] %vm943_vm0, %v5323_v62  ;;  %v1879_v38 = vmul.f32 %v1783_v6, %v5103_v20 }
 0x18d   : > { %1950 = vadd.xlane.f32.xlu0 %v1949_v14  ;;  %1488 = vst.msk [vmem:[%s4976_s23 + $0xf8] sm:$0xff] %vm943_vm0, %v5327_v36 }
 0x18e   : > { %2001 = vadd.xlane.f32.xlu1 %v2000_v18  ;;  %v4257_v31 = vpop.eup %4256  ;;  %v1623_v18 = vmul.f32 %v1591_v41, %v5103_v20 }
 0x18f   : > { %v5340_v14 = vmul.f32 %v4257_v31, %v1423_v15  ;;  %v2054_v15 = vsel %vm943_vm0, %v1880_v52, 0.0  ;;  %v2051_v31 = vsel %vm943_vm0, %v1879_v38, 0.0  ;;  %v1754_v52 = vld [vmem:[%s5037_s29 + $0x48] sm:$0xff] }
 0x190   : > { %v1667_v12 = vsel %vm943_vm0, %v1623_v18, 0.0 }
 0x191   : > { %1998 = vadd.xlane.f32.xlu0 %v1997_v19  ;;  %1487 = vst.msk [vmem:[%s4976_s23 + $0xf0] sm:$0xff] %vm943_vm0, %v5340_v14  ;;  %v1718_v19 = vsel %vm943_vm0, %v1640_v46, 0.0  ;;  %v1594_v46 = vld [vmem:[%s4964_s19 + $0x48] sm:$0xff]  ;;  %s4321_s23 = smov [#allocation3]  }
 0x192   : > { %2049 = vadd.xlane.f32.xlu1 %v2048_v48  ;;  %v1751_v48 = vld [vmem:[%s5037_s29 + $0x30] sm:$0xff]  ;;  %v1626_v44 = vmul.f32 %v1594_v46, %v5160_v40  ;;  %s4262_s15 = sshll.u32 %s4321_s23, 4  ;;  %s4263_s15 = int_to_ptr.vmem [resolvable:$false] %s4262_s15 }
 0x193   : > { %v1847_v5 = vmul.f32 %v1751_v48, %v5103_v20  ;;  %v1610_v48 = vld [vmem:[%s4964_s19 + $0xc8] sm:$0xff]  ;;  %p4265_p3 = scmp.lt.s32.totalorder %s3787_s17, %s4263_s15 }
 0x194   : > { %v1676_v54 = vsel %vm943_vm0, %v1626_v44, 0.0 }
 0x195   : > { %2046 = vadd.xlane.f32.xlu0 %v2045_v55  ;;  %v1767_v55 = vld [vmem:[%s5037_s29 + $0xb0] sm:$0xff] }
 0x196   : > { %2097 = vadd.xlane.f32.xlu1 %v2096_v60  ;;  %v1955_v60 = vsel %vm943_vm0, %v1847_v5, 0.0  ;;  %v1863_v3 = vmul.f32 %v1767_v55, %v5115_v16 }
 0x198   : > { %v2003_v24 = vsel %vm943_vm0, %v1863_v3, 0.0  ;;  %v1609_v3 = vld [vmem:[%s4964_s19 + $0xc0] sm:$0xff] }
 0x199   : > { %2094 = vadd.xlane.f32.xlu0 %v2093_v43  ;;  %v2262_v43 = vlaneseq  ;;  %v1641_v38 = vmul.f32 %v1609_v3, %v5181_v27 }
 0x19a   : > { %1511 = vadd.xlane.f32.xlu1 %v1510_v7  ;;  %v1800_v7 = vld [vmem:[%s5037_s29 + $0x1b8] sm:$0xff] }
 0x19b   : > { %v1896_v25 = vmul.f32 %v1800_v7, %v5105_v58  ;;  %v1721_v46 = vsel %vm943_vm0, %v1641_v38, 0.0  ;;  %v1802_v38 = vld [vmem:[%s5037_s29 + $0x1c8] sm:$0xff] }
 0x19d   : > { %1508 = vadd.xlane.f32.xlu0 %v1507_v23  ;;  %v5375_v23 = vand.u32 127, %v2262_v43  ;;  %v2102_v41 = vsel %vm943_vm0, %v1896_v25, 0.0 }
 0x19e   : > { %1559 = vadd.xlane.f32.xlu1 %v1558_v35  ;;  %v1799_v35 = vld [vmem:[%s5037_s29 + $0x1b0] sm:$0xff] }
 0x19f   : > { %v1895_v61 = vmul.f32 %v1799_v35, %v5115_v16  ;;  %v2507_v18 = vadd.s32 4294967288, %v5375_v23  ;;  %v1850_v35 = vmul.f32 %v1754_v52, %v5160_v40 }
 0x1a1   : > { %1556 = vadd.xlane.f32.xlu0 %v1555_v11  ;;  %v5382_v11 = vshrl.u32 %v2262_v43, 7  ;;  %v1964_v44 = vsel %vm943_vm0, %v1850_v35, 0.0 }
 0x1a2   : > { %1671 = vadd.xlane.f32.xlu1 %v1670_v21  ;;  %v2099_v21 = vsel %vm943_vm0, %v1895_v61, 0.0 }
 0x1a3   : > { %v5390_v30 = vsub.s32 %v2507_v18, %v5382_v11  ;;  %v5405_v5 = vsub.s32 %v5375_v23, %v5382_v11 }
 0x1a5   : > { %1668 = vadd.xlane.f32.xlu0 %v1667_v12  ;;  %7003 = vst [vmem:[#allocation6_spill] sm:$0xff] %v5390_v30  ;;  %v1513_v12 = vsel %vm943_vm0, %v5170_v17, 0.0  ;;  %7004 = vst [vmem:[#allocation7_spill] sm:$0xff] %v5405_v5 }
 0x1a6   : > { %1719 = vadd.xlane.f32.xlu1 %v1718_v19  ;;  %v1593_v19 = vld [vmem:[%s4964_s19 + $0x40] sm:$0xff] }
 0x1a7   : > { %v1625_v55 = vmul.f32 %v1593_v19, %v5170_v17 }
 0x1a9   : > { %1716 = vadd.xlane.f32.xlu0 %v1715_v1 }
 0x1aa   : > { %1959 = vadd.xlane.f32.xlu1 %v1958_v50 }
 0x1ad   : > { %1956 = vadd.xlane.f32.xlu0 %v1955_v60  ;;  %v1642_v60 = vmul.f32 %v1610_v48, %v5175_v53  ;;  %v1769_v48 = vld [vmem:[%s5037_s29 + $0xc0] sm:$0xff] }
 0x1ae   : > { %2007 = vadd.xlane.f32.xlu1 %v2006_v29 }
 0x1af   : > { %v1724_v25 = vsel %vm943_vm0, %v1642_v60, 0.0 }
 0x1b1   : > { %2004 = vadd.xlane.f32.xlu0 %v2003_v24  ;;  %v1673_v24 = vsel %vm943_vm0, %v1625_v55, 0.0 }
 0x1b2   : > { %2055 = vadd.xlane.f32.xlu1 %v2054_v15 }
 0x1b5   : > { %2052 = vadd.xlane.f32.xlu0 %v2051_v31  ;;  %v1753_v31 = vld [vmem:[%s5037_s29 + $0x40] sm:$0xff] }
 0x1b6   : > { %2103 = vadd.xlane.f32.xlu1 %v2102_v41  ;;  %v1770_v41 = vld [vmem:[%s5037_s29 + $0xc8] sm:$0xff] }
 0x1b7   : > { %v1866_v19 = vmul.f32 %v1770_v41, %v5175_v53 }
 0x1b9   : > { %2100 = vadd.xlane.f32.xlu0 %v2099_v21  ;;  %v2012_v52 = vsel %vm943_vm0, %v1866_v19, 0.0 }
 0x1ba   : > { %1517 = vadd.xlane.f32.xlu1 %v1516_v10 }
 0x1bd   : > { %1514 = vadd.xlane.f32.xlu0 %v1513_v12 }
 0x1be   : > { %1565 = vadd.xlane.f32.xlu1 %v1564_v39  ;;  %v5396_v34 = vpop.xlane.xlu0 %1493  ;;  %v1849_v39 = vmul.f32 %v1753_v31, %v5170_v17 }
 0x1bf   : > { %v5399_v32 = vpop.xlane.xlu1 %1541  ;;  %v2511_v1 = vrot.slane %v5396_v34, %v5390_v30 }
 0x1c0   : > { %v2619_v50 = vrot.slane %v5399_v32, %v5390_v30  ;;  %v1961_v60 = vsel %vm943_vm0, %v1849_v39, 0.0 }
 0x1c1   : > { %1562 = vadd.xlane.f32.xlu0 %v1561_v49  ;;  %v1786_v49 = vld [vmem:[%s5037_s29 + $0x148] sm:$0xff] }
 0x1c2   : > { %1677 = vadd.xlane.f32.xlu1 %v1676_v54  ;;  %v5415_v29 = vpop.xlane.xlu0 %1490 }
 0x1c3   : > { %v1654_v6 = vpop.xlane.xlu1 %1653  ;;  %v2506_v7 = vrot.slane %v5415_v29, %v5405_v5 }
 0x1c4   : > { %v2732_v43 = vrot.slane %v1654_v6, %v5390_v30  ;;  %v1882_v6 = vmul.f32 %v1786_v49, %v5160_v40 }
 0x1c5   : > { %v5424_v15 = vsel %vm2512_vm1, %v2511_v1, %v2506_v7  ;;  %1674 = vadd.xlane.f32.xlu0 %v1673_v24  ;;  %v1785_v7 = vld [vmem:[%s5037_s29 + $0x140] sm:$0xff] }
 0x1c6   : > { %1725 = vadd.xlane.f32.xlu1 %v1724_v25  ;;  %v5429_v61 = vpop.xlane.xlu0 %1538  ;;  %v1881_v41 = vmul.f32 %v1785_v7, %v5170_v17 }
 0x1c7   : > { %v1702_v10 = vpop.xlane.xlu1 %1701  ;;  %v2615_v18 = vrot.slane %v5429_v61, %v5405_v5 }
 0x1c8   : > { %v2811_v21 = vrot.slane %v1702_v10, %v5390_v30  ;;  %v2060_v10 = vsel %vm943_vm0, %v1882_v6, 0.0  ;;  %v2057_v19 = vsel %vm943_vm0, %v1881_v41, 0.0  ;;  %v1596_v6 = vld [vmem:[%s4964_s19 + $0x58] sm:$0xff] }
 0x1c9   : > { %v5438_v12 = vsel %vm2512_vm1, %v2619_v50, %v2615_v18  ;;  %1722 = vadd.xlane.f32.xlu0 %v1721_v46  ;;  %v1865_v50 = vmul.f32 %v1769_v48, %v5181_v27  ;;  %v1898_v18 = vmul.f32 %v1802_v38, %v5175_v53  ;;  %v1801_v46 = vld [vmem:[%s5037_s29 + $0x1c0] sm:$0xff]  ;;  %v1519_v38 = vsel %vm943_vm0, %v5204_v37, 0.0 }
 0x1ca   : > { %1965 = vadd.xlane.f32.xlu1 %v1964_v44  ;;  %v1651_v1 = vpop.xlane.xlu0 %1650  ;;  %v1897_v48 = vmul.f32 %v1801_v46, %v5181_v27 }
 0x1cb   : > { %v2728_v55 = vrot.slane %v1651_v1, %v5405_v5  ;;  %v5445_v54 = vpop.xlane.xlu1 %1941  ;;  %v2009_v31 = vsel %vm943_vm0, %v1865_v50, 0.0  ;;  %v2108_v1 = vsel %vm943_vm0, %v1898_v18, 0.0  ;;  %v1612_v18 = vld [vmem:[%s4964_s19 + $0xd8] sm:$0xff] }
 0x1cd   : > { %v5450_v3 = vsel %vm2512_vm1, %v2732_v43, %v2728_v55  ;;  %1962 = vadd.xlane.f32.xlu0 %v1961_v60  ;;  %v1522_v55 = vsel %vm943_vm0, %v5202_v33, 0.0  ;;  %v2105_v60 = vsel %vm943_vm0, %v1897_v48, 0.0 }
 0x1ce   : > { %2013 = vadd.xlane.f32.xlu1 %v2012_v52  ;;  %v1699_v24 = vpop.xlane.xlu0 %1698  ;;  %v2521_v52 = vadd.s32 4294967272, %v5375_v23 }
 0x1cf   : > { %v2807_v25 = vrot.slane %v1699_v24, %v5405_v5  ;;  %v5457_v35 = vpop.xlane.xlu1 %1989  ;;  %v1570_v24 = vsel %vm943_vm0, %v5211_v13, 0.0 }
 0x1d0   : > { %7005 = vst [vmem:[#allocation8_spill] sm:$0xff] %v5457_v35  ;;  %v5494_v41 = vsub.s32 %v2521_v52, %v5382_v11  ;;  %v1644_v52 = vmul.f32 %v1612_v18, %v5211_v13 }
 0x1d1   : > { %v5462_v43 = vsel %vm2512_vm1, %v2811_v21, %v2807_v25  ;;  %2010 = vadd.xlane.f32.xlu0 %v2009_v31  ;;  %v1628_v25 = vmul.f32 %v1596_v6, %v5202_v33  ;;  %v1595_v31 = vld [vmem:[%s4964_s19 + $0x50] sm:$0xff] }
 0x1d2   : > { %2061 = vadd.xlane.f32.xlu1 %v2060_v10  ;;  %v5467_v39 = vpop.xlane.xlu0 %1938  ;;  %7011 = vst [vmem:[#allocation14_spill] sm:$0xff] %v5494_v41  ;;  %v1611_v6 = vld [vmem:[%s4964_s19 + $0xd0] sm:$0xff]  ;;  %v1730_v18 = vsel %vm943_vm0, %v1644_v52, 0.0 }
 0x1d3   : > { %7006 = vst [vmem:[#allocation9_spill] sm:$0xff] %v5467_v39  ;;  %v5469_v44 = vpop.xlane.xlu1 %2037 }
 0x1d4   : > { %7007 = vst [vmem:[#allocation10_spill] sm:$0xff] %v5469_v44  ;;  %v1771_v44 = vld [vmem:[%s5037_s29 + $0xd0] sm:$0xff] }
 0x1d5   : > { %2058 = vadd.xlane.f32.xlu0 %v2057_v19  ;;  %v2514_v19 = vadd.s32 4294967280, %v5375_v23 }
 0x1d6   : > { %2109 = vadd.xlane.f32.xlu1 %v2108_v1  ;;  %v5474_v21 = vpop.xlane.xlu0 %1986  ;;  %v1567_v1 = vsel %vm943_vm0, %v5219_v45, 0.0 }
 0x1d7   : > { %v5476_v49 = vpop.xlane.xlu1 %2085  ;;  %v5516_v30 = vsub.s32 %v2514_v19, %v5382_v11  ;;  %v1772_v19 = vld [vmem:[%s5037_s29 + $0xd8] sm:$0xff] }
 0x1d8   : > { %7008 = vst [vmem:[#allocation11_spill] sm:$0xff] %v5476_v49 }
 0x1d9   : > { %2106 = vadd.xlane.f32.xlu0 %v2105_v60  ;;  %v1682_v60 = vsel %vm943_vm0, %v1628_v25, 0.0  ;;  %7015 = vst [vmem:[#allocation18_spill] sm:$0xff] %v5516_v30  ;;  %v1643_v25 = vmul.f32 %v1611_v6, %v5219_v45 }
 0x1da   : > { %1523 = vadd.xlane.f32.xlu1 %v1522_v55  ;;  %v5481_v50 = vpop.xlane.xlu0 %2034  ;;  %v1627_v55 = vmul.f32 %v1595_v31, %v5204_v37 }
 0x1db   : > { %7009 = vst [vmem:[#allocation12_spill] sm:$0xff] %v5481_v50  ;;  %v5485_v7 = vpop.xlane.xlu1 %2133 }
 0x1dc   : > { %7010 = vst [vmem:[#allocation13_spill] sm:$0xff] %v5485_v7  ;;  %v1679_v5 = vsel %vm943_vm0, %v1627_v55, 0.0 }
 0x1dd   : > { %1520 = vadd.xlane.f32.xlu0 %v1519_v38  ;;  %v1756_v38 = vld [vmem:[%s5037_s29 + $0x58] sm:$0xff] }
 0x1de   : > { %1571 = vadd.xlane.f32.xlu1 %v1570_v24  ;;  %v5496_v10 = vpop.xlane.xlu0 %2082 }
 0x1df   : > { %7012 = vst [vmem:[#allocation15_spill] sm:$0xff] %v5496_v10  ;;  %v5499_v46 = vpop.xlane.xlu1 %1499  ;;  %v1868_v10 = vmul.f32 %v1772_v19, %v5211_v13 }
 0x1e0   : > { %7013 = vst [vmem:[#allocation16_spill] sm:$0xff] %v5499_v46  ;;  %v2525_v48 = vrot.slane %v5499_v46, %v5494_v41  ;;  %v1806_v46 = vld [vmem:[%s5037_s29 + $0x1e8] sm:$0xff] }
 0x1e1   : > { %1568 = vadd.xlane.f32.xlu0 %v1567_v1  ;;  %v1852_v1 = vmul.f32 %v1756_v38, %v5202_v33 }
 0x1e2   : > { %1683 = vadd.xlane.f32.xlu1 %v1682_v60  ;;  %v5510_v24 = vpop.xlane.xlu0 %2130  ;;  %v1755_v60 = vld [vmem:[%s5037_s29 + $0x50] sm:$0xff] }
 0x1e3   : > { %7014 = vst [vmem:[#allocation17_spill] sm:$0xff] %v5510_v24  ;;  %v5513_v7 = vpop.xlane.xlu1 %1547  ;;  %v1851_v6 = vmul.f32 %v1755_v60, %v5204_v37 }
 0x1e4   : > { %v2629_v31 = vrot.slane %v5513_v7, %v5494_v41 }
 0x1e5   : > { %1680 = vadd.xlane.f32.xlu0 %v1679_v5  ;;  %v1727_v5 = vsel %vm943_vm0, %v1643_v25, 0.0 }
 0x1e6   : > { %1731 = vadd.xlane.f32.xlu1 %v1730_v18  ;;  %v5525_v24 = vpop.xlane.xlu0 %1544  ;;  %v1970_v18 = vsel %vm943_vm0, %v1852_v1, 0.0 }
 0x1e7   : > { %v5528_v49 = vpop.xlane.xlu1 %1496  ;;  %v2624_v55 = vrot.slane %v5525_v24, %v5516_v30 }
 0x1e8   : > { %7016 = vst [vmem:[#allocation19_spill] sm:$0xff] %v5528_v49  ;;  %v2518_v52 = vrot.slane %v5528_v49, %v5516_v30  ;;  %v1788_v49 = vld [vmem:[%s5037_s29 + $0x158] sm:$0xff] }
 0x1e9   : > { %v2625_v38 = vsel %vm2519_vm2, %v2624_v55, %v5438_v12  ;;  %1728 = vadd.xlane.f32.xlu0 %v1727_v5  ;;  %v1967_v55 = vsel %vm943_vm0, %v1851_v6, 0.0  ;;  %v1867_v5 = vmul.f32 %v1771_v44, %v5219_v45 }
 0x1ea   : > { %v2520_v50 = vsel %vm2519_vm2, %v2518_v52, %v5424_v15  ;;  %1971 = vadd.xlane.f32.xlu1 %v1970_v18  ;;  %v1657_v39 = vpop.xlane.xlu0 %1656  ;;  %v5545_v25 = vsel %vm2526_vm3, %v2629_v31, %v2625_v38  ;;  %v2018_v52 = vsel %vm943_vm0, %v1868_v10, 0.0  ;;  %v1884_v31 = vmul.f32 %v1788_v49, %v5202_v33  ;;  %v1787_v38 = vld [vmem:[%s5037_s29 + $0x150] sm:$0xff] }
 0x1eb   : > { %v1660_v60 = vpop.xlane.xlu1 %1659  ;;  %v2737_v12 = vrot.slane %v1657_v39, %v5516_v30  ;;  %v5549_v1 = vsel %vm2526_vm3, %v2525_v48, %v2520_v50  ;;  %v1804_v50 = vld [vmem:[%s5037_s29 + $0x1d8] sm:$0xff]  ;;  %v1883_v10 = vmul.f32 %v1787_v38, %v5204_v37 }
 0x1ec   : > { %v2742_v19 = vrot.slane %v1660_v60, %v5494_v41  ;;  %v2066_v49 = vsel %vm943_vm0, %v1884_v31, 0.0 }
 0x1ed   : > { %v2738_v15 = vsel %vm2519_vm2, %v2737_v12, %v5450_v3  ;;  %1968 = vadd.xlane.f32.xlu0 %v1967_v55  ;;  %v2015_v3 = vsel %vm943_vm0, %v1867_v5, 0.0  ;;  %v1900_v12 = vmul.f32 %v1804_v50, %v5211_v13  ;;  %v1803_v55 = vld [vmem:[%s5037_s29 + $0x1d0] sm:$0xff]  ;;  %v2063_v5 = vsel %vm943_vm0, %v1883_v10, 0.0 }
 0x1ee   : > { %2019 = vadd.xlane.f32.xlu1 %v2018_v52  ;;  %v1705_v39 = vpop.xlane.xlu0 %1704  ;;  %v5561_v48 = vsel %vm2526_vm3, %v2742_v19, %v2738_v15  ;;  %v1899_v38 = vmul.f32 %v1803_v55, %v5219_v45  ;;  %v1528_v50 = vsel %vm943_vm0, %v5244_v63, 0.0  ;;  %v1576_v10 = vsel %vm943_vm0, %v5257_v57, 0.0  ;;  %v1597_v55 = vld [vmem:[%s4964_s19 + $0x60] sm:$0xff] }
 0x1ef   : > { %v1708_v18 = vpop.xlane.xlu1 %1707  ;;  %v2816_v6 = vrot.slane %v1705_v39, %v5516_v30  ;;  %v1613_v30 = vld [vmem:[%s4964_s19 + $0xe0] sm:$0xff] }
 0x1f0   : > { %v2821_v44 = vrot.slane %v1708_v18, %v5494_v41  ;;  %v2111_v18 = vsel %vm943_vm0, %v1899_v38, 0.0  ;;  %v1614_v38 = vld [vmem:[%s4964_s19 + $0xe8] sm:$0xff] }
 0x1f1   : > { %v2817_v60 = vsel %vm2519_vm2, %v2816_v6, %v5462_v43  ;;  %2016 = vadd.xlane.f32.xlu0 %v2015_v3  ;;  %v2114_v43 = vsel %vm943_vm0, %v1900_v12, 0.0 }
 0x1f2   : > { %2067 = vadd.xlane.f32.xlu1 %v2066_v49  ;;  %v5572_v19 = vpop.xlane.xlu0 %1944  ;;  %v5575_v15 = vsel %vm2526_vm3, %v2821_v44, %v2817_v60  ;;  %v1598_v44 = vld [vmem:[%s4964_s19 + $0x68] sm:$0xff]  ;;  %v1525_v60 = vsel %vm943_vm0, %v5253_v26, 0.0  ;;  %v2535_v49 = vadd.s32 4294967256, %v5375_v23 }
 0x1f3   : > { %7017 = vst [vmem:[#allocation20_spill] sm:$0xff] %v5572_v19  ;;  %v5577_v52 = vpop.xlane.xlu1 %1947  ;;  %v1630_v12 = vmul.f32 %v1598_v44, %v5244_v63  ;;  %v1774_v19 = vld [vmem:[%s5037_s29 + $0xe8] sm:$0xff] }
 0x1f4   : > { %7018 = vst [vmem:[#allocation21_spill] sm:$0xff] %v5577_v52  ;;  %v5610_v41 = vsub.s32 %v2535_v49, %v5382_v11  ;;  %v1790_v52 = vld [vmem:[%s5037_s29 + $0x168] sm:$0xff] }
 0x1f5   : > { %2064 = vadd.xlane.f32.xlu0 %v2063_v5  ;;  %v1688_v44 = vsel %vm943_vm0, %v1630_v12, 0.0  ;;  %v1645_v12 = vmul.f32 %v1613_v30, %v5268_v47 }
 0x1f6   : > { %2115 = vadd.xlane.f32.xlu1 %v2114_v43  ;;  %v5582_v31 = vpop.xlane.xlu0 %1992  ;;  %7025 = vst [vmem:[#allocation28_spill] sm:$0xff] %v5610_v41 }
 0x1f7   : > { %7019 = vst [vmem:[#allocation22_spill] sm:$0xff] %v5582_v31  ;;  %v5584_v39 = vpop.xlane.xlu1 %1995 }
 0x1f8   : > { %7020 = vst [vmem:[#allocation23_spill] sm:$0xff] %v5584_v39  ;;  %v1773_v39 = vld [vmem:[%s5037_s29 + $0xe0] sm:$0xff] }
 0x1f9   : > { %2112 = vadd.xlane.f32.xlu0 %v2111_v18  ;;  %v1573_v18 = vsel %vm943_vm0, %v5268_v47, 0.0 }
 0x1fa   : > { %1529 = vadd.xlane.f32.xlu1 %v1528_v50  ;;  %v5589_v6 = vpop.xlane.xlu0 %2040  ;;  %v2528_v50 = vadd.s32 4294967264, %v5375_v23 }
 0x1fb   : > { %7021 = vst [vmem:[#allocation24_spill] sm:$0xff] %v5589_v6  ;;  %v5592_v3 = vpop.xlane.xlu1 %2043 }
 0x1fc   : > { %7022 = vst [vmem:[#allocation25_spill] sm:$0xff] %v5592_v3  ;;  %v5622_v6 = vsub.s32 %v2528_v50, %v5382_v11 }
 0x1fd   : > { %1526 = vadd.xlane.f32.xlu0 %v1525_v60  ;;  %v1629_v60 = vmul.f32 %v1597_v55, %v5253_v26 }
 0x1fe   : > { %1577 = vadd.xlane.f32.xlu1 %v1576_v10  ;;  %v5601_v5 = vpop.xlane.xlu0 %2088  ;;  %v1646_v10 = vmul.f32 %v1614_v38, %v5257_v57  ;;  %7028 = vst [vmem:[#allocation31_spill] sm:$0xff] %v5622_v6 }
 0x1ff   : > { %7023 = vst [vmem:[#allocation26_spill] sm:$0xff] %v5601_v5  ;;  %v5604_v43 = vpop.xlane.xlu1 %2091  ;;  %v1685_v55 = vsel %vm943_vm0, %v1629_v60, 0.0  ;;  %v1733_v60 = vsel %vm943_vm0, %v1645_v12, 0.0 }
 0x200   : > { %7024 = vst [vmem:[#allocation27_spill] sm:$0xff] %v5604_v43  ;;  %v1758_v43 = vld [vmem:[%s5037_s29 + $0x68] sm:$0xff]  ;;  %v1736_v38 = vsel %vm943_vm0, %v1646_v10, 0.0 }
 0x201   : > { %1574 = vadd.xlane.f32.xlu0 %v1573_v18  ;;  %v1854_v18 = vmul.f32 %v1758_v43, %v5244_v63 }
 0x202   : > { %1689 = vadd.xlane.f32.xlu1 %v1688_v44  ;;  %v5616_v5 = vpop.xlane.xlu0 %2136  ;;  %v1757_v44 = vld [vmem:[%s5037_s29 + $0x60] sm:$0xff] }
 0x203   : > { %7026 = vst [vmem:[#allocation29_spill] sm:$0xff] %v5616_v5  ;;  %v5619_v3 = vpop.xlane.xlu1 %1505  ;;  %v4320_v5 = vmov 0   ;;  %v1853_v10 = vmul.f32 %v1757_v44, %v5253_v26 }
 0x204   : > { %7027 = vst [vmem:[#allocation30_spill] sm:$0xff] %v5619_v3  ;;  %v2539_v49 = vrot.slane %v5619_v3, %v5610_v41  ;;  %4129 = vset.pattern.permute.xlu1 %v4320_v5  ;;  %4128 = vset.pattern.permute.xlu0 %v4320_v5  ;;  %v1870_v5 = vmul.f32 %v1774_v19, %v5257_v57 }
 0x205   : > { %1686 = vadd.xlane.f32.xlu0 %v1685_v55 }
 0x206   : > { %1737 = vadd.xlane.f32.xlu1 %v1736_v38  ;;  %v5631_v50 = vpop.xlane.xlu0 %1502  ;;  %v1976_v38 = vsel %vm943_vm0, %v1854_v18, 0.0  ;;  %v1973_v18 = vsel %vm943_vm0, %v1853_v10, 0.0 }
 0x207   : > { %7029 = vst [vmem:[#allocation32_spill] sm:$0xff] %v5631_v50  ;;  %v5634_v3 = vpop.xlane.xlu1 %1553  ;;  %v2532_v30 = vrot.slane %v5631_v50, %v5622_v6 }
 0x208   : > { %v2639_v43 = vrot.slane %v5634_v3, %v5610_v41 }
 0x209   : > { %v2534_v55 = vsel %vm2533_vm4, %v2532_v30, %v5549_v1  ;;  %1734 = vadd.xlane.f32.xlu0 %v1733_v60  ;;  %v1869_v30 = vmul.f32 %v1773_v39, %v5268_v47  ;;  %v2024_v60 = vsel %vm943_vm0, %v1870_v5, 0.0 }
 0x20a   : > { %1977 = vadd.xlane.f32.xlu1 %v1976_v38  ;;  %v5647_v50 = vpop.xlane.xlu0 %1550  ;;  %v5651_v31 = vsel %vm2540_vm5, %v2539_v49, %v2534_v55  ;;  %v1886_v49 = vmul.f32 %v1790_v52, %v5244_v63  ;;  %v1789_v55 = vld [vmem:[%s5037_s29 + $0x160] sm:$0xff] }
 0x20b   : > { %7030 = vst [vmem:[#allocation33_spill] sm:$0xff] %v5647_v50  ;;  %v1666_v12 = vpop.xlane.xlu1 %1665  ;;  %v2634_v44 = vrot.slane %v5647_v50, %v5622_v6  ;;  %v1885_v5 = vmul.f32 %v1789_v55, %v5253_v26 }
 0x20c   : > { %v2752_v1 = vrot.slane %v1666_v12, %v5610_v41  ;;  %v2072_v52 = vsel %vm943_vm0, %v1886_v49, 0.0 }
 0x20d   : > { %v2635_v19 = vsel %vm2533_vm4, %v2634_v44, %v5545_v25  ;;  %1974 = vadd.xlane.f32.xlu0 %v1973_v18  ;;  %v2021_v25 = vsel %vm943_vm0, %v1869_v30, 0.0  ;;  %v1902_v18 = vmul.f32 %v1806_v46, %v5257_v57  ;;  %v2069_v55 = vsel %vm943_vm0, %v1885_v5, 0.0 }
 0x20e   : > { %2025 = vadd.xlane.f32.xlu1 %v2024_v60  ;;  %v1663_v38 = vpop.xlane.xlu0 %1662  ;;  %v5665_v50 = vsel %vm2540_vm5, %v2639_v43, %v2635_v19  ;;  %v1805_v60 = vld [vmem:[%s5037_s29 + $0x1e0] sm:$0xff] }
 0x20f   : > { %v1714_v12 = vpop.xlane.xlu1 %1713  ;;  %v2747_v10 = vrot.slane %v1663_v38, %v5622_v6  ;;  %v2120_v46 = vsel %vm943_vm0, %v1902_v18, 0.0  ;;  %v1582_v18 = vsel %vm943_vm0, %v5327_v36, 0.0 }
 0x210   : > { %v2831_v39 = vrot.slane %v1714_v12, %v5610_v41  ;;  %v1615_v41 = vld [vmem:[%s4964_s19 + $0xf0] sm:$0xff] }
 0x211   : > { %v2748_v44 = vsel %vm2533_vm4, %v2747_v10, %v5561_v48  ;;  %2022 = vadd.xlane.f32.xlu0 %v2021_v25  ;;  %v1901_v48 = vmul.f32 %v1805_v60, %v5268_v47  ;;  %v1534_v25 = vsel %vm943_vm0, %v5316_v59, 0.0  ;;  %v2549_v60 = vadd.s32 4294967240, %v5375_v23 }
 0x212   : > { %2073 = vadd.xlane.f32.xlu1 %v2072_v52  ;;  %v1711_v43 = vpop.xlane.xlu0 %1710  ;;  %v5677_v19 = vsel %vm2540_vm5, %v2752_v1, %v2748_v44  ;;  %v1600_v44 = vld [vmem:[%s4964_s19 + $0x78] sm:$0xff] }
 0x213   : > { %v5679_v38 = vpop.xlane.xlu1 %1953  ;;  %v2826_v30 = vrot.slane %v1711_v43, %v5622_v6  ;;  %v2117_v5 = vsel %vm943_vm0, %v1901_v48, 0.0  ;;  %v1632_v43 = vmul.f32 %v1600_v44, %v5316_v59  ;;  %v1616_v48 = vld [vmem:[%s4964_s19 + $0xf8] sm:$0xff] }
 0x214   : > { %7031 = vst [vmem:[#allocation34_spill] sm:$0xff] %v5679_v38  ;;  %v1792_v38 = vld [vmem:[%s5037_s29 + $0x178] sm:$0xff] }
 0x215   : > { %v2827_v49 = vsel %vm2533_vm4, %v2826_v30, %v5575_v15  ;;  %2070 = vadd.xlane.f32.xlu0 %v2069_v55  ;;  %v1599_v30 = vld [vmem:[%s4964_s19 + $0x70] sm:$0xff]  ;;  %v1694_v44 = vsel %vm943_vm0, %v1632_v43, 0.0  ;;  %v1647_v43 = vmul.f32 %v1615_v41, %v5340_v14 }
 0x216   : > { %2121 = vadd.xlane.f32.xlu1 %v2120_v46  ;;  %v5687_v12 = vpop.xlane.xlu0 %1950  ;;  %v5690_v1 = vsel %vm2540_vm5, %v2831_v39, %v2827_v49  ;;  %v1531_v39 = vsel %vm943_vm0, %v5323_v62, 0.0  ;;  %v2542_v46 = vadd.s32 4294967248, %v5375_v23 }
 0x217   : > { %7032 = vst [vmem:[#allocation35_spill] sm:$0xff] %v5687_v12  ;;  %v5692_v10 = vpop.xlane.xlu1 %2001 }
 0x218   : > { %7033 = vst [vmem:[#allocation36_spill] sm:$0xff] %v5692_v10  ;;  %v1775_v10 = vld [vmem:[%s5037_s29 + $0xf0] sm:$0xff] }
 0x219   : > { %2118 = vadd.xlane.f32.xlu0 %v2117_v5  ;;  %v5718_v5 = vsub.s32 %v2549_v60, %v5382_v11 }
 0x21a   : > { %1535 = vadd.xlane.f32.xlu1 %v1534_v25  ;;  %v5697_v15 = vpop.xlane.xlu0 %1998  ;;  %v1579_v25 = vsel %vm943_vm0, %v5340_v14, 0.0 }
 0x21b   : > { %7034 = vst [vmem:[#allocation37_spill] sm:$0xff] %v5697_v15  ;;  %v5700_v52 = vpop.xlane.xlu1 %2049  ;;  %7038 = vst [vmem:[#allocation41_spill] sm:$0xff] %v5718_v5 }
 0x21c   : > { %7035 = vst [vmem:[#allocation38_spill] sm:$0xff] %v5700_v52 }
 0x21d   : > { %1532 = vadd.xlane.f32.xlu0 %v1531_v39  ;;  %v1631_v39 = vmul.f32 %v1599_v30, %v5323_v62 }
 0x21e   : > { %1583 = vadd.xlane.f32.xlu1 %v1582_v18  ;;  %v5709_v55 = vpop.xlane.xlu0 %2046  ;;  %v1648_v18 = vmul.f32 %v1616_v48, %v5327_v36 }
 0x21f   : > { %7036 = vst [vmem:[#allocation39_spill] sm:$0xff] %v5709_v55  ;;  %v5712_v49 = vpop.xlane.xlu1 %2097  ;;  %v5730_v55 = vsub.s32 %v2542_v46, %v5382_v11  ;;  %v1691_v30 = vsel %vm943_vm0, %v1631_v39, 0.0  ;;  %v1776_v46 = vld [vmem:[%s5037_s29 + $0xf8] sm:$0xff] }
 0x220   : > { %7037 = vst [vmem:[#allocation40_spill] sm:$0xff] %v5712_v49  ;;  %v1760_v49 = vld [vmem:[%s5037_s29 + $0x78] sm:$0xff]  ;;  %v1742_v48 = vsel %vm943_vm0, %v1648_v18, 0.0  ;;  %v1739_v18 = vsel %vm943_vm0, %v1647_v43, 0.0 }
 0x221   : > { %1580 = vadd.xlane.f32.xlu0 %v1579_v25  ;;  %7041 = vst [vmem:[#allocation44_spill] sm:$0xff] %v5730_v55  ;;  %v1856_v25 = vmul.f32 %v1760_v49, %v5316_v59 }
 0x222   : > { %1695 = vadd.xlane.f32.xlu1 %v1694_v44  ;;  %v5724_v6 = vpop.xlane.xlu0 %2094  ;;  %v1759_v44 = vld [vmem:[%s5037_s29 + $0x70] sm:$0xff] }
 0x223   : > { %7039 = vst [vmem:[#allocation42_spill] sm:$0xff] %v5724_v6  ;;  %v5727_v52 = vpop.xlane.xlu1 %1511  ;;  %v1855_v49 = vmul.f32 %v1759_v44, %v5323_v62 }
 0x224   : > { %7040 = vst [vmem:[#allocation43_spill] sm:$0xff] %v5727_v52  ;;  %v2553_v60 = vrot.slane %v5727_v52, %v5718_v5  ;;  %v1872_v52 = vmul.f32 %v1776_v46, %v5327_v36 }
 0x225   : > { %1692 = vadd.xlane.f32.xlu0 %v1691_v30 }
 0x226   : > { %1743 = vadd.xlane.f32.xlu1 %v1742_v48  ;;  %v5739_v6 = vpop.xlane.xlu0 %1508  ;;  %v1982_v48 = vsel %vm943_vm0, %v1856_v25, 0.0  ;;  %v1979_v25 = vsel %vm943_vm0, %v1855_v49, 0.0 }
 0x227   : > { %7042 = vst [vmem:[#allocation45_spill] sm:$0xff] %v5739_v6  ;;  %v5742_v12 = vpop.xlane.xlu1 %1559  ;;  %v2546_v39 = vrot.slane %v5739_v6, %v5730_v55 }
 0x228   : > { %v2649_v41 = vrot.slane %v5742_v12, %v5718_v5 }
 0x229   : > { %v2548_v30 = vsel %vm2547_vm6, %v2546_v39, %v5651_v31  ;;  %1740 = vadd.xlane.f32.xlu0 %v1739_v18  ;;  %v1871_v39 = vmul.f32 %v1775_v10, %v5340_v14  ;;  %v2030_v18 = vsel %vm943_vm0, %v1872_v52, 0.0 }
 0x22a   : > { %1983 = vadd.xlane.f32.xlu1 %v1982_v48  ;;  %v5755_v6 = vpop.xlane.xlu0 %1556  ;;  %v5759_v15 = vsel %vm2554_vm7, %v2553_v60, %v2548_v30  ;;  %v1888_v60 = vmul.f32 %v1792_v38, %v5316_v59  ;;  %v1791_v30 = vld [vmem:[%s5037_s29 + $0x170] sm:$0xff] }
 0x22b   : > { %7043 = vst [vmem:[#allocation46_spill] sm:$0xff] %v5755_v6  ;;  %v1672_v43 = vpop.xlane.xlu1 %1671  ;;  %v2644_v44 = vrot.slane %v5755_v6, %v5730_v55  ;;  %v1808_v6 = vld [vmem:[%s5037_s29 + $0x1f8] sm:$0xff]  ;;  %v1887_v52 = vmul.f32 %v1791_v30, %v5323_v62 }
 0x22c   : > { %v2762_v31 = vrot.slane %v1672_v43, %v5718_v5 }
 0x22d   : > { %v2645_v46 = vsel %vm2547_vm6, %v2644_v44, %v5665_v50  ;;  %1980 = vadd.xlane.f32.xlu0 %v1979_v25  ;;  %v2027_v50 = vsel %vm943_vm0, %v1871_v39, 0.0  ;;  %v2078_v44 = vsel %vm943_vm0, %v1888_v60, 0.0  ;;  %v1904_v25 = vmul.f32 %v1808_v6, %v5327_v36 }
 0x22e   : > { %2031 = vadd.xlane.f32.xlu1 %v2030_v18  ;;  %v1669_v48 = vpop.xlane.xlu0 %1668  ;;  %v5773_v43 = vsel %vm2554_vm7, %v2649_v41, %v2645_v46  ;;  %v1807_v41 = vld [vmem:[%s5037_s29 + $0x1f0] sm:$0xff]  ;;  %v1812_v18 = vld [vmem:[%s5037_s29 + $0x218] sm:$0xff] }
 0x22f   : > { %v1720_v49 = vpop.xlane.xlu1 %1719  ;;  %v2757_v10 = vrot.slane %v1669_v48, %v5730_v55  ;;  %v1903_v60 = vmul.f32 %v1807_v41, %v5340_v14 }
 0x230   : > { %v2841_v35 = vrot.slane %v1720_v49, %v5718_v5  ;;  %v2126_v49 = vsel %vm943_vm0, %v1904_v25, 0.0  ;;  %v1824_v5 = vld [vmem:[%s5037_s29 + $0x278] sm:$0xff] }
 0x231   : > { %v2758_v38 = vsel %vm2547_vm6, %v2757_v10, %v5677_v19  ;;  %2028 = vadd.xlane.f32.xlu0 %v2027_v50  ;;  %v2075_v19 = vsel %vm943_vm0, %v1887_v52, 0.0  ;;  %v1908_v10 = vmul.f32 %v1812_v18, %v5008_v0  ;;  %v2123_v41 = vsel %vm943_vm0, %v1903_v60, 0.0 }
 0x232   : > { %2079 = vadd.xlane.f32.xlu1 %v2078_v44  ;;  %v1717_v46 = vpop.xlane.xlu0 %1716  ;;  %v5786_v48 = vsel %vm2554_vm7, %v2762_v31, %v2758_v38  ;;  %v1813_v31 = vld [vmem:[%s5037_s29 + $0x220] sm:$0xff]  ;;  %v1814_v38 = vld [vmem:[%s5037_s29 + $0x228] sm:$0xff] }
 0x233   : > { %v5788_v39 = vpop.xlane.xlu1 %1959  ;;  %v2836_v30 = vrot.slane %v1717_v46, %v5730_v55  ;;  %v2138_v25 = vsel %vm943_vm0, %v1908_v10, 0.0  ;;  %v1910_v0 = vmul.f32 %v1814_v38, %v5056_v9  ;;  %v1815_v46 = vld [vmem:[%s5037_s29 + $0x230] sm:$0xff]  ;;  %v1818_v10 = vld [vmem:[%s5037_s29 + $0x248] sm:$0xff]  ;;  %v2556_v38 = vadd.s32 4294967232, %v5375_v23 }
 0x235   : > { %v2837_v6 = vsel %vm2547_vm6, %v2836_v30, %v5690_v1  ;;  %2076 = vadd.xlane.f32.xlu0 %v2075_v19  ;;  %v1909_v1 = vmul.f32 %v1813_v31, %v5058_v22  ;;  %v1816_v30 = vld [vmem:[%s5037_s29 + $0x238] sm:$0xff]  ;;  %v2144_v22 = vsel %vm943_vm0, %v1910_v0, 0.0  ;;  %v1819_v0 = vld [vmem:[%s5037_s29 + $0x250] sm:$0xff] }
 0x236   : > { %2127 = vadd.xlane.f32.xlu1 %v2126_v49  ;;  %v5798_v50 = vpop.xlane.xlu0 %1956  ;;  %v5802_v44 = vsel %vm2554_vm7, %v2841_v35, %v2837_v6  ;;  %v1911_v6 = vmul.f32 %v1815_v46, %v5103_v20  ;;  %v1912_v60 = vmul.f32 %v1816_v30, %v5099_v42  ;;  %v1817_v49 = vld [vmem:[%s5037_s29 + $0x240] sm:$0xff]  ;;  %v2563_v20 = vadd.s32 4294967224, %v5375_v23  ;;  %v1820_v30 = vld [vmem:[%s5037_s29 + $0x258] sm:$0xff] }
 0x237   : > { %v5804_v52 = vpop.xlane.xlu1 %2007  ;;  %v2141_v19 = vsel %vm943_vm0, %v1909_v1, 0.0  ;;  %v1913_v1 = vmul.f32 %v1817_v49, %v5170_v17  ;;  %v1914_v42 = vmul.f32 %v1818_v10, %v5160_v40  ;;  %v1916_v49 = vmul.f32 %v1820_v30, %v5202_v33  ;;  %v1821_v10 = vld [vmem:[%s5037_s29 + $0x260] sm:$0xff] }
 0x238   : > { %v1917_v33 = vmul.f32 %v1821_v10, %v5253_v26 }
 0x239   : > { %2124 = vadd.xlane.f32.xlu0 %v2123_v41  ;;  %v2147_v41 = vsel %vm943_vm0, %v1911_v6, 0.0  ;;  %v5839_v6 = vsub.s32 %v2556_v38, %v5382_v11  ;;  %v2153_v17 = vsel %vm943_vm0, %v1913_v1, 0.0  ;;  %v2156_v40 = vsel %vm943_vm0, %v1914_v42, 0.0  ;;  %v1822_v38 = vld [vmem:[%s5037_s29 + $0x268] sm:$0xff] }
 0x23a   : > { %2139 = vadd.xlane.f32.xlu1 %v2138_v25  ;;  %v5811_v18 = vpop.xlane.xlu0 %2004  ;;  %v2150_v25 = vsel %vm943_vm0, %v1912_v60, 0.0  ;;  %v1915_v60 = vmul.f32 %v1819_v0, %v5204_v37  ;;  %v2162_v0 = vsel %vm943_vm0, %v1916_v49, 0.0  ;;  %v1918_v30 = vmul.f32 %v1822_v38, %v5244_v63 }
 0x23b   : > { %v5814_v35 = vpop.xlane.xlu1 %2055  ;;  %7047 = vst [vmem:[#allocation50_spill] sm:$0xff] %v5839_v6  ;;  %v2165_v49 = vsel %vm943_vm0, %v1917_v33, 0.0 }
 0x23c   : > { %7044 = vst [vmem:[#allocation47_spill] sm:$0xff] %v5814_v35  ;;  %v2159_v1 = vsel %vm943_vm0, %v1915_v60, 0.0  ;;  %v2168_v38 = vsel %vm943_vm0, %v1918_v30, 0.0 }
 0x23d   : > { %2142 = vadd.xlane.f32.xlu0 %v2141_v19 }
 0x23e   : > { %2145 = vadd.xlane.f32.xlu1 %v2144_v22  ;;  %v5821_v9 = vpop.xlane.xlu0 %2052  ;;  %v5842_v22 = vsub.s32 %v2563_v20, %v5382_v11 }
 0x23f   : > { %v5824_v31 = vpop.xlane.xlu1 %2103 }
 0x240   : > { %7045 = vst [vmem:[#allocation48_spill] sm:$0xff] %v5824_v31  ;;  %7048 = vst [vmem:[#allocation51_spill] sm:$0xff] %v5842_v22 }
 0x241   : > { %2148 = vadd.xlane.f32.xlu0 %v2147_v41 }
 0x242   : > { %2151 = vadd.xlane.f32.xlu1 %v2150_v25  ;;  %v5833_v46 = vpop.xlane.xlu0 %2100 }
 0x243   : > { %7046 = vst [vmem:[#allocation49_spill] sm:$0xff] %v5833_v46  ;;  %v5836_v19 = vpop.xlane.xlu1 %1517 }
 0x244   : > { %v2567_v37 = vrot.slane %v5836_v19, %v5842_v22 }
 0x245   : > { %2154 = vadd.xlane.f32.xlu0 %v2153_v17  ;;  %v1823_v17 = vld [vmem:[%s5037_s29 + $0x270] sm:$0xff] }
 0x246   : > { %2157 = vadd.xlane.f32.xlu1 %v2156_v40  ;;  %v5849_v41 = vpop.xlane.xlu0 %1514  ;;  %v1919_v63 = vmul.f32 %v1823_v17, %v5323_v62 }
 0x247   : > { %v5852_v25 = vpop.xlane.xlu1 %1565  ;;  %v2560_v20 = vrot.slane %v5849_v41, %v5839_v6 }
 0x249   : > { %v2562_v42 = vsel %vm2561_vm8, %v2560_v20, %v5759_v15  ;;  %2160 = vadd.xlane.f32.xlu0 %v2159_v1  ;;  %v2659_v15 = vrot.slane %v5852_v25, %v5842_v22  ;;  %v1920_v20 = vmul.f32 %v1824_v5, %v5316_v59 }
 0x24a   : > { %2163 = vadd.xlane.f32.xlu1 %v2162_v0  ;;  %v5865_v40 = vpop.xlane.xlu0 %1562  ;;  %v5869_v55 = vsel %vm2568_vm9, %v2567_v37, %v2562_v42  ;;  %v1825_v37 = vld [vmem:[%s5037_s29 + $0x280] sm:$0xff]  ;;  %v1826_v42 = vld [vmem:[%s5037_s29 + $0x288] sm:$0xff] }
 0x24b   : > { %v1678_v60 = vpop.xlane.xlu1 %1677  ;;  %v2654_v26 = vrot.slane %v5865_v40, %v5839_v6  ;;  %v1921_v30 = vmul.f32 %v1825_v37, %v5000_v51  ;;  %v2174_v5 = vsel %vm943_vm0, %v1920_v20, 0.0 }
 0x24c   : > { %v2772_v17 = vrot.slane %v1678_v60, %v5842_v22 }
 0x24d   : > { %v2655_v10 = vsel %vm2561_vm8, %v2654_v26, %v5773_v43  ;;  %2166 = vadd.xlane.f32.xlu0 %v2165_v49  ;;  %v2171_v43 = vsel %vm943_vm0, %v1919_v63, 0.0  ;;  %v1922_v26 = vmul.f32 %v1826_v42, %v4985_v28  ;;  %v1829_v42 = vld [vmem:[%s5037_s29 + $0x2a0] sm:$0xff] }
 0x24e   : > { %2169 = vadd.xlane.f32.xlu1 %v2168_v38  ;;  %v1675_v1 = vpop.xlane.xlu0 %1674  ;;  %v5884_v0 = vsel %vm2568_vm9, %v2659_v15, %v2655_v10  ;;  %v1827_v15 = vld [vmem:[%s5037_s29 + $0x290] sm:$0xff]  ;;  %v1828_v10 = vld [vmem:[%s5037_s29 + $0x298] sm:$0xff]  ;;  %v2177_v38 = vsel %vm943_vm0, %v1921_v30, 0.0 }
 0x24f   : > { %v1726_v33 = vpop.xlane.xlu1 %1725  ;;  %v2767_v62 = vrot.slane %v1675_v1, %v5839_v6  ;;  %v1923_v20 = vmul.f32 %v1827_v15, %v5021_v8  ;;  %v2180_v37 = vsel %vm943_vm0, %v1922_v26, 0.0  ;;  %v1924_v1 = vmul.f32 %v1828_v10, %v5014_v4  ;;  %v1832_v26 = vld [vmem:[%s5037_s29 + $0x2b8] sm:$0xff] }
 0x251   : > { %v2768_v59 = vsel %vm2561_vm8, %v2767_v62, %v5786_v48  ;;  %2172 = vadd.xlane.f32.xlu0 %v2171_v43  ;;  %v2851_v48 = vrot.slane %v1726_v33, %v5842_v22  ;;  %v2183_v8 = vsel %vm943_vm0, %v1923_v20, 0.0  ;;  %v2186_v30 = vsel %vm943_vm0, %v1924_v1, 0.0 }
 0x252   : > { %2175 = vadd.xlane.f32.xlu1 %v2174_v5  ;;  %v1723_v49 = vpop.xlane.xlu0 %1722  ;;  %v5897_v60 = vsel %vm2568_vm9, %v2772_v17, %v2768_v59  ;;  %v1830_v17 = vld [vmem:[%s5037_s29 + $0x2a8] sm:$0xff]  ;;  %v1831_v59 = vld [vmem:[%s5037_s29 + $0x2b0] sm:$0xff] }
 0x253   : > { %v5899_v63 = vpop.xlane.xlu1 %1965  ;;  %v2846_v51 = vrot.slane %v1723_v49, %v5839_v6  ;;  %v1926_v4 = vmul.f32 %v1830_v17, %v5065_v56  ;;  %v1927_v10 = vmul.f32 %v1831_v59, %v5115_v16  ;;  %v2577_v16 = vadd.s32 4294967208, %v5375_v23  ;;  %v1835_v17 = vld [vmem:[%s5037_s29 + $0x2d0] sm:$0xff] }
 0x255   : > { %v2847_v28 = vsel %vm2561_vm8, %v2846_v51, %v5802_v44  ;;  %2178 = vadd.xlane.f32.xlu0 %v2177_v38  ;;  %v1925_v44 = vmul.f32 %v1829_v42, %v5073_v2  ;;  %v2192_v2 = vsel %vm943_vm0, %v1926_v4, 0.0  ;;  %v1928_v51 = vmul.f32 %v1832_v26, %v5105_v58  ;;  %v1834_v38 = vld [vmem:[%s5037_s29 + $0x2c8] sm:$0xff] }
 0x256   : > { %2181 = vadd.xlane.f32.xlu1 %v2180_v37  ;;  %v5910_v62 = vpop.xlane.xlu0 %1962  ;;  %v5914_v33 = vsel %vm2568_vm9, %v2851_v48, %v2847_v28  ;;  %v1833_v48 = vld [vmem:[%s5037_s29 + $0x2c0] sm:$0xff]  ;;  %v2570_v28 = vadd.s32 4294967216, %v5375_v23  ;;  %v2195_v37 = vsel %vm943_vm0, %v1927_v10, 0.0  ;;  %v1930_v58 = vmul.f32 %v1834_v38, %v5175_v53 }
 0x257   : > { %v5916_v43 = vpop.xlane.xlu1 %2013  ;;  %v2189_v49 = vsel %vm943_vm0, %v1925_v44, 0.0  ;;  %v1929_v1 = vmul.f32 %v1833_v48, %v5181_v27  ;;  %v2198_v42 = vsel %vm943_vm0, %v1928_v51, 0.0  ;;  %v1836_v44 = vld [vmem:[%s5037_s29 + $0x2d8] sm:$0xff]  ;;  %v5954_v59 = vsub.s32 %v2577_v16, %v5382_v11  ;;  %v1837_v10 = vld [vmem:[%s5037_s29 + $0x2e0] sm:$0xff]  ;;  %v1838_v51 = vld [vmem:[%s5037_s29 + $0x2e8] sm:$0xff] }
 0x258   : > { %v5951_v4 = vsub.s32 %v2570_v28, %v5382_v11  ;;  %v1931_v26 = vmul.f32 %v1835_v17, %v5219_v45  ;;  %v2204_v53 = vsel %vm943_vm0, %v1930_v58, 0.0  ;;  %v1840_v17 = vld [vmem:[%s5037_s29 + $0x2f8] sm:$0xff] }
 0x259   : > { %2184 = vadd.xlane.f32.xlu0 %v2183_v8  ;;  %7053 = vst [vmem:[#allocation56_spill] sm:$0xff] %v5954_v59  ;;  %v2201_v27 = vsel %vm943_vm0, %v1929_v1, 0.0  ;;  %v1934_v1 = vmul.f32 %v1838_v51, %v5257_v57 }
 0x25a   : > { %2187 = vadd.xlane.f32.xlu1 %v2186_v30  ;;  %v5923_v5 = vpop.xlane.xlu0 %2010  ;;  %7052 = vst [vmem:[#allocation55_spill] sm:$0xff] %v5951_v4  ;;  %v2207_v28 = vsel %vm943_vm0, %v1931_v26, 0.0 }
 0x25b   : > { %v5926_v15 = vpop.xlane.xlu1 %2061 }
 0x25c   : > { %7049 = vst [vmem:[#allocation52_spill] sm:$0xff] %v5926_v15 }
 0x25d   : > { %2190 = vadd.xlane.f32.xlu0 %v2189_v49  ;;  %v1932_v49 = vmul.f32 %v1836_v44, %v5211_v13  ;;  %v1933_v13 = vmul.f32 %v1837_v10, %v5268_v47  ;;  %v1936_v10 = vmul.f32 %v1840_v17, %v5327_v36 }
 0x25e   : > { %2193 = vadd.xlane.f32.xlu1 %v2192_v2  ;;  %v5933_v56 = vpop.xlane.xlu0 %2058 }
 0x25f   : > { %v5936_v20 = vpop.xlane.xlu1 %2109  ;;  %v2210_v16 = vsel %vm943_vm0, %v1932_v49, 0.0  ;;  %v2216_v49 = vsel %vm943_vm0, %v1934_v1, 0.0 }
 0x260   : > { %7050 = vst [vmem:[#allocation53_spill] sm:$0xff] %v5936_v20 }
 0x261   : > { %2196 = vadd.xlane.f32.xlu0 %v2195_v37 }
 0x262   : > { %2199 = vadd.xlane.f32.xlu1 %v2198_v42  ;;  %v5945_v8 = vpop.xlane.xlu0 %2106  ;;  %v1839_v42 = vld [vmem:[%s5037_s29 + $0x2f0] sm:$0xff]  ;;  %s4264_s29 = scalar_lea.vmem %s4263_s15, 512 }
 0x263   : > { %7051 = vst [vmem:[#allocation54_spill] sm:$0xff] %v5945_v8  ;;  %v5948_v30 = vpop.xlane.xlu1 %1523  ;;  %p4266_p4 = scmp.lt.s32.totalorder %s4264_s29, %s4258_s28 }
 0x264   : > { %v2581_v45 = vrot.slane %v5948_v30, %v5954_v59 }
 0x265   : > { %2202 = vadd.xlane.f32.xlu0 %v2201_v27  ;;  %p4267_p5 = por %p4266_p4, %p4265_p3 }
 0x266   : > { %2205 = vadd.xlane.f32.xlu1 %v2204_v53  ;;  %v5961_v2 = vpop.xlane.xlu0 %1520  ;;  %v1935_v53 = vmul.f32 %v1839_v42, %v5340_v14 }
 0x267   : > { %v5964_v48 = vpop.xlane.xlu1 %1571  ;;  %v2574_v38 = vrot.slane %v5961_v2, %v5951_v4  ;;  %p4268_p7 = pnand %p4267_p5, %p4261_p2 }
 0x268   : > { %v2669_v47 = vrot.slane %v5964_v48, %v5954_v59 }
 0x269   : > { %v2576_v37 = vsel %vm6992_vm10, %v2574_v38, %v5869_v55  ;;  %2208 = vadd.xlane.f32.xlu0 %v2207_v28  ;;  %v2213_v55 = vsel %vm943_vm0, %v1933_v13, 0.0  ;;  %v2219_v13 = vsel %vm943_vm0, %v1935_v53, 0.0 }
 0x26a   : > { %2211 = vadd.xlane.f32.xlu1 %v2210_v16  ;;  %v5977_v58 = vpop.xlane.xlu0 %1568  ;;  %v2583_v44 = vsel %vm6991_vm11, %v2581_v45, %v2576_v37 }
 0x26b   : > { %v1684_v27 = vpop.xlane.xlu1 %1683  ;;  %v2664_v26 = vrot.slane %v5977_v58, %v5951_v4 }
 0x26c   : > { %v2782_v37 = vrot.slane %v1684_v27, %v5954_v59 }
 0x26d   : > { %v2665_v57 = vsel %vm6992_vm10, %v2664_v26, %v5884_v0  ;;  %2214 = vadd.xlane.f32.xlu0 %v2213_v55  ;;  %v2222_v0 = vsel %vm943_vm0, %v1936_v10, 0.0  ;;  %v2584_v10 = vadd.s32 4294967200, %v5375_v23  ;;  %vm3751_vm0 = vcmask 1040384  }
 0x26e   : > { %2217 = vadd.xlane.f32.xlu1 %v2216_v49  ;;  %v1681_v51 = vpop.xlane.xlu0 %1680  ;;  %v2670_v38 = vsel %vm6991_vm11, %v2669_v47, %v2665_v57 }
 0x26f   : > { %v1732_v45 = vpop.xlane.xlu1 %1731  ;;  %v2777_v28 = vrot.slane %v1681_v51, %v5951_v4  ;;  %v2591_v51 = vadd.s32 4294967192, %v5375_v23 }
 0x270   : > { %v2861_v17 = vrot.slane %v1732_v45, %v5954_v59 }
 0x271   : > { %v2778_v14 = vsel %vm6992_vm10, %v2777_v28, %v5897_v60  ;;  %2220 = vadd.xlane.f32.xlu0 %v2219_v13  ;;  %v6025_v28 = vsub.s32 %v2584_v10, %v5382_v11  ;;  %v2257_v13 = vld [vmem:[%s6927_s5] sm:$0x7] }
 0x272   : > { %2223 = vadd.xlane.f32.xlu1 %v2222_v0  ;;  %v1729_v16 = vpop.xlane.xlu0 %1728  ;;  %v2783_v36 = vsel %vm6991_vm11, %v2782_v37, %v2778_v14  ;;  %v6028_v37 = vsub.s32 %v2591_v51, %v5382_v11 }
 0x273   : > { %v5999_v1 = vpop.xlane.xlu1 %1971  ;;  %v2856_v42 = vrot.slane %v1729_v16, %v5951_v4  ;;  %7058 = vst [vmem:[#allocation61_spill] sm:$0xff] %v6025_v28 }
 0x274   : > { %7059 = vst [vmem:[#allocation62_spill] sm:$0xff] %v6028_v37 }
 0x275   : > { %v2857_v27 = vsel %vm6992_vm10, %v2856_v42, %v5914_v33 }
 0x276   : > { %v6005_v26 = vpop.xlane.xlu0 %1968  ;;  %v2862_v60 = vsel %vm6991_vm11, %v2861_v17, %v2857_v27 }
 0x277   : > { %v6008_v47 = vpop.xlane.xlu1 %2019 }
 0x27a   : > { %v6010_v55 = vpop.xlane.xlu0 %2016 }
 0x27b   : > { %v6012_v53 = vpop.xlane.xlu1 %2067 }
 0x27c   : > { %7054 = vst [vmem:[#allocation57_spill] sm:$0xff] %v6012_v53 }
 0x27e   : > { %v6014_v57 = vpop.xlane.xlu0 %2064 }
 0x27f   : > { %7055 = vst [vmem:[#allocation58_spill] sm:$0xff] %v6014_v57  ;;  %v6016_v49 = vpop.xlane.xlu1 %2115 }
 0x280   : > { %7056 = vst [vmem:[#allocation59_spill] sm:$0xff] %v6016_v49 }
 0x282   : > { %v6020_v45 = vpop.xlane.xlu0 %2112 }
 0x283   : > { %7057 = vst [vmem:[#allocation60_spill] sm:$0xff] %v6020_v45  ;;  %v6022_v33 = vpop.xlane.xlu1 %1529 }
 0x284   : > { %v2595_v42 = vrot.slane %v6022_v33, %v6028_v37 }
 0x286   : > { %v6033_v14 = vpop.xlane.xlu0 %1526 }
 0x287   : > { %v6035_v0 = vpop.xlane.xlu1 %1577  ;;  %v2588_v16 = vrot.slane %v6033_v14, %v6025_v28  ;;  %2260 = vperm.xlu0 %4128, %v2257_v13  }
 0x288   : > { %v2679_v22 = vrot.slane %v6035_v0, %v6028_v37 }
 0x289   : > { %v2590_v17 = vsel %vm2589_vm12, %v2588_v16, %v2583_v44 }
 0x28a   : > { %v6042_v27 = vpop.xlane.xlu0 %1574  ;;  %v2597_v10 = vsel %vm2596_vm13, %v2595_v42, %v2590_v17 }
 0x28b   : > { %v1690_v51 = vpop.xlane.xlu1 %1689  ;;  %v2674_v59 = vrot.slane %v6042_v27, %v6025_v28 }
 0x28c   : > { %v2792_v44 = vrot.slane %v1690_v51, %v6028_v37 }
 0x28d   : > { %v2675_v4 = vsel %vm2589_vm12, %v2674_v59, %v2670_v38 }
 0x28e   : > { %v1687_v13 = vpop.xlane.xlu0 %1686  ;;  %v2680_v6 = vsel %vm2596_vm13, %v2679_v22, %v2675_v4 }
 0x28f   : > { %v1738_v49 = vpop.xlane.xlu1 %1737  ;;  %v2787_v20 = vrot.slane %v1687_v13, %v6025_v28 }
 0x290   : > { %v2871_v53 = vrot.slane %v1738_v49, %v6028_v37  ;;  %v2605_v49 = vadd.s32 4294967176, %v5375_v23 }
 0x291   : > { %v2788_v16 = vsel %vm2589_vm12, %v2787_v20, %v2783_v36 }
 0x292   : > { %v1735_v42 = vpop.xlane.xlu0 %1734  ;;  %v2793_v17 = vsel %vm2596_vm13, %v2792_v44, %v2788_v16  ;;  %v2598_v44 = vadd.s32 4294967184, %v5375_v23 }
 0x293   : > { %v6055_v31 = vpop.xlane.xlu1 %1977  ;;  %v2866_v45 = vrot.slane %v1735_v42, %v6025_v28 }
 0x295   : > { %v2867_v59 = vsel %vm2589_vm12, %v2866_v45, %v2862_v60  ;;  %v6083_v45 = vsub.s32 %v2605_v49, %v5382_v11 }
 0x296   : > { %v6060_v38 = vpop.xlane.xlu0 %1974  ;;  %v2872_v22 = vsel %vm2596_vm13, %v2871_v53, %v2867_v59  ;;  %v6080_v53 = vsub.s32 %v2598_v44, %v5382_v11 }
 0x297   : > { %v6063_v4 = vpop.xlane.xlu1 %2025  ;;  %7066 = vst [vmem:[#allocation69_spill] sm:$0xff] %v6083_v45 }
 0x298   : > { %7060 = vst [vmem:[#allocation63_spill] sm:$0xff] %v6063_v4  ;;  %7065 = vst [vmem:[#allocation68_spill] sm:$0xff] %v6080_v53 }
 0x29a   : > { %v6065_v51 = vpop.xlane.xlu0 %2022 }
 0x29b   : > { %v6067_v20 = vpop.xlane.xlu1 %2073 }
 0x29c   : > { %7061 = vst [vmem:[#allocation64_spill] sm:$0xff] %v6067_v20 }
 0x29e   : > { %v6069_v36 = vpop.xlane.xlu0 %2070 }
 0x29f   : > { %7062 = vst [vmem:[#allocation65_spill] sm:$0xff] %v6069_v36  ;;  %v6071_v13 = vpop.xlane.xlu1 %2121 }
 0x2a0   : > { %7063 = vst [vmem:[#allocation66_spill] sm:$0xff] %v6071_v13 }
 0x2a2   : > { %v6075_v16 = vpop.xlane.xlu0 %2118 }
 0x2a3   : > { %7064 = vst [vmem:[#allocation67_spill] sm:$0xff] %v6075_v16  ;;  %v6077_v60 = vpop.xlane.xlu1 %1535 }
 0x2a4   : > { %v2609_v23 = vrot.slane %v6077_v60, %v6083_v45 }
 0x2a6   : > { %v6085_v42 = vpop.xlane.xlu0 %1532 }
 0x2a7   : > { %v1584_v59 = vpop.xlane.xlu1 %1583  ;;  %v2602_v37 = vrot.slane %v6085_v42, %v6080_v53 }
 0x2a8   : > { %v2689_v20 = vrot.slane %v1584_v59, %v6083_v45 }
 0x2a9   : > { %v2604_v28 = vsel %vm2603_vm14, %v2602_v37, %v2597_v10 }
 0x2aa   : > { %v2611_v13 = vsel %vm2610_vm15, %v2609_v23, %v2604_v28  ;;  %v6093_v44 = vpop.xlane.xlu0 %1580 }
 0x2ab   : > { %v1696_v16 = vpop.xlane.xlu1 %1695  ;;  %v2684_v49 = vrot.slane %v6093_v44, %v6080_v53 }
 0x2ac   : > { %v2802_v36 = vrot.slane %v1696_v16, %v6083_v45 }
 0x2ad   : > { %v2685_v8 = vsel %vm2603_vm14, %v2684_v49, %v2680_v6 }
 0x2ae   : > { %v2690_v15 = vsel %vm2610_vm15, %v2689_v20, %v2685_v8  ;;  %v1693_v46 = vpop.xlane.xlu0 %1692 }
 0x2af   : > { %v2797_v35 = vrot.slane %v1693_v46, %v6080_v53  ;;  %v1744_v37 = vpop.xlane.xlu1 %1743 }
 0x2b0   : > { %v2881_v6 = vrot.slane %v1744_v37, %v6083_v45  ;;  %v2268_v45 = vsub.s32 1, %v5382_v11 }
 0x2b1   : > { %v2798_v28 = vsel %vm2603_vm14, %v2797_v35, %v2793_v17 }
 0x2b2   : > { %v2803_v10 = vsel %vm2610_vm15, %v2802_v36, %v2798_v28  ;;  %v1741_v23 = vpop.xlane.xlu0 %1740 }
 0x2b3   : > { %v2876_v4 = vrot.slane %v1741_v23, %v6080_v53  ;;  %v6105_v57 = vsel %vm3751_vm0, %v2611_v13, %v2803_v10 }
 0x2b4   : > { %7067 = vst [vmem:[#allocation70_spill] sm:$0xff] %v6105_v57 }
 0x2b5   : > { %v2877_v8 = vsel %vm2603_vm14, %v2876_v4, %v2872_v22 }
 0x2b6   : > { %v2882_v20 = vsel %vm2610_vm15, %v2881_v6, %v2877_v8  ;;  %v6110_v46 = vpop.xlane.xlu0 %1980 }
 0x2b7   : > { %v6112_v16 = vsel %vm3751_vm0, %v2690_v15, %v2882_v20  ;;  %vm3743_vm0 = vcmask 1043459  }
 0x2b8   : > { %7068 = vst [vmem:[#allocation71_spill] sm:$0xff] %v6112_v16 }
 0x2ba   : > { %v6114_v49 = vpop.xlane.xlu0 %2028 }
 0x2be   : > { %v6116_v35 = vpop.xlane.xlu0 %2076 }
 0x2bf   : > { %7069 = vst [vmem:[#allocation72_spill] sm:$0xff] %v6116_v35 }
 0x2c2   : > { %v6118_v17 = vpop.xlane.xlu0 %2124 }
 0x2c3   : > { %7070 = vst [vmem:[#allocation73_spill] sm:$0xff] %v6118_v17 }
 0x2c6   : > { %v6120_v36 = vpop.xlane.xlu0 %2142 }
 0x2c7   : > { %7071 = vst [vmem:[#allocation74_spill] sm:$0xff] %v6120_v36  ;;  %v6217_v36 = vsub.f32 1.0, %v5399_v32 }
 0x2c9   : > { %7092 = vst [vmem:[#allocation95_spill] sm:$0xff] %v6217_v36 }
 0x2ca   : > { %v6122_v13 = vpop.xlane.xlu0 %2148 }
 0x2cb   : > { %7072 = vst [vmem:[#allocation75_spill] sm:$0xff] %v6122_v13 }
 0x2ce   : > { %v6124_v28 = vpop.xlane.xlu0 %2154 }
 0x2cf   : > { %7073 = vst [vmem:[#allocation76_spill] sm:$0xff] %v6124_v28 }
 0x2d2   : > { %v6126_v37 = vpop.xlane.xlu0 %2160 }
 0x2d3   : > { %7074 = vst [vmem:[#allocation77_spill] sm:$0xff] %v6126_v37 }
 0x2d6   : > { %v6128_v22 = vpop.xlane.xlu0 %2166 }
 0x2d7   : > { %7075 = vst [vmem:[#allocation78_spill] sm:$0xff] %v6128_v22  ;;  %v2264_v22 = vsub.s32 0, %v5382_v11 }
 0x2da   : > { %v6130_v4 = vpop.xlane.xlu0 %2172 }
 0x2db   : > { %7076 = vst [vmem:[#allocation79_spill] sm:$0xff] %v6130_v4 }
 0x2de   : > { %v6132_v15 = vpop.xlane.xlu0 %2178 }
 0x2df   : > { %7077 = vst [vmem:[#allocation80_spill] sm:$0xff] %v6132_v15  ;;  %v6152_v15 = vsub.f32 1.0, %v5513_v7  ;;  %v6172_v7 = vsub.f32 1.0, %v6035_v0 }
 0x2e1   : > { %7082 = vst [vmem:[#allocation85_spill] sm:$0xff] %v6152_v15 }
 0x2e2   : > { %v6134_v10 = vpop.xlane.xlu0 %2184 }
 0x2e3   : > { %7078 = vst [vmem:[#allocation81_spill] sm:$0xff] %v6134_v10  ;;  %v6164_v10 = vsub.f32 1.0, %v5964_v48  ;;  %v2272_v48 = vsub.s32 2, %v5382_v11  ;;  %v6204_v11 = vsub.f32 1.0, %v5396_v34  ;;  %v6223_v34 = vsub.f32 1.0, %v6093_v44 }
 0x2e5   : > { %7090 = vst [vmem:[#allocation93_spill] sm:$0xff] %v6204_v11 }
 0x2e6   : > { %v6136_v23 = vpop.xlane.xlu0 %2190 }
 0x2e7   : > { %7079 = vst [vmem:[#allocation82_spill] sm:$0xff] %v6136_v23  ;;  %v6155_v23 = vsub.f32 1.0, %v5634_v3  ;;  %v6174_v3 = vsub.f32 1.0, %v1584_v59 }
 0x2ea   : > { %v6138_v6 = vpop.xlane.xlu0 %2196 }
 0x2eb   : > { %7080 = vst [vmem:[#allocation83_spill] sm:$0xff] %v6138_v6  ;;  %v6158_v6 = vsub.f32 1.0, %v5742_v12 }
 0x2ee   : > { %v6140_v8 = vpop.xlane.xlu0 %2202 }
 0x2ef   : > { %7081 = vst [vmem:[#allocation84_spill] sm:$0xff] %v6140_v8  ;;  %v6161_v8 = vsub.f32 1.0, %v5852_v25 }
 0x2f2   : > { %v6142_v20 = vpop.xlane.xlu0 %2208 }
 0x2f6   : > { %v6144_v16 = vpop.xlane.xlu0 %2214 }
 0x2fa   : > { %v6146_v57 = vpop.xlane.xlu0 %2220 }
 0x302   : > { %v2261_v53 = vpop.permute.xlu0 %2260 }
 0x303   : > { %v6149_v4 = vrot.slane %v2261_v53, %v2268_v45  ;;  %v6201_v13 = vrot.slane %v2261_v53, %v2264_v22  ;;  %v6220_v22 = vsub.f32 1.0, %v6042_v27 }
 0x305   : > { %v6169_v45 = vmul.f32 %v6149_v4, %v6152_v15  ;;  %v6178_v12 = vmul.f32 %v6149_v4, %v6155_v23  ;;  %v6182_v25 = vmul.f32 %v6149_v4, %v6158_v6  ;;  %v6187_v37 = vmul.f32 %v6149_v4, %v6161_v8 }
 0x306   : > { %v6191_v0 = vmul.f32 %v6149_v4, %v6164_v10  ;;  %v6195_v59 = vmul.f32 %v6149_v4, %v6172_v7  ;;  %v6199_v28 = vmul.f32 %v6149_v4, %v6174_v3 }
 0x307   : > { %7083 = vst [vmem:[#allocation86_spill] sm:$0xff] %v6169_v45  ;;  %7084 = vst [vmem:[#allocation87_spill] sm:$0xff] %v6178_v12  ;;  %v6256_v12 = vsub.f32 1.0, %v5525_v24  ;;  %v7102_v24 = vld [vmem:[#allocation16_spill] sm:$0xff] }
 0x308   : > { %7085 = vst [vmem:[#allocation88_spill] sm:$0xff] %v6182_v25  ;;  %7086 = vst [vmem:[#allocation89_spill] sm:$0xff] %v6187_v37  ;;  %v6206_v25 = vrot.slane %v2261_v53, %v2272_v48  ;;  %v6209_v37 = vsub.f32 1.0, %v5865_v40  ;;  %v6226_v53 = vsub.f32 1.0, %v5429_v61 }
 0x309   : > { %7087 = vst [vmem:[#allocation90_spill] sm:$0xff] %v6191_v0  ;;  %7088 = vst [vmem:[#allocation91_spill] sm:$0xff] %v6195_v59  ;;  %v6212_v0 = vsub.f32 1.0, %v5977_v58  ;;  %v2278_v59 = vmul.f32 %v6201_v13, %v6204_v11  ;;  %v2295_v45 = vmul.f32 %v6201_v13, %v6256_v12  ;;  %v7105_v11 = vld [vmem:[#allocation46_spill] sm:$0xff] }
 0x30a   : > { %7089 = vst [vmem:[#allocation92_spill] sm:$0xff] %v6199_v28  ;;  %7091 = vst [vmem:[#allocation94_spill] sm:$0xff] %v6206_v25  ;;  %v6230_v40 = vmul.f32 %v6206_v25, %v6209_v37  ;;  %v6236_v32 = vmul.f32 %v6206_v25, %v6164_v10  ;;  %v2369_v27 = vmul.f32 %v6206_v25, %v6220_v22 }
 0x30b   : > { %7093 = vst [vmem:[#allocation96_spill] sm:$0xff] %v6226_v53  ;;  %v2367_v58 = vmul.f32 %v6206_v25, %v6212_v0  ;;  %v6242_v44 = vmul.f32 %v6206_v25, %v6172_v7  ;;  %v2371_v61 = vmul.f32 %v6206_v25, %v6223_v34  ;;  %v6248_v48 = vmul.f32 %v6206_v25, %v6174_v3  ;;  %v7099_v25 = vld [vmem:[#allocation8_spill] sm:$0xff] }
 0x30c   : > { %7094 = vst [vmem:[#allocation97_spill] sm:$0xff] %v6230_v40  ;;  %7095 = vst [vmem:[#allocation98_spill] sm:$0xff] %v6236_v32  ;;  %v2293_v40 = vmul.f32 %v6201_v13, %v6226_v53  ;;  %v2374_v28 = vadd.f32 %v2278_v59, %v5445_v54  ;;  %v2294_v32 = vmul.f32 %v6201_v13, %v6217_v36  ;;  %v7100_v59 = vld [vmem:[#allocation33_spill] sm:$0xff]  ;;  %v6271_v36 = vsub.f32 1.0, %v7102_v24 }
 0x30d   : > { %7096 = vst [vmem:[#allocation99_spill] sm:$0xff] %v6242_v44  ;;  %7097 = vst [vmem:[#allocation100_spill] sm:$0xff] %v6248_v48  ;;  %v6259_v44 = vsub.f32 1.0, %v5415_v29  ;;  %v6268_v35 = vsub.f32 1.0, %v7100_v59  ;;  %v6285_v59 = vpop.xlane.xlu1 %1983  ;;  %v7107_v24 = vld [vmem:[#allocation21_spill] sm:$0xff] }
 0x30e   : > { %7098 = vst [vmem:[#allocation101_spill] sm:$0xff] %v6256_v12  ;;  %2985 = vperm.xlu1 %4129, %v2374_v28   ;;  %v2389_v48 = vadd.f32 %v2293_v40, %v5474_v21  ;;  %v2390_v54 = vadd.f32 %v2294_v32, %v7099_v25  ;;  %v7103_v28 = vld [vmem:[#allocation22_spill] sm:$0xff]  ;;  %v2280_v21 = vmul.f32 %v6201_v13, %v6271_v36  ;;  %v7104_v40 = vld [vmem:[#allocation9_spill] sm:$0xff]  ;;  %v6280_v25 = vsub.f32 1.0, %v7105_v11 }
 0x30f   : > { %v2277_v17 = vmul.f32 %v6201_v13, %v6259_v44  ;;  %7101 = vst [vmem:[#allocation8_spill] sm:$0xff] %v6268_v35  ;;  %v2297_v29 = vmul.f32 %v6201_v13, %v6268_v35  ;;  %v2391_v12 = vadd.f32 %v2295_v45, %v7103_v28  ;;  %v2296_v45 = vmul.f32 %v6201_v13, %v6152_v15 }
 0x310   : > { %3030 = vperm.xlu0 %4128, %v2389_v48   ;;  %v2299_v32 = vmul.f32 %v6201_v13, %v6280_v25  ;;  %v7106_v48 = vld [vmem:[#allocation37_spill] sm:$0xff]  ;;  %v2376_v28 = vadd.f32 %v2280_v21, %v7107_v24  ;;  %v6291_v35 = vsub.f32 1.0, %v5849_v41  ;;  %v7110_v21 = vld [vmem:[#allocation30_spill] sm:$0xff]  ;;  %v6314_v15 = vsub.f32 1.0, %v5961_v2 }
 0x311   : > { %v2373_v53 = vadd.f32 %v2277_v17, %v7104_v40  ;;  %v7108_v17 = vld [vmem:[#allocation19_spill] sm:$0xff]  ;;  %v6303_v24 = vsub.f32 1.0, %v7110_v21  ;;  %v6305_v41 = vpop.xlane.xlu1 %2031  ;;  %v2298_v2 = vmul.f32 %v6201_v13, %v6155_v23 }
 0x312   : > { %3033 = vperm.xlu1 %4129, %v2390_v54   ;;  %v2393_v54 = vadd.f32 %v2297_v29, %v7106_v48  ;;  %v6294_v11 = vsub.f32 1.0, %v7108_v17  ;;  %v7109_v40 = vld [vmem:[#allocation23_spill] sm:$0xff] }
 0x313   : > { %v2392_v48 = vadd.f32 %v2296_v45, %v7109_v40  ;;  %v6317_v45 = vadd.f32 %v2367_v58, %v6142_v20  ;;  %v6323_v40 = vadd.f32 %v2371_v61, %v6146_v57  ;;  %v7112_v20 = vld [vmem:[#allocation34_spill] sm:$0xff]  ;;  %v2303_v57 = vmul.f32 %v6201_v13, %v6212_v0  ;;  %v7114_v61 = vld [vmem:[#allocation36_spill] sm:$0xff] }
 0x314   : > { %3036 = vperm.xlu0 %4128, %v2391_v12   ;;  %v2285_v12 = vmul.f32 %v6201_v13, %v6291_v35  ;;  %v2279_v29 = vmul.f32 %v6201_v13, %v6294_v11  ;;  %v2394_v21 = vadd.f32 %v2298_v2, %v7114_v61 }
 0x316   : > { %2982 = vperm.xlu1 %4129, %v2373_v53   ;;  %v2395_v53 = vadd.f32 %v2299_v32, %v5811_v18  ;;  %v2282_v18 = vmul.f32 %v6201_v13, %v6303_v24  ;;  %v7111_v32 = vld [vmem:[#allocation20_spill] sm:$0xff] }
 0x317   : > { %v2375_v17 = vadd.f32 %v2279_v29, %v7111_v32  ;;  %v6328_v29 = vpop.xlane.xlu1 %2079 }
 0x318   : > { %3042 = vperm.xlu0 %4128, %v2393_v54   ;;  %v2301_v54 = vmul.f32 %v6201_v13, %v6209_v37  ;;  %v2378_v58 = vadd.f32 %v2282_v18, %v7112_v20 }
 0x31a   : > { %2991 = vperm.xlu1 %4129, %v2376_v28   ;;  %v2381_v28 = vadd.f32 %v2285_v12, %v5910_v62  ;;  %v2287_v62 = vmul.f32 %v6201_v13, %v6314_v15  ;;  %v2397_v12 = vadd.f32 %v2301_v54, %v5923_v5  ;;  %v6343_v54 = vsub.f32 1.0, %v6033_v14 }
 0x31b   : > { %v6348_v32 = vpop.xlane.xlu1 %2127  ;;  %v6357_v14 = vsub.f32 1.0, %v6085_v42  ;;  %v2305_v42 = vmul.f32 %v6201_v13, %v6220_v22 }
 0x31c   : > { %3048 = vperm.xlu0 %4128, %v2395_v53   ;;  %v6320_v53 = vadd.f32 %v2369_v27, %v6144_v16  ;;  %v2383_v27 = vadd.f32 %v2287_v62, %v6005_v26  ;;  %v2399_v26 = vadd.f32 %v2303_v57, %v6010_v55  ;;  %v2300_v55 = vmul.f32 %v6201_v13, %v6158_v6 }
 0x31d   : > { %v2291_v20 = vmul.f32 %v6201_v13, %v6357_v14 }
 0x31e   : > { %3039 = vperm.xlu1 %4129, %v2392_v48   ;;  %v7113_v48 = vld [vmem:[#allocation32_spill] sm:$0xff] }
 0x31f   : > { %v6334_v16 = vsub.f32 1.0, %v7113_v48  ;;  %v6362_v48 = vpop.xlane.xlu1 %2139  ;;  %v2387_v61 = vadd.f32 %v2291_v20, %v6110_v46 }
 0x320   : > { %3006 = vperm.xlu0 %4128, %v2381_v28   ;;  %v7115_v28 = vld [vmem:[#allocation43_spill] sm:$0xff] }
 0x321   : > { %v2281_v5 = vmul.f32 %v6201_v13, %v6334_v16  ;;  %v6346_v18 = vsub.f32 1.0, %v7115_v28  ;;  %v6377_v28 = vsub.f32 1.0, %v5836_v19 }
 0x322   : > { %2988 = vperm.xlu1 %4129, %v2375_v17   ;;  %v2289_v17 = vmul.f32 %v6201_v13, %v6343_v54 }
 0x323   : > { %v2284_v62 = vmul.f32 %v6201_v13, %v6346_v18  ;;  %v2286_v46 = vmul.f32 %v6201_v13, %v6377_v28 }
 0x324   : > { %3054 = vperm.xlu0 %4128, %v2397_v12   ;;  %v7116_v12 = vld [vmem:[#allocation35_spill] sm:$0xff] }
 0x325   : > { %v2377_v2 = vadd.f32 %v2281_v5, %v7116_v12  ;;  %v2380_v57 = vadd.f32 %v2284_v62, %v5788_v39  ;;  %v6379_v39 = vpop.xlane.xlu1 %2145  ;;  %v2382_v20 = vadd.f32 %v2286_v46, %v5899_v63  ;;  %v2313_v63 = vmul.f32 %v6149_v4, %v6334_v16 }
 0x326   : > { %2997 = vperm.xlu1 %4129, %v2378_v58   ;;  %v2385_v58 = vadd.f32 %v2289_v17, %v6060_v38  ;;  %v2307_v17 = vmul.f32 %v6201_v13, %v6223_v34 }
 0x328   : > { %3012 = vperm.xlu0 %4128, %v2383_v27   ;;  %v7117_v27 = vld [vmem:[#allocation45_spill] sm:$0xff]  ;;  %v2403_v19 = vadd.f32 %v2307_v17, %v6114_v49  ;;  %v7120_v17 = vld [vmem:[#allocation39_spill] sm:$0xff] }
 0x329   : > { %v6368_v5 = vsub.f32 1.0, %v7117_v27  ;;  %v6390_v12 = vpop.xlane.xlu1 %2151 }
 0x32a   : > { %3045 = vperm.xlu1 %4129, %v2394_v21   ;;  %v2396_v21 = vadd.f32 %v2300_v55, %v5804_v52  ;;  %v2309_v52 = vmul.f32 %v6149_v4, %v6259_v44 }
 0x32b   : > { %v2283_v38 = vmul.f32 %v6201_v13, %v6368_v5 }
 0x32c   : > { %3060 = vperm.xlu0 %4128, %v2399_v26   ;;  %v2401_v26 = vadd.f32 %v2305_v42, %v6065_v51  ;;  %v6396_v51 = vsub.f32 1.0, %v5948_v30  ;;  %v7119_v30 = vld [vmem:[#allocation24_spill] sm:$0xff] }
 0x32d   : > { %v2379_v62 = vadd.f32 %v2283_v38, %v5798_v50  ;;  %v2311_v50 = vmul.f32 %v6149_v4, %v6294_v11  ;;  %v6404_v27 = vpop.xlane.xlu1 %2157 }
 0x32e   : > { %2994 = vperm.xlu1 %4129, %v2377_v2   ;;  %v2302_v2 = vmul.f32 %v6201_v13, %v6161_v8  ;;  %v2288_v49 = vmul.f32 %v6201_v13, %v6396_v51 }
 0x32f   : > { %v2407_v42 = vadd.f32 %v2311_v50, %v7119_v30  ;;  %v2306_v50 = vmul.f32 %v6201_v13, %v6172_v7  ;;  %v7123_v7 = vld [vmem:[#allocation65_spill] sm:$0xff] }
 0x330   : > { %3018 = vperm.xlu0 %4128, %v2385_v58   ;;  %v7118_v58 = vld [vmem:[#allocation12_spill] sm:$0xff]  ;;  %v2384_v38 = vadd.f32 %v2288_v49, %v5999_v1  ;;  %v6424_v1 = vsub.f32 1.0, %v6077_v60 }
 0x331   : > { %v2405_v55 = vadd.f32 %v2309_v52, %v7118_v58  ;;  %v6418_v46 = vpop.xlane.xlu1 %2163 }
 0x332   : > { %3003 = vperm.xlu1 %4129, %v2380_v57   ;;  %v2398_v57 = vadd.f32 %v2302_v2, %v5916_v43  ;;  %v2315_v43 = vmul.f32 %v6149_v4, %v6368_v5 }
 0x334   : > { %3024 = vperm.xlu0 %4128, %v2387_v61   ;;  %v2304_v61 = vmul.f32 %v6201_v13, %v6164_v10  ;;  %v2411_v10 = vadd.f32 %v2315_v43, %v5821_v9  ;;  %v2321_v9 = vmul.f32 %v6149_v4, %v6343_v54 }
 0x336   : > { %3051 = vperm.xlu1 %4129, %v2396_v21   ;;  %v6413_v21 = vsub.f32 1.0, %v6022_v33  ;;  %v2400_v52 = vadd.f32 %v2304_v61, %v6008_v47  ;;  %v2317_v33 = vmul.f32 %v6149_v4, %v6291_v35  ;;  %v2319_v47 = vmul.f32 %v6149_v4, %v6314_v15 }
 0x338   : > { %3066 = vperm.xlu0 %4128, %v2401_v26   ;;  %v2409_v26 = vadd.f32 %v2313_v63, %v7120_v17  ;;  %v2413_v60 = vadd.f32 %v2317_v33, %v5933_v56  ;;  %v7122_v63 = vld [vmem:[#allocation63_spill] sm:$0xff]  ;;  %v2323_v56 = vmul.f32 %v6149_v4, %v6357_v14  ;;  %v7125_v17 = vld [vmem:[#allocation96_spill] sm:$0xff] }
 0x339   : > { %v2402_v30 = vadd.f32 %v2306_v50, %v7122_v63  ;;  %v7130_v50 = vld [vmem:[#allocation25_spill] sm:$0xff]  ;;  %v2316_v63 = vmul.f32 %v6149_v4, %v6346_v18 }
 0x33a   : > { %3000 = vperm.xlu1 %4129, %v2379_v62   ;;  %v2290_v62 = vmul.f32 %v6201_v13, %v6413_v21 }
 0x33c   : > { %3072 = vperm.xlu0 %4128, %v2403_v19   ;;  %v2292_v19 = vmul.f32 %v6201_v13, %v6424_v1  ;;  %v2386_v2 = vadd.f32 %v2290_v62, %v6055_v31  ;;  %v7121_v31 = vld [vmem:[#allocation58_spill] sm:$0xff]  ;;  %v2312_v62 = vmul.f32 %v6149_v4, %v6271_v36 }
 0x33e   : > { %3009 = vperm.xlu1 %4129, %v2382_v20   ;;  %v6432_v20 = vpop.xlane.xlu1 %2169  ;;  %v2388_v58 = vadd.f32 %v2292_v19, %v6285_v59  ;;  %v2417_v59 = vadd.f32 %v2321_v9, %v7123_v7  ;;  %v7131_v9 = vld [vmem:[#allocation8_spill] sm:$0xff] }
 0x340   : > { %3078 = vperm.xlu0 %4128, %v2405_v55   ;;  %v2415_v55 = vadd.f32 %v2319_v47, %v7121_v31  ;;  %v2329_v31 = vmul.f32 %v6149_v4, %v7131_v9 }
 0x342   : > { %3057 = vperm.xlu1 %4129, %v2398_v57   ;;  %v6443_v49 = vpop.xlane.xlu1 %2175  ;;  %v2308_v57 = vmul.f32 %v6201_v13, %v6174_v3  ;;  %v2325_v13 = vmul.f32 %v6149_v4, %v7125_v17  ;;  %v7126_v3 = vld [vmem:[#allocation72_spill] sm:$0xff] }
 0x344   : > { %3084 = vperm.xlu0 %4128, %v2407_v42   ;;  %v7124_v42 = vld [vmem:[#allocation93_spill] sm:$0xff] }
 0x345   : > { %v2310_v61 = vmul.f32 %v6149_v4, %v7124_v42 }
 0x346   : > { %3015 = vperm.xlu1 %4129, %v2384_v38   ;;  %v2404_v38 = vadd.f32 %v2308_v57, %v6305_v41  ;;  %v6454_v43 = vpop.xlane.xlu1 %2181  ;;  %v7129_v41 = vld [vmem:[#allocation15_spill] sm:$0xff] }
 0x348   : > { %3090 = vperm.xlu0 %4128, %v2409_v26   ;;  %v2419_v26 = vadd.f32 %v2323_v56, %v7126_v3  ;;  %v7135_v3 = vld [vmem:[#allocation47_spill] sm:$0xff] }
 0x34a   : > { %3063 = vperm.xlu1 %4129, %v2400_v52   ;;  %v7127_v52 = vld [vmem:[#allocation10_spill] sm:$0xff]  ;;  %v6465_v47 = vpop.xlane.xlu1 %2187 }
 0x34b   : > { %v2406_v33 = vadd.f32 %v2310_v61, %v7127_v52  ;;  %v7134_v61 = vld [vmem:[#allocation42_spill] sm:$0xff]  ;;  %v7136_v52 = vld [vmem:[#allocation49_spill] sm:$0xff] }
 0x34c   : > { %3096 = vperm.xlu0 %4128, %v2411_v10   ;;  %v7128_v10 = vld [vmem:[#allocation101_spill] sm:$0xff] }
 0x34d   : > { %v2327_v19 = vmul.f32 %v6149_v4, %v7128_v10 }
 0x34e   : > { %3021 = vperm.xlu1 %4129, %v2386_v2   ;;  %v2421_v2 = vadd.f32 %v2325_v13, %v7129_v41  ;;  %v6476_v7 = vpop.xlane.xlu1 %2193  ;;  %v2318_v13 = vmul.f32 %v6149_v4, %v6377_v28  ;;  %v2320_v41 = vmul.f32 %v6149_v4, %v6396_v51 }
 0x350   : > { %3102 = vperm.xlu0 %4128, %v2413_v60   ;;  %v2314_v60 = vmul.f32 %v6149_v4, %v6303_v24 }
 0x352   : > { %3027 = vperm.xlu1 %4129, %v2388_v58   ;;  %v2408_v58 = vadd.f32 %v2312_v62, %v7130_v50  ;;  %v2333_v62 = vmul.f32 %v6149_v4, %v6209_v37  ;;  %v2335_v50 = vmul.f32 %v6149_v4, %v6212_v0  ;;  %v7139_v37 = vld [vmem:[#allocation57_spill] sm:$0xff]  ;;  %v7141_v0 = vld [vmem:[#allocation64_spill] sm:$0xff] }
 0x354   : > { %3108 = vperm.xlu0 %4128, %v2415_v55   ;;  %v7132_v55 = vld [vmem:[#allocation26_spill] sm:$0xff] }
 0x355   : > { %v2423_v57 = vadd.f32 %v2327_v19, %v7132_v55  ;;  %v6487_v19 = vpop.xlane.xlu1 %2199  ;;  %v2322_v55 = vmul.f32 %v6149_v4, %v6413_v21 }
 0x356   : > { %3069 = vperm.xlu1 %4129, %v2402_v30   ;;  %v7133_v30 = vld [vmem:[#allocation38_spill] sm:$0xff] }
 0x357   : > { %v2410_v56 = vadd.f32 %v2314_v60, %v7133_v30  ;;  %v2337_v30 = vmul.f32 %v6149_v4, %v6220_v22 }
 0x358   : > { %3114 = vperm.xlu0 %4128, %v2417_v59   ;;  %v2331_v59 = vmul.f32 %v6149_v4, %v6280_v25 }
 0x35a   : > { %3075 = vperm.xlu1 %4129, %v2404_v38   ;;  %v2425_v38 = vadd.f32 %v2329_v31, %v7134_v61  ;;  %v2324_v61 = vmul.f32 %v6149_v4, %v6424_v1 }
 0x35c   : > { %3120 = vperm.xlu0 %4128, %v2419_v26   ;;  %v2412_v26 = vadd.f32 %v2316_v63, %v7135_v3  ;;  %v6498_v63 = vpop.xlane.xlu1 %2205  ;;  %v7142_v3 = vld [vmem:[#allocation67_spill] sm:$0xff]  ;;  %v2420_v22 = vadd.f32 %v2324_v61, %v6328_v29  ;;  %v7149_v29 = vld [vmem:[#allocation86_spill] sm:$0xff] }
 0x35e   : > { %3081 = vperm.xlu1 %4129, %v2406_v33   ;;  %v2427_v33 = vadd.f32 %v2331_v59, %v7136_v52  ;;  %v7143_v52 = vld [vmem:[#allocation95_spill] sm:$0xff] }
 0x360   : > { %3126 = vperm.xlu0 %4128, %v2421_v2   ;;  %v7137_v2 = vld [vmem:[#allocation52_spill] sm:$0xff] }
 0x361   : > { %v2414_v60 = vadd.f32 %v2318_v13, %v7137_v2  ;;  %v2339_v13 = vmul.f32 %v6149_v4, %v6223_v34 }
 0x362   : > { %3087 = vperm.xlu1 %4129, %v2408_v58   ;;  %v7138_v58 = vld [vmem:[#allocation54_spill] sm:$0xff] }
 0x363   : > { %v2429_v31 = vadd.f32 %v2333_v62, %v7138_v58  ;;  %v6509_v62 = vpop.xlane.xlu1 %2211  ;;  %v7146_v58 = vld [vmem:[#allocation11_spill] sm:$0xff] }
 0x364   : > { %3132 = vperm.xlu0 %4128, %v2423_v57   ;;  %v2416_v57 = vadd.f32 %v2320_v41, %v7139_v37  ;;  %v7144_v41 = vld [vmem:[#allocation94_spill] sm:$0xff]  ;;  %v7147_v37 = vld [vmem:[#allocation17_spill] sm:$0xff] }
 0x365   : > { %v2341_v2 = vmul.f32 %v7144_v41, %v6259_v44  ;;  %v2345_v44 = vmul.f32 %v7144_v41, %v6334_v16  ;;  %v2349_v16 = vmul.f32 %v7144_v41, %v6291_v35  ;;  %v7163_v35 = vld [vmem:[#allocation90_spill] sm:$0xff] }
 0x366   : > { %3093 = vperm.xlu1 %4129, %v2410_v56   ;;  %v7140_v56 = vld [vmem:[#allocation60_spill] sm:$0xff] }
 0x367   : > { %v2431_v59 = vadd.f32 %v2335_v50, %v7140_v56  ;;  %v6518_v34 = vpop.xlane.xlu1 %2217  ;;  %v7150_v56 = vld [vmem:[#allocation29_spill] sm:$0xff] }
 0x368   : > { %3138 = vperm.xlu0 %4128, %v2425_v38   ;;  %v2418_v38 = vadd.f32 %v2322_v55, %v7141_v0  ;;  %v2343_v55 = vmul.f32 %v7144_v41, %v6294_v11  ;;  %v7151_v0 = vld [vmem:[#allocation40_spill] sm:$0xff]  ;;  %v2347_v11 = vmul.f32 %v7144_v41, %v6368_v5 }
 0x36a   : > { %3099 = vperm.xlu1 %4129, %v2412_v26   ;;  %v2433_v26 = vadd.f32 %v2337_v30, %v7142_v3  ;;  %v7153_v3 = vld [vmem:[#allocation74_spill] sm:$0xff] }
 0x36b   : > { %v6528_v61 = vpop.xlane.xlu1 %2223 }
 0x36c   : > { %3144 = vperm.xlu0 %4128, %v2427_v33   ;;  %v2326_v33 = vmul.f32 %v6149_v4, %v7143_v52  ;;  %v2437_v4 = vadd.f32 %v2341_v2, %v7147_v37 }
 0x36e   : > { %3105 = vperm.xlu1 %4129, %v2414_v60   ;;  %v7145_v60 = vld [vmem:[#allocation73_spill] sm:$0xff] }
 0x36f   : > { %v2435_v50 = vadd.f32 %v2339_v13, %v7145_v60 }
 0x370   : > { %3150 = vperm.xlu0 %4128, %v2429_v31   ;;  %v2422_v31 = vadd.f32 %v2326_v33, %v7146_v58  ;;  %v7154_v33 = vld [vmem:[#allocation48_spill] sm:$0xff] }
 0x372   : > { %3111 = vperm.xlu1 %4129, %v2416_v57   ;;  %v7148_v57 = vld [vmem:[#allocation27_spill] sm:$0xff] }
 0x373   : > { %v2424_v30 = vadd.f32 %v7149_v29, %v7148_v57  ;;  %v7159_v57 = vld [vmem:[#allocation7_spill] sm:$0xff] }
 0x374   : > { %3156 = vperm.xlu0 %4128, %v2431_v59   ;;  %v2439_v59 = vadd.f32 %v2343_v55, %v7150_v56  ;;  %v7158_v55 = vld [vmem:[#allocation89_spill] sm:$0xff]  ;;  %v2351_v56 = vmul.f32 %v7144_v41, %v6314_v15 }
 0x376   : > { %3117 = vperm.xlu1 %4129, %v2418_v38   ;;  %v7152_v38 = vld [vmem:[#allocation87_spill] sm:$0xff] }
 0x377   : > { %v2426_v13 = vadd.f32 %v7152_v38, %v7151_v0  ;;  %v7162_v38 = vld [vmem:[#allocation59_spill] sm:$0xff] }
 0x378   : > { %3162 = vperm.xlu0 %4128, %v2433_v26   ;;  %v2441_v26 = vadd.f32 %v2345_v44, %v7153_v3 }
 0x37a   : > { %3123 = vperm.xlu1 %4129, %v2420_v22   ;;  %v7155_v22 = vld [vmem:[#allocation88_spill] sm:$0xff] }
 0x37b   : > { %v2428_v2 = vadd.f32 %v7155_v22, %v7154_v33 }
 0x37c   : > { %3168 = vperm.xlu0 %4128, %v2435_v50   ;;  %v7156_v50 = vld [vmem:[#allocation75_spill] sm:$0xff] }
 0x37d   : > { %v2443_v58 = vadd.f32 %v2347_v11, %v7156_v50  ;;  %v7165_v50 = vld [vmem:[#allocation77_spill] sm:$0xff] }
 0x37e   : > { %3129 = vperm.xlu1 %4129, %v2422_v31   ;;  %v7157_v31 = vld [vmem:[#allocation53_spill] sm:$0xff] }
 0x37f   : > { %v2430_v37 = vadd.f32 %v7158_v55, %v7157_v31  ;;  %v7166_v31 = vld [vmem:[#allocation66_spill] sm:$0xff] }
 0x380   : > { %3174 = vperm.xlu0 %4128, %v2437_v4  }
 0x382   : > { %3135 = vperm.xlu1 %4129, %v2424_v30   ;;  %v7160_v30 = vld [vmem:[#allocation6_spill] sm:$0xff] }
 0x384   : > { %3180 = vperm.xlu0 %4128, %v2439_v59   ;;  %v7161_v59 = vld [vmem:[#allocation76_spill] sm:$0xff] }
 0x385   : > { %v2445_v0 = vadd.f32 %v2349_v16, %v7161_v59  ;;  %v7167_v16 = vld [vmem:[#allocation91_spill] sm:$0xff] }
 0x386   : > { %3141 = vperm.xlu1 %4129, %v2426_v13   ;;  %v2432_v13 = vadd.f32 %v7163_v35, %v7162_v38  ;;  %v2434_v55 = vadd.f32 %v7167_v16, %v7166_v31  ;;  %v7171_v35 = vld [vmem:[#allocation92_spill] sm:$0xff]  ;;  %v2362_v31 = vmul.f32 %v7144_v41, %v6155_v23 }
 0x388   : > { %3186 = vperm.xlu0 %4128, %v2441_v26   ;;  %v7164_v26 = vld [vmem:[#allocation18_spill] sm:$0xff] }
 0x389   : > { %v2986_v60 = vpop.permute.xlu1 %2985 }
 0x38a   : > { %3147 = vperm.xlu1 %4129, %v2428_v2   ;;  %v2358_v2 = vmul.f32 %v7144_v41, %v7143_v52 }
 0x38b   : > { %v3031_v4 = vpop.permute.xlu0 %3030 }
 0x38c   : > { %v3351_v29 = vrot.slane %v3031_v4, %v7159_v57  ;;  %3192 = vperm.xlu0 %4128, %v2443_v58   ;;  %v2447_v58 = vadd.f32 %v2351_v56, %v7165_v50  ;;  %v7168_v4 = vld [vmem:[#allocation31_spill] sm:$0xff]  ;;  %v2454_v52 = vadd.f32 %v2358_v2, %v6454_v43  ;;  %v2342_v56 = vmul.f32 %v7144_v41, %v7124_v42  ;;  %v7173_v2 = vld [vmem:[#allocation13_spill] sm:$0xff] }
 0x38d   : > { %v3034_v5 = vpop.permute.xlu1 %3033  ;;  %v2344_v42 = vmul.f32 %v7144_v41, %v6271_v36  ;;  %v2364_v36 = vmul.f32 %v7144_v41, %v6158_v6 }
 0x38e   : > { %v3355_v44 = vrot.slane %v3034_v5, %v7160_v30  ;;  %3153 = vperm.xlu1 %4129, %v2430_v37  }
 0x38f   : > { %v3037_v11 = vpop.permute.xlu0 %3036 }
 0x390   : > { %v3356_v3 = vsel %vm2512_vm1, %v3355_v44, %v3351_v29  ;;  %v3360_v33 = vrot.slane %v3037_v11, %v7164_v26  ;;  %3198 = vperm.xlu0 %4128, %v2445_v0   ;;  %v7169_v44 = vld [vmem:[#allocation14_spill] sm:$0xff]  ;;  %v7170_v0 = vld [vmem:[#allocation85_spill] sm:$0xff] }
 0x391   : > { %v2983_v22 = vpop.permute.xlu1 %2982  ;;  %v2360_v38 = vmul.f32 %v7144_v41, %v7170_v0  ;;  %v7174_v0 = vld [vmem:[#allocation50_spill] sm:$0xff] }
 0x392   : > { %3159 = vperm.xlu1 %4129, %v2432_v13   ;;  %v3361_v15 = vsel %vm2519_vm2, %v3360_v33, %v3356_v3  ;;  %v2436_v13 = vadd.f32 %v7171_v35, %v6348_v32  ;;  %v7172_v3 = vld [vmem:[#allocation44_spill] sm:$0xff]  ;;  %v3272_v43 = vrot.slane %v2983_v22, %v7159_v57  ;;  %v2438_v32 = vadd.f32 %v2342_v56, %v7173_v2 }
 0x393   : > { %v3043_v37 = vpop.permute.xlu0 %3042  ;;  %v2456_v16 = vadd.f32 %v2360_v38, %v6465_v47  ;;  %v2458_v38 = vadd.f32 %v2362_v31, %v6476_v7 }
 0x394   : > { %v3370_v5 = vrot.slane %v3043_v37, %v7168_v4  ;;  %3204 = vperm.xlu0 %4128, %v2447_v58  }
 0x395   : > { %v2992_v29 = vpop.permute.xlu1 %2991 }
 0x396   : > { %v3286_v59 = vrot.slane %v2992_v29, %v7169_v44  ;;  %3165 = vperm.xlu1 %4129, %v2434_v55   ;;  %v3276_v29 = vrot.slane %v2986_v60, %v7160_v30  ;;  %v2346_v60 = vmul.f32 %v7144_v41, %v6303_v24  ;;  %v2460_v24 = vadd.f32 %v2364_v36, %v6487_v19 }
 0x397   : > { %v3049_v11 = vpop.permute.xlu0 %3048 }
 0x398   : > { %v3380_v33 = vrot.slane %v3049_v11, %v7172_v3  ;;  %3225 = vperm.xlu0 %4128, %v2454_v52   ;;  %v3277_v56 = vsel %vm2512_vm1, %v3276_v29, %v3272_v43  ;;  %v2442_v31 = vadd.f32 %v2346_v60, %v6379_v39  ;;  %v7176_v43 = vld [vmem:[#allocation55_spill] sm:$0xff] }
 0x399   : > { %v3040_v50 = vpop.permute.xlu1 %3039 }
 0x39a   : > { %v3365_v58 = vrot.slane %v3040_v50, %v7169_v44  ;;  %3171 = vperm.xlu1 %4129, %v2436_v13   ;;  %v7175_v50 = vld [vmem:[#allocation28_spill] sm:$0xff] }
 0x39b   : > { %v6575_v55 = vpop.permute.xlu0 %3006 }
 0x39c   : > { %v3366_v37 = vsel %vm2526_vm3, %v3365_v58, %v3361_v15  ;;  %v3311_v52 = vrot.slane %v6575_v55, %v7174_v0  ;;  %3231 = vperm.xlu0 %4128, %v2456_v16   ;;  %v2440_v15 = vadd.f32 %v2344_v42, %v6362_v48  ;;  %v2366_v58 = vmul.f32 %v7144_v41, %v6161_v8 }
 0x39d   : > { %v2989_v23 = vpop.permute.xlu1 %2988  ;;  %v3371_v47 = vsel %vm2533_vm4, %v3370_v5, %v3366_v37  ;;  %v2348_v48 = vmul.f32 %v7144_v41, %v6346_v18  ;;  %v2352_v8 = vmul.f32 %v7144_v41, %v6396_v51  ;;  %v2350_v18 = vmul.f32 %v7144_v41, %v6377_v28 }
 0x39e   : > { %v3281_v22 = vrot.slane %v2989_v23, %v7164_v26  ;;  %3177 = vperm.xlu1 %4129, %v2438_v32   ;;  %v2462_v19 = vadd.f32 %v2366_v58, %v6498_v63  ;;  %v2353_v63 = vmul.f32 %v7144_v41, %v6343_v54 }
 0x39f   : > { %v6590_v35 = vpop.permute.xlu0 %3054  ;;  %v2444_v39 = vadd.f32 %v2348_v48, %v6390_v12  ;;  %v2448_v28 = vadd.f32 %v2352_v8, %v6418_v46  ;;  %v2357_v12 = vmul.f32 %v7144_v41, %v7125_v17  ;;  %v2354_v46 = vmul.f32 %v7144_v41, %v6413_v21  ;;  %v7179_v17 = vld [vmem:[#allocation78_spill] sm:$0xff] }
 0x3a0   : > { %v3282_v13 = vsel %vm2519_vm2, %v3281_v22, %v3277_v56  ;;  %v3390_v5 = vrot.slane %v6590_v35, %v7174_v0  ;;  %3237 = vperm.xlu0 %4128, %v2458_v38   ;;  %v7177_v56 = vld [vmem:[#allocation61_spill] sm:$0xff]  ;;  %v2355_v21 = vmul.f32 %v7144_v41, %v6357_v14  ;;  %v2356_v14 = vmul.f32 %v7144_v41, %v6424_v1 }
 0x3a1   : > { %v2998_v11 = vpop.permute.xlu1 %2997  ;;  %v3287_v6 = vsel %vm2526_vm3, %v3286_v59, %v3282_v13  ;;  %v7178_v35 = vld [vmem:[#allocation41_spill] sm:$0xff]  ;;  %v2449_v13 = vadd.f32 %v2353_v63, %v7179_v17 }
 0x3a2   : > { %v3296_v7 = vrot.slane %v2998_v11, %v7175_v50  ;;  %3183 = vperm.xlu1 %4129, %v2440_v15   ;;  %v7180_v11 = vld [vmem:[#allocation80_spill] sm:$0xff] }
 0x3a3   : > { %v6603_v16 = vpop.permute.xlu0 %3012 }
 0x3a4   : > { %v3321_v42 = vrot.slane %v6603_v16, %v7176_v43  ;;  %3243 = vperm.xlu0 %4128, %v2460_v24   ;;  %v7181_v24 = vld [vmem:[#allocation68_spill] sm:$0xff] }
 0x3a5   : > { %v3046_v59 = vpop.permute.xlu1 %3045  ;;  %v7189_v16 = vld [vmem:[#allocation56_spill] sm:$0xff] }
 0x3a6   : > { %v3375_v2 = vrot.slane %v3046_v59, %v7175_v50  ;;  %3189 = vperm.xlu1 %4129, %v2442_v31   ;;  %v2450_v59 = vadd.f32 %v2354_v46, %v6432_v20  ;;  %v7183_v20 = vld [vmem:[#allocation79_spill] sm:$0xff] }
 0x3a7   : > { %v6614_v32 = vpop.permute.xlu0 %3060  ;;  %v2451_v63 = vadd.f32 %v2355_v21, %v7183_v20  ;;  %v7185_v46 = vld [vmem:[#allocation51_spill] sm:$0xff] }
 0x3a8   : > { %v3376_v37 = vsel %vm2540_vm5, %v3375_v2, %v3371_v47  ;;  %v3400_v29 = vrot.slane %v6614_v32, %v7176_v43  ;;  %3249 = vperm.xlu0 %4128, %v2462_v19   ;;  %v2446_v47 = vadd.f32 %v2350_v18, %v6404_v27  ;;  %v2359_v27 = vmul.f32 %v7144_v41, %v7128_v10  ;;  %v7182_v2 = vld [vmem:[#allocation81_spill] sm:$0xff]  ;;  %v7190_v32 = vld [vmem:[#allocation98_spill] sm:$0xff] }
 0x3a9   : > { %v2995_v23 = vpop.permute.xlu1 %2994  ;;  %v3381_v22 = vsel %vm2547_vm6, %v3380_v33, %v3376_v37  ;;  %v2361_v10 = vmul.f32 %v7144_v41, %v7131_v9  ;;  %v2363_v9 = vmul.f32 %v7144_v41, %v6280_v25  ;;  %v2452_v25 = vadd.f32 %v2356_v14, %v6443_v49  ;;  %v7186_v41 = vld [vmem:[#allocation83_spill] sm:$0xff] }
 0x3aa   : > { %v3291_v51 = vrot.slane %v2995_v23, %v7168_v4  ;;  %3195 = vperm.xlu1 %4129, %v2444_v39   ;;  %v2455_v8 = vadd.f32 %v2359_v27, %v7182_v2 }
 0x3ab   : > { %v6627_v36 = vpop.permute.xlu0 %3018 }
 0x3ac   : > { %v3292_v38 = vsel %vm2533_vm4, %v3291_v51, %v3287_v6  ;;  %v3331_v33 = vrot.slane %v6627_v36, %v7177_v56  ;;  %3207 = vperm.xlu0 %4128, %v2448_v28   ;;  %v2453_v6 = vadd.f32 %v2357_v12, %v7180_v11  ;;  %v7184_v28 = vld [vmem:[#allocation82_spill] sm:$0xff] }
 0x3ad   : > { %v3004_v60 = vpop.permute.xlu1 %3003  ;;  %v3297_v15 = vsel %vm2540_vm5, %v3296_v7, %v3292_v38  ;;  %v2457_v12 = vadd.f32 %v2361_v10, %v7184_v28 }
 0x3ae   : > { %v3306_v54 = vrot.slane %v3004_v60, %v7178_v35  ;;  %3201 = vperm.xlu1 %4129, %v2446_v47  }
 0x3af   : > { %v6640_v58 = vpop.permute.xlu0 %3024 }
 0x3b0   : > { %v3341_v48 = vrot.slane %v6640_v58, %v7181_v24  ;;  %3210 = vperm.xlu0 %4128, %v2449_v13   ;;  %v2459_v13 = vadd.f32 %v2363_v9, %v7186_v41 }
 0x3b1   : > { %v3052_v7 = vpop.permute.xlu1 %3051 }
 0x3b2   : > { %v3385_v31 = vrot.slane %v3052_v7, %v7178_v35  ;;  %3222 = vperm.xlu1 %4129, %v2453_v6   ;;  %v7187_v6 = vld [vmem:[#allocation84_spill] sm:$0xff]  ;;  %v7188_v7 = vld [vmem:[#allocation97_spill] sm:$0xff] }
 0x3b3   : > { %v3067_v19 = vpop.permute.xlu0 %3066  ;;  %v2461_v49 = vadd.f32 %v7188_v7, %v7187_v6 }
 0x3b4   : > { %v3386_v18 = vsel %vm2554_vm7, %v3385_v31, %v3381_v22  ;;  %v3410_v39 = vrot.slane %v3067_v19, %v7177_v56  ;;  %3213 = vperm.xlu0 %4128, %v2450_v59  }
 0x3b5   : > { %v3001_v37 = vpop.permute.xlu1 %3000  ;;  %v3391_v23 = vsel %vm2561_vm8, %v3390_v5, %v3386_v18 }
 0x3b6   : > { %v3301_v51 = vrot.slane %v3001_v37, %v7172_v3  ;;  %3228 = vperm.xlu1 %4129, %v2455_v8  }
 0x3b7   : > { %v3073_v22 = vpop.permute.xlu0 %3072 }
 0x3b8   : > { %v3302_v47 = vsel %vm2547_vm6, %v3301_v51, %v3297_v15  ;;  %v3420_v38 = vrot.slane %v3073_v22, %v7181_v24  ;;  %3216 = vperm.xlu0 %4128, %v2451_v63  }
 0x3b9   : > { %v3307_v5 = vsel %vm2554_vm7, %v3306_v54, %v3302_v47  ;;  %v3010_v60 = vpop.permute.xlu1 %3009 }
 0x3ba   : > { %v3312_v1 = vsel %vm2561_vm8, %v3311_v52, %v3307_v5  ;;  %v3316_v17 = vrot.slane %v3010_v60, %v7185_v46  ;;  %3234 = vperm.xlu1 %4129, %v2457_v12   ;;  %v7191_v12 = vld [vmem:[#allocation62_spill] sm:$0xff]  ;;  %v7192_v5 = vld [vmem:[#allocation69_spill] sm:$0xff] }
 0x3bb   : > { %v3079_v27 = vpop.permute.xlu0 %3078 }
 0x3bc   : > { %v3317_v15 = vsel %vm2568_vm9, %v3316_v17, %v3312_v1  ;;  %v3430_v11 = vrot.slane %v3079_v27, %v7159_v57  ;;  %3219 = vperm.xlu0 %4128, %v2452_v25  }
 0x3bd   : > { %v3058_v54 = vpop.permute.xlu1 %3057  ;;  %v3322_v55 = vsel %vm6992_vm10, %v3321_v42, %v3317_v15 }
 0x3be   : > { %v3395_v52 = vrot.slane %v3058_v54, %v7185_v46  ;;  %3240 = vperm.xlu1 %4129, %v2459_v13  }
 0x3bf   : > { %v3085_v31 = vpop.permute.xlu0 %3084 }
 0x3c0   : > { %v3396_v21 = vsel %vm2568_vm9, %v3395_v52, %v3391_v23  ;;  %v3439_v59 = vrot.slane %v3085_v31, %v7164_v26 }
 0x3c1   : > { %v3016_v10 = vpop.permute.xlu1 %3015  ;;  %v3401_v2 = vsel %vm6992_vm10, %v3400_v29, %v3396_v21  ;;  %v2464_v29 = vadd.f32 %v7190_v32, %v6509_v62 }
 0x3c2   : > { %v3326_v8 = vrot.slane %v3016_v10, %v7189_v16  ;;  %3246 = vperm.xlu1 %4129, %v2461_v49  }
 0x3c3   : > { %v3091_v42 = vpop.permute.xlu0 %3090 }
 0x3c4   : > { %v3327_v19 = vsel %vm6991_vm11, %v3326_v8, %v3322_v55  ;;  %v3449_v18 = vrot.slane %v3091_v42, %v7168_v4  ;;  %v7194_v55 = vld [vmem:[#allocation100_spill] sm:$0xff] }
 0x3c5   : > { %v3064_v37 = vpop.permute.xlu1 %3063  ;;  %v3332_v23 = vsel %vm2589_vm12, %v3331_v33, %v3327_v19  ;;  %v2468_v52 = vadd.f32 %v7194_v55, %v6528_v61 }
 0x3c6   : > { %v3405_v51 = vrot.slane %v3064_v37, %v7189_v16  ;;  %3252 = vperm.xlu1 %4129, %v6317_v45  }
 0x3c7   : > { %v3097_v14 = vpop.permute.xlu0 %3096 }
 0x3c8   : > { %v3406_v20 = vsel %vm6991_vm11, %v3405_v51, %v3401_v2  ;;  %v3459_v63 = vrot.slane %v3097_v14, %v7172_v3 }
 0x3c9   : > { %v3022_v9 = vpop.permute.xlu1 %3021  ;;  %v3411_v28 = vsel %vm2589_vm12, %v3410_v39, %v3406_v20  ;;  %v7193_v39 = vld [vmem:[#allocation99_spill] sm:$0xff] }
 0x3ca   : > { %v3336_v22 = vrot.slane %v3022_v9, %v7191_v12  ;;  %3255 = vperm.xlu1 %4129, %v2464_v29   ;;  %v2466_v1 = vadd.f32 %v7193_v39, %v6518_v34 }
 0x3cb   : > { %v3103_v36 = vpop.permute.xlu0 %3102 }
 0x3cc   : > { %v3337_v33 = vsel %vm2596_vm13, %v3336_v22, %v3332_v23  ;;  %v3469_v47 = vrot.slane %v3103_v36, %v7174_v0 }
 0x3cd   : > { %v3342_v45 = vsel %vm2603_vm14, %v3341_v48, %v3337_v33  ;;  %v3028_v62 = vpop.permute.xlu1 %3027 }
 0x3ce   : > { %v3346_v60 = vrot.slane %v3028_v62, %v7192_v5  ;;  %3258 = vperm.xlu1 %4129, %v6320_v53  }
 0x3cf   : > { %v3109_v17 = vpop.permute.xlu0 %3108 }
 0x3d0   : > { %v6712_v25 = vsel %vm2610_vm15, %v3346_v60, %v3342_v45  ;;  %v3479_v41 = vrot.slane %v3109_v17, %v7176_v43 }
 0x3d1   : > { %v3070_v13 = vpop.permute.xlu1 %3069 }
 0x3d2   : > { %v3415_v27 = vrot.slane %v3070_v13, %v7191_v12  ;;  %3261 = vperm.xlu1 %4129, %v2466_v1  }
 0x3d3   : > { %v3115_v58 = vpop.permute.xlu0 %3114 }
 0x3d4   : > { %v3416_v48 = vsel %vm2596_vm13, %v3415_v27, %v3411_v28  ;;  %v3489_v15 = vrot.slane %v3115_v58, %v7177_v56 }
 0x3d5   : > { %v3421_v53 = vsel %vm2603_vm14, %v3420_v38, %v3416_v48  ;;  %v3076_v54 = vpop.permute.xlu1 %3075 }
 0x3d6   : > { %v3425_v34 = vrot.slane %v3076_v54, %v7192_v5  ;;  %3264 = vperm.xlu1 %4129, %v6323_v40  }
 0x3d7   : > { %v3121_v6 = vpop.permute.xlu0 %3120 }
 0x3d8   : > { %v6724_v7 = vsel %vm2610_vm15, %v3425_v34, %v3421_v53  ;;  %v3499_v49 = vrot.slane %v3121_v6, %v7181_v24 }
 0x3d9   : > { %v3082_v31 = vpop.permute.xlu1 %3081 }
 0x3da   : > { %v3434_v21 = vrot.slane %v3082_v31, %v7160_v30  ;;  %3267 = vperm.xlu1 %4129, %v2468_v52  }
 0x3db   : > { %v3127_v10 = vpop.permute.xlu0 %3126 }
 0x3dc   : > { %v3435_v38 = vsel %vm2512_vm1, %v3434_v21, %v3430_v11  ;;  %v3509_v2 = vrot.slane %v3127_v10, %v7159_v57 }
 0x3dd   : > { %v3440_v40 = vsel %vm2519_vm2, %v3439_v59, %v3435_v38  ;;  %v3088_v8 = vpop.permute.xlu1 %3087 }
 0x3de   : > { %v3444_v61 = vrot.slane %v3088_v8, %v7169_v44 }
 0x3df   : > { %v3133_v42 = vpop.permute.xlu0 %3132 }
 0x3e0   : > { %v3445_v19 = vsel %vm2526_vm3, %v3444_v61, %v3440_v40  ;;  %v3518_v37 = vrot.slane %v3133_v42, %v7164_v26 }
 0x3e1   : > { %v3450_v23 = vsel %vm2533_vm4, %v3449_v18, %v3445_v19  ;;  %v3094_v51 = vpop.permute.xlu1 %3093 }
 0x3e2   : > { %v3454_v32 = vrot.slane %v3094_v51, %v7175_v50 }
 0x3e3   : > { %v3139_v29 = vpop.permute.xlu0 %3138 }
 0x3e4   : > { %v3455_v11 = vsel %vm2540_vm5, %v3454_v32, %v3450_v23  ;;  %v3528_v14 = vrot.slane %v3139_v29, %v7168_v4 }
 0x3e5   : > { %v3460_v59 = vsel %vm2547_vm6, %v3459_v63, %v3455_v11  ;;  %v3100_v20 = vpop.permute.xlu1 %3099 }
 0x3e6   : > { %v3464_v9 = vrot.slane %v3100_v20, %v7178_v35 }
 0x3e7   : > { %v3145_v28 = vpop.permute.xlu0 %3144 }
 0x3e8   : > { %v3465_v22 = vsel %vm2554_vm7, %v3464_v9, %v3460_v59  ;;  %v3538_v36 = vrot.slane %v3145_v28, %v7172_v3 }
 0x3e9   : > { %v3470_v18 = vsel %vm2561_vm8, %v3469_v47, %v3465_v22  ;;  %v3106_v33 = vpop.permute.xlu1 %3105 }
 0x3ea   : > { %v3474_v45 = vrot.slane %v3106_v33, %v7185_v46 }
 0x3eb   : > { %v3151_v62 = vpop.permute.xlu0 %3150 }
 0x3ec   : > { %v3475_v60 = vsel %vm2568_vm9, %v3474_v45, %v3470_v18  ;;  %v3548_v39 = vrot.slane %v3151_v62, %v7174_v0 }
 0x3ed   : > { %v3480_v63 = vsel %vm6992_vm10, %v3479_v41, %v3475_v60  ;;  %v3112_v1 = vpop.permute.xlu1 %3111 }
 0x3ee   : > { %v3484_v17 = vrot.slane %v3112_v1, %v7189_v16 }
 0x3ef   : > { %v3157_v13 = vpop.permute.xlu0 %3156 }
 0x3f0   : > { %v3485_v27 = vsel %vm6991_vm11, %v3484_v17, %v3480_v63  ;;  %v3558_v58 = vrot.slane %v3157_v13, %v7176_v43 }
 0x3f1   : > { %v3490_v47 = vsel %vm2589_vm12, %v3489_v15, %v3485_v27  ;;  %v3118_v48 = vpop.permute.xlu1 %3117 }
 0x3f2   : > { %v3494_v53 = vrot.slane %v3118_v48, %v7191_v12 }
 0x3f3   : > { %v3163_v54 = vpop.permute.xlu0 %3162 }
 0x3f4   : > { %v3495_v34 = vsel %vm2596_vm13, %v3494_v53, %v3490_v47  ;;  %v3568_v55 = vrot.slane %v3163_v54, %v7177_v56 }
 0x3f5   : > { %v3500_v41 = vsel %vm2603_vm14, %v3499_v49, %v3495_v34  ;;  %v3124_v52 = vpop.permute.xlu1 %3123 }
 0x3f6   : > { %v3504_v6 = vrot.slane %v3124_v52, %v7192_v5 }
 0x3f7   : > { %v3169_v31 = vpop.permute.xlu0 %3168 }
 0x3f8   : > { %v3505_v21 = vsel %vm2610_vm15, %v3504_v6, %v3500_v41  ;;  %v3578_v10 = vrot.slane %v3169_v31, %v7181_v24 }
 0x3f9   : > { %v6760_v15 = vsel %vm3743_vm0, %v3505_v21, %v6712_v25  ;;  %v3130_v38 = vpop.permute.xlu1 %3129 }
 0x3fa   : > { %v3513_v40 = vrot.slane %v3130_v38, %v7160_v30 }
 0x3fb   : > { %v3175_v8 = vpop.permute.xlu0 %3174 }
 0x3fc   : > { %v3514_v61 = vsel %vm2512_vm1, %v3513_v40, %v3509_v2  ;;  %v3588_v6 = vrot.slane %v3175_v8, %v7159_v57 }
 0x3fd   : > { %v3519_v49 = vsel %vm2519_vm2, %v3518_v37, %v3514_v61  ;;  %v3136_v42 = vpop.permute.xlu1 %3135 }
 0x3fe   : > { %v3523_v19 = vrot.slane %v3136_v42, %v7169_v44 }
 0x3ff   : > { %v3181_v23 = vpop.permute.xlu0 %3180 }
 0x400   : > { %v3524_v51 = vsel %vm2526_vm3, %v3523_v19, %v3519_v49  ;;  %v3597_v38 = vrot.slane %v3181_v23, %v7164_v26 }
 0x401   : > { %v3529_v32 = vsel %vm2533_vm4, %v3528_v14, %v3524_v51  ;;  %v3142_v29 = vpop.permute.xlu1 %3141 }
 0x402   : > { %v3533_v25 = vrot.slane %v3142_v29, %v7175_v50 }
 0x403   : > { %v3187_v11 = vpop.permute.xlu0 %3186 }
 0x404   : > { %v3534_v59 = vsel %vm2540_vm5, %v3533_v25, %v3529_v32  ;;  %v3607_v19 = vrot.slane %v3187_v11, %v7168_v4 }
 0x405   : > { %v3539_v20 = vsel %vm2547_vm6, %v3538_v36, %v3534_v59  ;;  %v3148_v9 = vpop.permute.xlu1 %3147 }
 0x406   : > { %v3543_v2 = vrot.slane %v3148_v9, %v7178_v35 }
 0x407   : > { %v3193_v37 = vpop.permute.xlu0 %3192 }
 0x408   : > { %v3544_v28 = vsel %vm2554_vm7, %v3543_v2, %v3539_v20  ;;  %v3617_v25 = vrot.slane %v3193_v37, %v7172_v3 }
 0x409   : > { %v3549_v22 = vsel %vm2561_vm8, %v3548_v39, %v3544_v28  ;;  %v3154_v18 = vpop.permute.xlu1 %3153 }
 0x40a   : > { %v3553_v33 = vrot.slane %v3154_v18, %v7185_v46 }
 0x40b   : > { %v3199_v14 = vpop.permute.xlu0 %3198 }
 0x40c   : > { %v3554_v45 = vsel %vm2568_vm9, %v3553_v33, %v3549_v22  ;;  %v3627_v11 = vrot.slane %v3199_v14, %v7174_v0 }
 0x40d   : > { %v3559_v62 = vsel %vm6992_vm10, %v3558_v58, %v3554_v45  ;;  %v3160_v60 = vpop.permute.xlu1 %3159 }
 0x40e   : > { %v3563_v63 = vrot.slane %v3160_v60, %v7189_v16 }
 0x40f   : > { %v3205_v36 = vpop.permute.xlu0 %3204 }
 0x410   : > { %v3564_v1 = vsel %vm6991_vm11, %v3563_v63, %v3559_v62  ;;  %v3637_v37 = vrot.slane %v3205_v36, %v7176_v43 }
 0x411   : > { %v3569_v17 = vsel %vm2589_vm12, %v3568_v55, %v3564_v1  ;;  %v3166_v13 = vpop.permute.xlu1 %3165 }
 0x412   : > { %v3573_v27 = vrot.slane %v3166_v13, %v7191_v12 }
 0x413   : > { %v6781_v39 = vpop.permute.xlu0 %3225 }
 0x414   : > { %v3574_v47 = vsel %vm2596_vm13, %v3573_v27, %v3569_v17 }
 0x415   : > { %v3579_v48 = vsel %vm2603_vm14, %v3578_v10, %v3574_v47  ;;  %v3172_v53 = vpop.permute.xlu1 %3171 }
 0x416   : > { %v3583_v58 = vrot.slane %v3172_v53, %v7192_v5 }
 0x417   : > { %v6786_v54 = vpop.permute.xlu0 %3231 }
 0x418   : > { %v3584_v34 = vsel %vm2610_vm15, %v3583_v58, %v3579_v48 }
 0x419   : > { %v6791_v41 = vsel %vm3743_vm0, %v3584_v34, %v6724_v7  ;;  %v3178_v55 = vpop.permute.xlu1 %3177  ;;  %vm3745_vm0 = vcmask 1044484  }
 0x41a   : > { %v3592_v52 = vrot.slane %v3178_v55, %v7160_v30 }
 0x41b   : > { %v6795_v31 = vpop.permute.xlu0 %3237 }
 0x41c   : > { %v3593_v21 = vsel %vm2512_vm1, %v3592_v52, %v3588_v6 }
 0x41d   : > { %v3184_v10 = vpop.permute.xlu1 %3183  ;;  %v3598_v49 = vsel %vm2519_vm2, %v3597_v38, %v3593_v21 }
 0x41e   : > { %v3602_v40 = vrot.slane %v3184_v10, %v7169_v44 }
 0x41f   : > { %v6800_v61 = vpop.permute.xlu0 %3243 }
 0x420   : > { %v3603_v7 = vsel %vm2526_vm3, %v3602_v40, %v3598_v49  ;;  %v7195_v40 = vld [vmem:[#allocation70_spill] sm:$0xff] }
 0x421   : > { %v3190_v42 = vpop.permute.xlu1 %3189  ;;  %v3608_v32 = vsel %vm2533_vm4, %v3607_v19, %v3603_v7 }
 0x422   : > { %v3612_v8 = vrot.slane %v3190_v42, %v7175_v50 }
 0x423   : > { %v6806_v51 = vpop.permute.xlu0 %3249 }
 0x424   : > { %v3613_v29 = vsel %vm2540_vm5, %v3612_v8, %v3608_v32  ;;  %v3671_v8 = vrot.slane %v6781_v39, %v7160_v30  ;;  %v3691_v30 = vrot.slane %v6795_v31, %v7175_v50  ;;  %v3711_v50 = vrot.slane %v6806_v51, %v7185_v46 }
 0x425   : > { %v3196_v23 = vpop.permute.xlu1 %3195  ;;  %v3618_v9 = vsel %vm2547_vm6, %v3617_v25, %v3613_v29 }
 0x426   : > { %v3622_v59 = vrot.slane %v3196_v23, %v7178_v35 }
 0x427   : > { %v3208_v20 = vpop.permute.xlu0 %3207 }
 0x428   : > { %v3623_v2 = vsel %vm2554_vm7, %v3622_v59, %v3618_v9  ;;  %v3642_v1 = vrot.slane %v3208_v20, %v7189_v16 }
 0x429   : > { %v3202_v28 = vpop.permute.xlu1 %3201  ;;  %v3628_v33 = vsel %vm2561_vm8, %v3627_v11, %v3623_v2 }
 0x42a   : > { %v3632_v22 = vrot.slane %v3202_v28, %v7185_v46 }
 0x42b   : > { %v3211_v18 = vpop.permute.xlu0 %3210 }
 0x42c   : > { %v3633_v45 = vsel %vm2568_vm9, %v3632_v22, %v3628_v33  ;;  %v3647_v14 = vrot.slane %v3211_v18, %v7177_v56 }
 0x42d   : > { %v3223_v62 = vpop.permute.xlu1 %3222  ;;  %v3638_v60 = vsel %vm6992_vm10, %v3637_v37, %v3633_v45  ;;  %vm3757_vm10 = vcmask 1044480  }
 0x42e   : > { %v3643_v13 = vsel %vm6991_vm11, %v3642_v1, %v3638_v60  ;;  %vm3754_vm11 = vcmask 1041408   ;;  %v3667_v7 = vrot.slane %v3223_v62, %v7159_v57  ;;  %v3681_v57 = vrot.slane %v6786_v54, %v7169_v44  ;;  %v7198_v62 = vld [vmem:[#allocation71_spill] sm:$0xff] }
 0x42f   : > { %v3214_v63 = vpop.permute.xlu0 %3213  ;;  %v3648_v53 = vsel %vm2589_vm12, %v3647_v14, %v3643_v13  ;;  %v3701_v44 = vrot.slane %v6800_v61, %v7178_v35 }
 0x430   : > { %v3652_v47 = vrot.slane %v3214_v63, %v7191_v12 }
 0x431   : > { %v3229_v17 = vpop.permute.xlu1 %3228 }
 0x432   : > { %v3653_v34 = vsel %vm2596_vm13, %v3652_v47, %v3648_v53  ;;  %v3676_v19 = vrot.slane %v3229_v17, %v7164_v26 }
 0x433   : > { %v3217_v27 = vpop.permute.xlu0 %3216 }
 0x434   : > { %v3657_v58 = vrot.slane %v3217_v27, %v7181_v24 }
 0x435   : > { %v3235_v48 = vpop.permute.xlu1 %3234 }
 0x436   : > { %v3658_v6 = vsel %vm2603_vm14, %v3657_v58, %v3653_v34  ;;  %v3686_v23 = vrot.slane %v3235_v48, %v7168_v4 }
 0x437   : > { %v3220_v36 = vpop.permute.xlu0 %3219 }
 0x438   : > { %v3662_v55 = vrot.slane %v3220_v36, %v7192_v5 }
 0x439   : > { %v3241_v52 = vpop.permute.xlu1 %3240 }
 0x43a   : > { %v3663_v21 = vsel %vm2610_vm15, %v3662_v55, %v3658_v6  ;;  %v3696_v20 = vrot.slane %v3241_v52, %v7172_v3 }
 0x43b   : > { %v3746_v10 = vsel %vm3745_vm0, %v3663_v21, %v6760_v15  ;;  %v3672_v15 = vsel %vm2512_vm1, %v3671_v8, %v3667_v7  ;;  %vm7196_vm1 = vcmask 720512  }
 0x43c   : > { %v3755_v49 = vsel %vm3754_vm11, %v7195_v40, %v3746_v10  ;;  %v3677_v29 = vsel %vm2519_vm2, %v3676_v19, %v3672_v15  ;;  %vm7197_vm2 = vcmask 786112  }
 0x43d   : > { %v3247_v38 = vpop.permute.xlu1 %3246  ;;  %v3758_v42 = vsel %vm3757_vm10, %v3755_v49, 0.0  ;;  %v3682_v26 = vsel %vm2526_vm3, %v3681_v57, %v3677_v29 }
 0x43e   : > { %3760 = vst [vmem:[%s6838_s14] sm:$0xff] %v3758_v42  ;;  %v3687_v59 = vsel %vm2533_vm4, %v3686_v23, %v3682_v26  ;;  %v3706_v4 = vrot.slane %v3247_v38, %v7174_v0 }
 0x43f   : > { %v3692_v9 = vsel %vm2540_vm5, %v3691_v30, %v3687_v59 }
 0x440   : > { %v3697_v2 = vsel %vm2547_vm6, %v3696_v20, %v3692_v9 }
 0x441   : > { %v3253_v32 = vpop.permute.xlu1 %3252  ;;  %v3702_v28 = vsel %vm2554_vm7, %v3701_v44, %v3697_v2 }
 0x442   : > { %v3707_v11 = vsel %vm2561_vm8, %v3706_v4, %v3702_v28  ;;  %v3716_v3 = vrot.slane %v3253_v32, %v7176_v43 }
 0x443   : > { %v3712_v18 = vsel %vm2568_vm9, %v3711_v50, %v3707_v11 }
 0x444   : > { %v3717_v61 = vsel %vm7196_vm1, %v3716_v3, %v3712_v18 }
 0x445   : > { %v3256_v25 = vpop.permute.xlu1 %3255 }
 0x446   : > { %v3721_v31 = vrot.slane %v3256_v25, %v7189_v16 }
 0x448   : > { %v3722_v43 = vsel %vm7197_vm2, %v3721_v31, %v3717_v61 }
 0x449   : > { %v3259_v39 = vpop.permute.xlu1 %3258 }
 0x44a   : > { %v3726_v22 = vrot.slane %v3259_v39, %v7177_v56 }
 0x44c   : > { %v3727_v45 = vsel %vm2589_vm12, %v3726_v22, %v3722_v43 }
 0x44d   : > { %v3262_v54 = vpop.permute.xlu1 %3261 }
 0x44e   : > { %v3731_v35 = vrot.slane %v3262_v54, %v7191_v12 }
 0x450   : > { %v3732_v16 = vsel %vm2596_vm13, %v3731_v35, %v3727_v45 }
 0x451   : > { %v3265_v0 = vpop.permute.xlu1 %3264 }
 0x452   : > { %v3736_v33 = vrot.slane %v3265_v0, %v7181_v24 }
 0x454   : > { %v3737_v51 = vsel %vm2603_vm14, %v3736_v33, %v3732_v16 }
 0x455   : > { %v3268_v46 = vpop.permute.xlu1 %3267 }
 0x456   : > { %v3741_v56 = vrot.slane %v3268_v46, %v7192_v5 }
 0x458   : > { %v3742_v12 = vsel %vm2610_vm15, %v3741_v56, %v3737_v51 }
 0x459   : > { %v3748_v24 = vsel %vm3745_vm0, %v3742_v12, %v6791_v41 }
 0x45a   : > { %v3756_v37 = vsel %vm3754_vm11, %v7198_v62, %v3748_v24 }
 0x45b   : > { %v3759_v5 = vsel %vm3757_vm10, %v3756_v37, 0.0 }
 0x45c   : > { %3761 = vst [vmem:[%s6838_s14 + $0x8] sm:$0xff] %v3759_v5 }
 0x45d   : > { %4271 = shalt.err (!%p4268_p7)
}
 0x45e   : > { %s4272_s8 = scalar_lea.hbm %s6884_s21, 256  ;;  %s4276_s13 = scalar_lea.hbm %s6929_s7, 1024 }
 0x45f   : > { %p4273_p9 = scmp.ne.s32.totalorder %s6884_s21, %s4272_s8  ;;  %p4277_p12 = scmp.lt.s32.totalorder %s6884_s21, %s6929_s7 }
 0x460   : > { %p4278_p13 = scmp.lt.s32.totalorder %s4276_s13, %s4272_s8 }
 0x461   : > { %p4274_p10 = pnand %p4273_p9, %p4401_p6 }
 0x462   : > { %p4279_p0 = por %p4278_p13, %p4277_p12 }
 0x463   : > { %p4275_p11 = pneg %p4274_p10 }
 0x465   : > { %p4280_p1 = pnand %p4279_p0, %p4275_p11 }
 0x467   : > { %4283 = shalt.err (!%p4280_p1)
}
 0x468   : > { %4088 = dma.vmem_to_hbm [thread:$0]  (%p4401_p6), %s3787_s17, 256, %s6884_s21, %s3768_s22  }
 0x469 PF: > { %p4094_p2 = scmp.ge.s32.totalorder %s4318_s27, 2  ;;  %s3806_s18 = sand.u32 1, %s4306_s24  }
 0x46a   : > { %s3807_s19 = scalar_lea.sflag [#allocation4], %s3806_s18 }
 0x46b   : > { %p4091_p3 = pnand %p4094_p2, %p4405_p8 }
 0x46d   : > { %p4092_p4 = pneg %p4091_p3 }
 0x46f   : > { %4301 = dma.done.wait (%p4092_p4), %s3807_s19, 256  }
 0x470   : > { %4303 = vsyncadd (%p4092_p4), %s3807_s19, 4294967040  ;;  %p18_p5 = scmp.ge.s32.totalorder %s4387_s30, 6   ;;  %s7199_s24 = smov %s4310_s25 }
 0x471   : > { %s7200_s25 = smov %s4314_s26  ;;  %s7201_s26 = smov %s4399_s10 }
 0x472   : > { %s7202_s27 = smov %s4387_s30  ;;  %20 = sbr.rel (!%p18_p5) target bundleno = 3 (0x3), region = 143 }
 0x477   :  { %3812 = vsyncpa [#allocation4], 1 }
 0x478   :  { %3814 = vsyncpa [#allocation4 + $0x1], 1 }

</bundles_post_ra>
